<compile_context>
chip_gen: v6e
topology: v6e:2x2x1
jax: 0.10.0
libtpu: 0.0.40
codegen_flags: <defaults>
</compile_context>

<pallas_src>
import jax
import jax.numpy as jnp
from jax.experimental import pallas as pl
from jax.experimental.pallas import tpu as pltpu


def _output_block_kernel(x1_ref, x2_ref, w1_ref, b1_ref, w2_ref, b2_ref,
                         w3t_ref, b3_ref, out_ref, xp_ref, h1p_ref):
    # x1_ref/x2_ref : (1, H, W, C)       NHWC, unpadded, bf16
    # w1_ref        : (9*2C, C)          conv1 weights, im2col (dy,dx,cin) order, bf16
    # b1_ref/b2_ref : (1, C)             f32
    # w2_ref        : (9*C, C)           conv2 weights, im2col order, bf16
    # w3t_ref       : (Cout, C)          1x1 conv weights, transposed, bf16
    # b3_ref        : (Cout, 1)          f32
    # out_ref       : (1, Cout, H*W)     lane-dense f32 output
    # xp_ref        : (H+2, W+2, 2C)     zero-bordered bf16 scratch (concat([x2,x1]))
    # h1p_ref       : (H+2, W+2, C)      zero-bordered bf16 scratch (padded h1)
    H = x1_ref.shape[1]
    W = x1_ref.shape[2]
    C = x1_ref.shape[3]

    # ---- zero only the 1-pixel halo, once per call (scratch persists across
    #      grid steps; interiors are fully overwritten every step).
    @pl.when(pl.program_id(0) == 0)
    def _zero_halos():
        for ref in (xp_ref, h1p_ref):
            cdim = ref.shape[2]
            zr = jnp.zeros((1, W + 2, cdim), ref.dtype)
            zc = jnp.zeros((H + 2, 1, cdim), ref.dtype)
            ref[0:1, :, :] = zr
            ref[H + 1:H + 2, :, :] = zr
            ref[:, 0:1, :] = zc
            ref[:, W + 1:W + 2, :] = zc

    # ---- fold concat([x2, x1]) + spatial zero-pad into one VMEM scratch ----
    xp_ref[1:H + 1, 1:W + 1, 0:C] = x2_ref[0]
    xp_ref[1:H + 1, 1:W + 1, C:2 * C] = x1_ref[0]

    # ---- conv1: 3x3, 2C -> C.  im2col the 9 taps once -> one big-K matmul.
    p1 = jnp.concatenate(
        [xp_ref[dy:dy + H, dx:dx + W, :]
         for dy in range(3) for dx in range(3)], axis=-1)       # (H, W, 9*2C)
    p1f = p1.reshape(H * W, 9 * 2 * C)
    a1 = jnp.dot(p1f, w1_ref[...], preferred_element_type=jnp.float32)
    h1 = jnp.maximum(a1 + b1_ref[...], 0.0)                     # (H*W, C) f32

    # ---- conv2: 3x3, C -> C.  Same im2col scheme on the padded h1 scratch.
    h1p_ref[1:H + 1, 1:W + 1, :] = h1.reshape(H, W, C).astype(h1p_ref.dtype)
    p2 = jnp.concatenate(
        [h1p_ref[dy:dy + H, dx:dx + W, :]
         for dy in range(3) for dx in range(3)], axis=-1)       # (H, W, 9*C)
    p2f = p2.reshape(H * W, 9 * C)
    a2 = jnp.dot(p2f, w2_ref[...], preferred_element_type=jnp.float32)
    h2 = jnp.maximum(a2 + b2_ref[...], 0.0)                     # (H*W, C) f32

    # ---- conv3: 1x1, C -> Cout, emitted lane-dense as (Cout, H*W) ----
    # NT matmul: (Cout, C) x (H*W, C)^T -> (Cout, H*W); lanes = H*W (dense).
    h2b = h2.astype(w3t_ref.dtype)
    y = jax.lax.dot_general(w3t_ref[...], h2b,
                            dimension_numbers=(((1,), (1,)), ((), ())),
                            preferred_element_type=jnp.float32)
    out_ref[0] = (y + b3_ref[...]).astype(out_ref.dtype)


def output_block_pallas(x1_nchw, x2_nchw, params):
    """x1, x2: (N, C, H, W) float32.  Returns (N, Cout, H, W) float32."""
    w1, b1, w2, b2, w3, b3 = (params[k] for k in
                              ("w1", "b1", "w2", "b2", "w3", "b3"))
    N, C, H, W = x1_nchw.shape
    Cout = w3.shape[-1]
    cdt = jnp.bfloat16

    # NCHW -> NHWC fused with the bf16 cast (single XLA pass per input).
    x1 = jnp.transpose(x1_nchw, (0, 2, 3, 1)).astype(cdt)
    x2 = jnp.transpose(x2_nchw, (0, 2, 3, 1)).astype(cdt)

    # im2col weight layout: (dy, dx, cin) flattened row-major matches the
    # in-kernel tap-concat order; cin order within a tap is concat([x2, x1]).
    w1_r = w1.reshape(9 * 2 * C, C).astype(cdt)
    w2_r = w2.reshape(9 * C, C).astype(cdt)
    w3t = jnp.transpose(w3).astype(cdt)                 # (Cout, C)
    b1r = b1.reshape(1, C).astype(jnp.float32)
    b2r = b2.reshape(1, C).astype(jnp.float32)
    b3r = b3.reshape(Cout, 1).astype(jnp.float32)

    full = lambda a: pl.BlockSpec(a.shape, lambda b: (0,) * a.ndim)

    out_flat = pl.pallas_call(
        _output_block_kernel,
        out_shape=jax.ShapeDtypeStruct((N, Cout, H * W), jnp.float32),
        grid_spec=pltpu.PrefetchScalarGridSpec(
            num_scalar_prefetch=0,
            grid=(N,),
            in_specs=[
                pl.BlockSpec((1, H, W, C), lambda b: (b, 0, 0, 0)),   # x1
                pl.BlockSpec((1, H, W, C), lambda b: (b, 0, 0, 0)),   # x2
                full(w1_r),   # (9*2C, C)
                full(b1r),    # (1, C)
                full(w2_r),   # (9*C, C)
                full(b2r),    # (1, C)
                full(w3t),    # (Cout, C)
                full(b3r),    # (Cout, 1)
            ],
            out_specs=pl.BlockSpec((1, Cout, H * W), lambda b: (b, 0, 0)),
            scratch_shapes=[
                pltpu.VMEM((H + 2, W + 2, 2 * C), cdt),   # padded concat input
                pltpu.VMEM((H + 2, W + 2, C), cdt),       # padded h1
            ],
        ),
        compiler_params=pltpu.CompilerParams(
            dimension_semantics=("arbitrary",),
            vmem_limit_bytes=48 * 1024 * 1024),
    )(x1, x2, w1_r, b1r, w2_r, b2r, w3t, b3r)

    # Lane-dense (N, Cout, H*W) -> NCHW is a pure reshape (no HBM transpose).
    return out_flat.reshape(N, Cout, H, W)


def output_block_ref(x1_nchw, x2_nchw, params):
    """Pure-JAX f32 reference (for correctness check)."""
    w1, b1, w2, b2, w3, b3 = (params[k] for k in
                              ("w1", "b1", "w2", "b2", "w3", "b3"))
    dn = ("NHWC", "HWIO", "NHWC")
    x1 = jnp.transpose(x1_nchw, (0, 2, 3, 1))
    x2 = jnp.transpose(x2_nchw, (0, 2, 3, 1))
    x = jnp.concatenate([x2, x1], axis=-1)
    h = jax.lax.conv_general_dilated(x, w1, (1, 1), "SAME",
                                     dimension_numbers=dn) + b1
    h = jax.nn.relu(h)
    h = jax.lax.conv_general_dilated(h, w2, (1, 1), "SAME",
                                     dimension_numbers=dn) + b2
    h = jax.nn.relu(h)
    w3_4d = w3.reshape(1, 1, *w3.shape)
    y = jax.lax.conv_general_dilated(h, w3_4d, (1, 1), "SAME",
                                     dimension_numbers=dn) + b3
    return jnp.transpose(y, (0, 3, 1, 2))


def init_params(key, in_channels, out_channels):
    C, Cout = in_channels, out_channels
    ks = jax.random.split(key, 6)
    scale = 0.1
    return {
        # HWIO weight layout for the kernel / reference.
        "w1": scale * jax.random.normal(ks[0], (3, 3, 2 * C, C), jnp.float32),
        "b1": scale * jax.random.normal(ks[1], (C,), jnp.float32),
        "w2": scale * jax.random.normal(ks[2], (3, 3, C, C), jnp.float32),
        "b2": scale * jax.random.normal(ks[3], (C,), jnp.float32),
        "w3": scale * jax.random.normal(ks[4], (C, Cout), jnp.float32),
        "b3": scale * jax.random.normal(ks[5], (Cout,), jnp.float32),
    }


if __name__ == "__main__":
    key = jax.random.PRNGKey(0)
    k_x1, k_x2, k_p = jax.random.split(key, 3)

    N, C, H, W = 2, 4, 16, 16
    Cout = 3

    x1 = jax.random.normal(k_x1, (N, C, H, W), jnp.float32)
    x2 = jax.random.normal(k_x2, (N, C, H, W), jnp.float32)
    params = init_params(k_p, C, Cout)

    out = jax.jit(output_block_pallas)(x1, x2, params)
    out = jax.block_until_ready(out)

    ref = jax.block_until_ready(output_block_ref(x1, x2, params))
    assert out.shape == (N, Cout, H, W), out.shape
    # bf16 MXU inputs (f32 accumulate / f32 elementwise) vs. an f32 reference:
    # use a bf16-appropriate tolerance.
    assert jnp.allclose(out, ref, atol=5e-2, rtol=5e-2), \
        float(jnp.max(jnp.abs(out - ref)))

    print("KERNEL_OK")
</pallas_src>

<mosaic_0001>
module attributes {stable_mosaic.version = 11 : i64} {
  func.func @_output_block_kernel(%arg0: i32, %arg1: memref<1x16x16x4xbf16, #tpu.memory_space<vmem>>, %arg2: memref<1x16x16x4xbf16, #tpu.memory_space<vmem>>, %arg3: memref<72x4xbf16, #tpu.memory_space<vmem>>, %arg4: memref<1x4xf32, #tpu.memory_space<vmem>>, %arg5: memref<36x4xbf16, #tpu.memory_space<vmem>>, %arg6: memref<1x4xf32, #tpu.memory_space<vmem>>, %arg7: memref<3x4xbf16, #tpu.memory_space<vmem>>, %arg8: memref<3x1xf32, #tpu.memory_space<vmem>>, %arg9: memref<1x3x256xf32, #tpu.memory_space<vmem>>, %arg10: memref<18x18x8xbf16, #tpu.memory_space<vmem>>, %arg11: memref<18x18x4xbf16, #tpu.memory_space<vmem>>) attributes {dimension_semantics = [#tpu.dimension_semantics<arbitrary>], iteration_bounds = array<i64: 2>, scalar_prefetch = 0 : i64, scratch_operands = 2 : i64, tpu.core_type = #tpu.core_type<tc>, window_params = [{transform_indices = @transform_0, window_bounds = array<i64: 1, 16, 16, 4>}, {transform_indices = @transform_1, window_bounds = array<i64: 1, 16, 16, 4>}, {pipeline_mode = #tpu.pipeline_mode<synchronous>, transform_indices = @transform_2, window_bounds = array<i64: 72, 4>}, {pipeline_mode = #tpu.pipeline_mode<synchronous>, transform_indices = @transform_3, window_bounds = array<i64: 1, 4>}, {pipeline_mode = #tpu.pipeline_mode<synchronous>, transform_indices = @transform_4, window_bounds = array<i64: 36, 4>}, {pipeline_mode = #tpu.pipeline_mode<synchronous>, transform_indices = @transform_5, window_bounds = array<i64: 1, 4>}, {pipeline_mode = #tpu.pipeline_mode<synchronous>, transform_indices = @transform_6, window_bounds = array<i64: 3, 4>}, {pipeline_mode = #tpu.pipeline_mode<synchronous>, transform_indices = @transform_7, window_bounds = array<i64: 3, 1>}, {transform_indices = @transform_8, window_bounds = array<i64: 1, 3, 256>}]} {
    %c0_i32 = arith.constant 0 : i32
    %0 = arith.cmpi eq, %arg0, %c0_i32 : i32
    %1 = arith.extui %0 : i1 to i32
    %c0_i32_0 = arith.constant 0 : i32
    %2 = arith.cmpi ne, %1, %c0_i32_0 : i32
    scf.if %2 {
      %cst_87 = arith.constant 0.000000e+00 : bf16
      %57 = vector.broadcast %cst_87 : bf16 to vector<1x18x8xbf16>
      %cst_88 = arith.constant 0.000000e+00 : bf16
      %58 = vector.broadcast %cst_88 : bf16 to vector<18x1x8xbf16>
      %c0_89 = arith.constant 0 : index
      %c0_90 = arith.constant 0 : index
      %c0_91 = arith.constant 0 : index
      %59 = vector.load %arg10[%c0_89, %c0_90, %c0_91] : memref<18x18x8xbf16, #tpu.memory_space<vmem>>, vector<1x18x8xbf16>
      tpu.vector_store %arg10[%c0_89, %c0_90, %c0_91], %57 {strides = array<i32>} : memref<18x18x8xbf16, #tpu.memory_space<vmem>>, vector<1x18x8xbf16>,
      %c17 = arith.constant 17 : index
      %c0_92 = arith.constant 0 : index
      %c0_93 = arith.constant 0 : index
      %60 = vector.load %arg10[%c17, %c0_92, %c0_93] : memref<18x18x8xbf16, #tpu.memory_space<vmem>>, vector<1x18x8xbf16>
      tpu.vector_store %arg10[%c17, %c0_92, %c0_93], %57 {strides = array<i32>} : memref<18x18x8xbf16, #tpu.memory_space<vmem>>, vector<1x18x8xbf16>,
      %c0_94 = arith.constant 0 : index
      %c0_95 = arith.constant 0 : index
      %c0_96 = arith.constant 0 : index
      %61 = vector.load %arg10[%c0_94, %c0_95, %c0_96] : memref<18x18x8xbf16, #tpu.memory_space<vmem>>, vector<18x1x8xbf16>
      tpu.vector_store %arg10[%c0_94, %c0_95, %c0_96], %58 {strides = array<i32>} : memref<18x18x8xbf16, #tpu.memory_space<vmem>>, vector<18x1x8xbf16>,
      %c0_97 = arith.constant 0 : index
      %c17_98 = arith.constant 17 : index
      %c0_99 = arith.constant 0 : index
      %62 = vector.load %arg10[%c0_97, %c17_98, %c0_99] : memref<18x18x8xbf16, #tpu.memory_space<vmem>>, vector<18x1x8xbf16>
      tpu.vector_store %arg10[%c0_97, %c17_98, %c0_99], %58 {strides = array<i32>} : memref<18x18x8xbf16, #tpu.memory_space<vmem>>, vector<18x1x8xbf16>,
      %cst_100 = arith.constant 0.000000e+00 : bf16
      %63 = vector.broadcast %cst_100 : bf16 to vector<1x18x4xbf16>
      %cst_101 = arith.constant 0.000000e+00 : bf16
      %64 = vector.broadcast %cst_101 : bf16 to vector<18x1x4xbf16>
      %c0_102 = arith.constant 0 : index
      %c0_103 = arith.constant 0 : index
      %c0_104 = arith.constant 0 : index
      %65 = vector.load %arg11[%c0_102, %c0_103, %c0_104] : memref<18x18x4xbf16, #tpu.memory_space<vmem>>, vector<1x18x4xbf16>
      tpu.vector_store %arg11[%c0_102, %c0_103, %c0_104], %63 {strides = array<i32>} : memref<18x18x4xbf16, #tpu.memory_space<vmem>>, vector<1x18x4xbf16>,
      %c17_105 = arith.constant 17 : index
      %c0_106 = arith.constant 0 : index
      %c0_107 = arith.constant 0 : index
      %66 = vector.load %arg11[%c17_105, %c0_106, %c0_107] : memref<18x18x4xbf16, #tpu.memory_space<vmem>>, vector<1x18x4xbf16>
      tpu.vector_store %arg11[%c17_105, %c0_106, %c0_107], %63 {strides = array<i32>} : memref<18x18x4xbf16, #tpu.memory_space<vmem>>, vector<1x18x4xbf16>,
      %c0_108 = arith.constant 0 : index
      %c0_109 = arith.constant 0 : index
      %c0_110 = arith.constant 0 : index
      %67 = vector.load %arg11[%c0_108, %c0_109, %c0_110] : memref<18x18x4xbf16, #tpu.memory_space<vmem>>, vector<18x1x4xbf16>
      tpu.vector_store %arg11[%c0_108, %c0_109, %c0_110], %64 {strides = array<i32>} : memref<18x18x4xbf16, #tpu.memory_space<vmem>>, vector<18x1x4xbf16>,
      %c0_111 = arith.constant 0 : index
      %c17_112 = arith.constant 17 : index
      %c0_113 = arith.constant 0 : index
      %68 = vector.load %arg11[%c0_111, %c17_112, %c0_113] : memref<18x18x4xbf16, #tpu.memory_space<vmem>>, vector<18x1x4xbf16>
      tpu.vector_store %arg11[%c0_111, %c17_112, %c0_113], %64 {strides = array<i32>} : memref<18x18x4xbf16, #tpu.memory_space<vmem>>, vector<18x1x4xbf16>,
    } else {
    }
    %c0 = arith.constant 0 : index
    %c0_1 = arith.constant 0 : index
    %c0_2 = arith.constant 0 : index
    %c0_3 = arith.constant 0 : index
    %3 = vector.load %arg2[%c0, %c0_1, %c0_2, %c0_3] : memref<1x16x16x4xbf16, #tpu.memory_space<vmem>>, vector<1x16x16x4xbf16>
    %4 = vector.shape_cast %3 : vector<1x16x16x4xbf16> to vector<16x16x4xbf16>
    %c1 = arith.constant 1 : index
    %c1_4 = arith.constant 1 : index
    %c0_5 = arith.constant 0 : index
    %5 = vector.load %arg10[%c1, %c1_4, %c0_5] : memref<18x18x8xbf16, #tpu.memory_space<vmem>>, vector<16x16x4xbf16>
    tpu.vector_store %arg10[%c1, %c1_4, %c0_5], %4 {strides = array<i32>} : memref<18x18x8xbf16, #tpu.memory_space<vmem>>, vector<16x16x4xbf16>,
    %c0_6 = arith.constant 0 : index
    %c0_7 = arith.constant 0 : index
    %c0_8 = arith.constant 0 : index
    %c0_9 = arith.constant 0 : index
    %6 = vector.load %arg1[%c0_6, %c0_7, %c0_8, %c0_9] : memref<1x16x16x4xbf16, #tpu.memory_space<vmem>>, vector<1x16x16x4xbf16>
    %7 = vector.shape_cast %6 : vector<1x16x16x4xbf16> to vector<16x16x4xbf16>
    %c1_10 = arith.constant 1 : index
    %c1_11 = arith.constant 1 : index
    %c4 = arith.constant 4 : index
    %8 = vector.load %arg10[%c1_10, %c1_11, %c4] : memref<18x18x8xbf16, #tpu.memory_space<vmem>>, vector<16x16x4xbf16>
    tpu.vector_store %arg10[%c1_10, %c1_11, %c4], %7 {strides = array<i32>} : memref<18x18x8xbf16, #tpu.memory_space<vmem>>, vector<16x16x4xbf16>,
    %c0_12 = arith.constant 0 : index
    %c0_13 = arith.constant 0 : index
    %c0_14 = arith.constant 0 : index
    %9 = vector.load %arg10[%c0_12, %c0_13, %c0_14] : memref<18x18x8xbf16, #tpu.memory_space<vmem>>, vector<16x16x8xbf16>
    %c0_15 = arith.constant 0 : index
    %c1_16 = arith.constant 1 : index
    %c0_17 = arith.constant 0 : index
    %10 = vector.load %arg10[%c0_15, %c1_16, %c0_17] : memref<18x18x8xbf16, #tpu.memory_space<vmem>>, vector<16x16x8xbf16>
    %c0_18 = arith.constant 0 : index
    %c2 = arith.constant 2 : index
    %c0_19 = arith.constant 0 : index
    %11 = vector.load %arg10[%c0_18, %c2, %c0_19] : memref<18x18x8xbf16, #tpu.memory_space<vmem>>, vector<16x16x8xbf16>
    %c1_20 = arith.constant 1 : index
    %c0_21 = arith.constant 0 : index
    %c0_22 = arith.constant 0 : index
    %12 = vector.load %arg10[%c1_20, %c0_21, %c0_22] : memref<18x18x8xbf16, #tpu.memory_space<vmem>>, vector<16x16x8xbf16>
    %c1_23 = arith.constant 1 : index
    %c1_24 = arith.constant 1 : index
    %c0_25 = arith.constant 0 : index
    %13 = vector.load %arg10[%c1_23, %c1_24, %c0_25] : memref<18x18x8xbf16, #tpu.memory_space<vmem>>, vector<16x16x8xbf16>
    %c1_26 = arith.constant 1 : index
    %c2_27 = arith.constant 2 : index
    %c0_28 = arith.constant 0 : index
    %14 = vector.load %arg10[%c1_26, %c2_27, %c0_28] : memref<18x18x8xbf16, #tpu.memory_space<vmem>>, vector<16x16x8xbf16>
    %c2_29 = arith.constant 2 : index
    %c0_30 = arith.constant 0 : index
    %c0_31 = arith.constant 0 : index
    %15 = vector.load %arg10[%c2_29, %c0_30, %c0_31] : memref<18x18x8xbf16, #tpu.memory_space<vmem>>, vector<16x16x8xbf16>
    %c2_32 = arith.constant 2 : index
    %c1_33 = arith.constant 1 : index
    %c0_34 = arith.constant 0 : index
    %16 = vector.load %arg10[%c2_32, %c1_33, %c0_34] : memref<18x18x8xbf16, #tpu.memory_space<vmem>>, vector<16x16x8xbf16>
    %c2_35 = arith.constant 2 : index
    %c2_36 = arith.constant 2 : index
    %c0_37 = arith.constant 0 : index
    %17 = vector.load %arg10[%c2_35, %c2_36, %c0_37] : memref<18x18x8xbf16, #tpu.memory_space<vmem>>, vector<16x16x8xbf16>
    %18 = tpu.concatenate %9, %10, %11, %12, %13, %14, %15, %16, %17 in 2 : vector<16x16x8xbf16>, vector<16x16x8xbf16>, vector<16x16x8xbf16>, vector<16x16x8xbf16>, vector<16x16x8xbf16>, vector<16x16x8xbf16>, vector<16x16x8xbf16>, vector<16x16x8xbf16>, vector<16x16x8xbf16> -> vector<16x16x72xbf16>
    %19 = vector.shape_cast %18 : vector<16x16x72xbf16> to vector<256x72xbf16>
    %c0_38 = arith.constant 0 : index
    %c0_39 = arith.constant 0 : index
    %20 = vector.load %arg3[%c0_38, %c0_39] : memref<72x4xbf16, #tpu.memory_space<vmem>>, vector<72x4xbf16>
    %cst = arith.constant dense<0.000000e+00> : vector<256x4xf32>
    %21 = tpu.matmul %19, %20, %cst {dimension_numbers = #tpu.dot_dimension_numbers<[1], [0], [0], [1], [0, 0, 1, 1], [], []>} : vector<256x72xbf16>, vector<72x4xbf16>, vector<256x4xf32> -> vector<256x4xf32>
    %c0_40 = arith.constant 0 : index
    %c0_41 = arith.constant 0 : index
    %22 = vector.load %arg4[%c0_40, %c0_41] : memref<1x4xf32, #tpu.memory_space<vmem>>, vector<1x4xf32>
    %23 = vector.broadcast %22 : vector<1x4xf32> to vector<256x4xf32>
    %24 = arith.addf %21, %23 : vector<256x4xf32>
    %cst_42 = arith.constant 0.000000e+00 : f32
    %25 = vector.broadcast %cst_42 : f32 to vector<256x4xf32>
    %26 = arith.maximumf %24, %25 : vector<256x4xf32>
    %27 = vector.shape_cast %26 : vector<256x4xf32> to vector<16x16x4xf32>
    %28 = arith.truncf %27 : vector<16x16x4xf32> to vector<16x16x4xbf16>
    %c1_43 = arith.constant 1 : index
    %c1_44 = arith.constant 1 : index
    %c0_45 = arith.constant 0 : index
    %29 = vector.load %arg11[%c1_43, %c1_44, %c0_45] : memref<18x18x4xbf16, #tpu.memory_space<vmem>>, vector<16x16x4xbf16>
    tpu.vector_store %arg11[%c1_43, %c1_44, %c0_45], %28 {strides = array<i32>} : memref<18x18x4xbf16, #tpu.memory_space<vmem>>, vector<16x16x4xbf16>,
    %c0_46 = arith.constant 0 : index
    %c0_47 = arith.constant 0 : index
    %c0_48 = arith.constant 0 : index
    %30 = vector.load %arg11[%c0_46, %c0_47, %c0_48] : memref<18x18x4xbf16, #tpu.memory_space<vmem>>, vector<16x16x4xbf16>
    %c0_49 = arith.constant 0 : index
    %c1_50 = arith.constant 1 : index
    %c0_51 = arith.constant 0 : index
    %31 = vector.load %arg11[%c0_49, %c1_50, %c0_51] : memref<18x18x4xbf16, #tpu.memory_space<vmem>>, vector<16x16x4xbf16>
    %c0_52 = arith.constant 0 : index
    %c2_53 = arith.constant 2 : index
    %c0_54 = arith.constant 0 : index
    %32 = vector.load %arg11[%c0_52, %c2_53, %c0_54] : memref<18x18x4xbf16, #tpu.memory_space<vmem>>, vector<16x16x4xbf16>
    %c1_55 = arith.constant 1 : index
    %c0_56 = arith.constant 0 : index
    %c0_57 = arith.constant 0 : index
    %33 = vector.load %arg11[%c1_55, %c0_56, %c0_57] : memref<18x18x4xbf16, #tpu.memory_space<vmem>>, vector<16x16x4xbf16>
    %c1_58 = arith.constant 1 : index
    %c1_59 = arith.constant 1 : index
    %c0_60 = arith.constant 0 : index
    %34 = vector.load %arg11[%c1_58, %c1_59, %c0_60] : memref<18x18x4xbf16, #tpu.memory_space<vmem>>, vector<16x16x4xbf16>
    %c1_61 = arith.constant 1 : index
    %c2_62 = arith.constant 2 : index
    %c0_63 = arith.constant 0 : index
    %35 = vector.load %arg11[%c1_61, %c2_62, %c0_63] : memref<18x18x4xbf16, #tpu.memory_space<vmem>>, vector<16x16x4xbf16>
    %c2_64 = arith.constant 2 : index
    %c0_65 = arith.constant 0 : index
    %c0_66 = arith.constant 0 : index
    %36 = vector.load %arg11[%c2_64, %c0_65, %c0_66] : memref<18x18x4xbf16, #tpu.memory_space<vmem>>, vector<16x16x4xbf16>
    %c2_67 = arith.constant 2 : index
    %c1_68 = arith.constant 1 : index
    %c0_69 = arith.constant 0 : index
    %37 = vector.load %arg11[%c2_67, %c1_68, %c0_69] : memref<18x18x4xbf16, #tpu.memory_space<vmem>>, vector<16x16x4xbf16>
    %c2_70 = arith.constant 2 : index
    %c2_71 = arith.constant 2 : index
    %c0_72 = arith.constant 0 : index
    %38 = vector.load %arg11[%c2_70, %c2_71, %c0_72] : memref<18x18x4xbf16, #tpu.memory_space<vmem>>, vector<16x16x4xbf16>
    %39 = tpu.concatenate %30, %31, %32, %33, %34, %35, %36, %37, %38 in 2 : vector<16x16x4xbf16>, vector<16x16x4xbf16>, vector<16x16x4xbf16>, vector<16x16x4xbf16>, vector<16x16x4xbf16>, vector<16x16x4xbf16>, vector<16x16x4xbf16>, vector<16x16x4xbf16>, vector<16x16x4xbf16> -> vector<16x16x36xbf16>
    %40 = vector.shape_cast %39 : vector<16x16x36xbf16> to vector<256x36xbf16>
    %c0_73 = arith.constant 0 : index
    %c0_74 = arith.constant 0 : index
    %41 = vector.load %arg5[%c0_73, %c0_74] : memref<36x4xbf16, #tpu.memory_space<vmem>>, vector<36x4xbf16>
    %cst_75 = arith.constant dense<0.000000e+00> : vector<256x4xf32>
    %42 = tpu.matmul %40, %41, %cst_75 {dimension_numbers = #tpu.dot_dimension_numbers<[1], [0], [0], [1], [0, 0, 1, 1], [], []>} : vector<256x36xbf16>, vector<36x4xbf16>, vector<256x4xf32> -> vector<256x4xf32>
    %c0_76 = arith.constant 0 : index
    %c0_77 = arith.constant 0 : index
    %43 = vector.load %arg6[%c0_76, %c0_77] : memref<1x4xf32, #tpu.memory_space<vmem>>, vector<1x4xf32>
    %44 = vector.broadcast %43 : vector<1x4xf32> to vector<256x4xf32>
    %45 = arith.addf %42, %44 : vector<256x4xf32>
    %cst_78 = arith.constant 0.000000e+00 : f32
    %46 = vector.broadcast %cst_78 : f32 to vector<256x4xf32>
    %47 = arith.maximumf %45, %46 : vector<256x4xf32>
    %48 = arith.truncf %47 : vector<256x4xf32> to vector<256x4xbf16>
    %c0_79 = arith.constant 0 : index
    %c0_80 = arith.constant 0 : index
    %49 = vector.load %arg7[%c0_79, %c0_80] : memref<3x4xbf16, #tpu.memory_space<vmem>>, vector<3x4xbf16>
    %cst_81 = arith.constant dense<0.000000e+00> : vector<3x256xf32>
    %50 = tpu.matmul %49, %48, %cst_81 {dimension_numbers = #tpu.dot_dimension_numbers<[1], [1], [0], [0], [0, 0, 1, 0], [], []>} : vector<3x4xbf16>, vector<256x4xbf16>, vector<3x256xf32> -> vector<3x256xf32>
    %c0_82 = arith.constant 0 : index
    %c0_83 = arith.constant 0 : index
    %51 = vector.load %arg8[%c0_82, %c0_83] : memref<3x1xf32, #tpu.memory_space<vmem>>, vector<3x1xf32>
    %52 = vector.broadcast %51 : vector<3x1xf32> to vector<3x256xf32>
    %53 = arith.addf %50, %52 : vector<3x256xf32>
    %c0_84 = arith.constant 0 : index
    %c0_85 = arith.constant 0 : index
    %c0_86 = arith.constant 0 : index
    %54 = vector.load %arg9[%c0_84, %c0_85, %c0_86] : memref<1x3x256xf32, #tpu.memory_space<vmem>>, vector<1x3x256xf32>
    %55 = vector.shape_cast %54 : vector<1x3x256xf32> to vector<3x256xf32>
    %56 = vector.shape_cast %53 : vector<3x256xf32> to vector<1x3x256xf32>
    tpu.vector_store %arg9[%c0_84, %c0_85, %c0_86], %56 {strides = array<i32>} : memref<1x3x256xf32, #tpu.memory_space<vmem>>, vector<1x3x256xf32>,
    return
  }
  func.func @transform_0(%arg0: i32) -> (i32, i32, i32, i32) {
    %c0_i32 = arith.constant 0 : i32
    %c0_i32_0 = arith.constant 0 : i32
    %c0_i32_1 = arith.constant 0 : i32
    %c0_i32_2 = arith.constant 0 : i32
    return %arg0, %c0_i32, %c0_i32_0, %c0_i32_1 : i32, i32, i32, i32
  }
  func.func @transform_1(%arg0: i32) -> (i32, i32, i32, i32) {
    %c0_i32 = arith.constant 0 : i32
    %c0_i32_0 = arith.constant 0 : i32
    %c0_i32_1 = arith.constant 0 : i32
    %c0_i32_2 = arith.constant 0 : i32
    return %arg0, %c0_i32, %c0_i32_0, %c0_i32_1 : i32, i32, i32, i32
  }
  func.func @transform_2(%arg0: i32) -> (i32, i32) {
    %c0_i32 = arith.constant 0 : i32
    %c0_i32_0 = arith.constant 0 : i32
    %c0_i32_1 = arith.constant 0 : i32
    return %c0_i32, %c0_i32_0 : i32, i32
  }
  func.func @transform_3(%arg0: i32) -> (i32, i32) {
    %c0_i32 = arith.constant 0 : i32
    %c0_i32_0 = arith.constant 0 : i32
    %c0_i32_1 = arith.constant 0 : i32
    return %c0_i32, %c0_i32_0 : i32, i32
  }
  func.func @transform_4(%arg0: i32) -> (i32, i32) {
    %c0_i32 = arith.constant 0 : i32
    %c0_i32_0 = arith.constant 0 : i32
    %c0_i32_1 = arith.constant 0 : i32
    return %c0_i32, %c0_i32_0 : i32, i32
  }
  func.func @transform_5(%arg0: i32) -> (i32, i32) {
    %c0_i32 = arith.constant 0 : i32
    %c0_i32_0 = arith.constant 0 : i32
    %c0_i32_1 = arith.constant 0 : i32
    return %c0_i32, %c0_i32_0 : i32, i32
  }
  func.func @transform_6(%arg0: i32) -> (i32, i32) {
    %c0_i32 = arith.constant 0 : i32
    %c0_i32_0 = arith.constant 0 : i32
    %c0_i32_1 = arith.constant 0 : i32
    return %c0_i32, %c0_i32_0 : i32, i32
  }
  func.func @transform_7(%arg0: i32) -> (i32, i32) {
    %c0_i32 = arith.constant 0 : i32
    %c0_i32_0 = arith.constant 0 : i32
    %c0_i32_1 = arith.constant 0 : i32
    return %c0_i32, %c0_i32_0 : i32, i32
  }
  func.func @transform_8(%arg0: i32) -> (i32, i32, i32) {
    %c0_i32 = arith.constant 0 : i32
    %c0_i32_0 = arith.constant 0 : i32
    %c0_i32_1 = arith.constant 0 : i32
    return %arg0, %c0_i32, %c0_i32_0 : i32, i32, i32
  }
}

</mosaic_0001>

<bundles_post_ra>
// kernel: output_block_pallas.1
= control target key start
LH: loop header
LB: loop body
LE: loop exit
PB: predicated region body
PF: predicated region fallthrough
CT: control target
= control target key end

     0   :  { %s7702_s27 = smov 0   ;;  %s10587_s0 = inlined_call_operand.vmem [shape: bf16[2,16,16,4], index: 0, kind: input, shape index: {}]   ;;  %s10588_s1 = inlined_call_operand.vmem [shape: bf16[2,16,16,4], index: 1, kind: input, shape index: {}]   ;;  %s10589_s2 = inlined_call_operand.vmem [shape: bf16[72,4], index: 2, kind: input, shape index: {}]   ;;  %s10590_s3 = inlined_call_operand.vmem [shape: f32[1,4], index: 3, kind: input, shape index: {}]   ;;  %s10591_s4 = inlined_call_operand.vmem [shape: bf16[36,4], index: 4, kind: input, shape index: {}]   ;;  %s10592_s5 = inlined_call_operand.vmem [shape: f32[1,4], index: 5, kind: input, shape index: {}]   ;;  %s10593_s6 = inlined_call_operand.vmem [shape: bf16[3,4], index: 6, kind: input, shape index: {}]   ;;  %s10594_s7 = inlined_call_operand.vmem [shape: f32[3,1], index: 7, kind: input, shape index: {}]   ;;  %s10595_s8 = inlined_call_operand.vmem [shape: f32[2,3,256], index: 8, kind: output, shape index: {}]  }
   0x1 LB: > { %s6778_s28 = sadd.s32 4294967295, %s7641_s27   ;;  %p6782_p0 = scmp.ge.s32.totalorder %s7641_s27, 1  ;;  %s7641_s27 = sphi %s7702_s27, %s18_s27  }
   0x2   : > { %p272_p1 = scmp.lt.s32.totalorder %s7641_s27, 3 }
   0x4   : > { %p273_p2 = pnand %p6782_p0, %p272_p1 }
   0x5   : > { %p311_p3 = scmp.lt.s32.totalorder (!%p273_p2), %s6778_s28, 1  ;;  %p6789_p4 = scmp.ne.s32.totalorder (!%p273_p2), %s6778_s28, 0 }
   0x6   : > { %276 = sbr.rel (%p273_p2) target bundleno = 1444 (0x5a4), region = 52 }
   0xb   : > { %s312_s29 = scalar_select %p311_p3, %s6778_s28, 1 }
   0xc   : > { %330 = sbr.rel (%p6789_p4) target bundleno = 84 (0x54), region = 56 }
   0xd   : > { %s7155_s30 = sshll.u32 %s312_s29, 7  ;;  %s7157_s9 = sshll.u32 %s312_s29, 3 }
   0xe   : > { %s7713_s12 = scalar_lea.vmem %s10587_s0, %s7155_s30  ;;  %s7718_s15 = scalar_lea.vmem %s10588_s1, %s7155_s30 }
   0xf   : > { %s7723_s18 = scalar_lea.vmem %s10595_s8, %s7157_s9 }
  0x11   : > { %vm331_vm0 = vcmask 60416   ;;  %vm334_vm1 = vcmask 57344   ;;  %vm341_vm2 = vsmask.f32 256  ;;  %v7643_v0 = vmov 0  }
  0x12   : > { %332 = vst.msk [vmem:[#allocation2] sm:$0xf] %vm331_vm0, %v7643_v0  ;;  %333 = vst.msk [vmem:[#allocation2 + $0x4] sm:$0xf] %vm331_vm0, %v7643_v0  ;;  %vm397_vm4 = vsmask.f32 7938 }
  0x13   : > { %337 = vst.msk [vmem:[#allocation2 + $0xcc] sm:$0xf] %vm331_vm0, %v7643_v0  ;;  %338 = vst.msk [vmem:[#allocation2 + $0xd0] sm:$0xf] %vm331_vm0, %v7643_v0  ;;  %vm453_vm5 = vcmask 27648   ;;  %vm456_vm6 = vcmask 24576  }
  0x14   : > { %335 = vst.msk [vmem:[#allocation2 + $0x8] sm:$0x1] %vm334_vm1, %v7643_v0  ;;  %vm7728_vm3 = vmand %vm334_vm1, %vm341_vm2  ;;  %v346_v2 = vld [vmem:[#allocation2 + $0xc] sm:$0x1]  ;;  %v349_v4 = vld [vmem:[#allocation2 + $0x18] sm:$0x1] }
  0x15   : > { %339 = vst.msk [vmem:[#allocation2 + $0xd4] sm:$0x1] %vm334_vm1, %v7643_v0  ;;  %v347_v3 = vsel %vm7728_vm3, 0, %v346_v2  ;;  %v352_v5 = vld [vmem:[#allocation2 + $0x24] sm:$0x1]  ;;  %v350_v6 = vsel %vm7728_vm3, 0, %v349_v4  ;;  %vm7759_vm7 = vmand %vm334_vm1, %vm397_vm4 }
  0x16   : > { %454 = vst.msk [vmem:[#allocation3] sm:$0xf] %vm453_vm5, %v7643_v0  ;;  %455 = vst.msk [vmem:[#allocation3 + $0x4] sm:$0xf] %vm453_vm5, %v7643_v0  ;;  %v353_v7 = vsel %vm7728_vm3, 0, %v352_v5 }
  0x17   : > { %459 = vst.msk [vmem:[#allocation3 + $0xcc] sm:$0xf] %vm453_vm5, %v7643_v0  ;;  %460 = vst.msk [vmem:[#allocation3 + $0xd0] sm:$0xf] %vm453_vm5, %v7643_v0  ;;  %v355_v8 = vld [vmem:[#allocation2 + $0x30] sm:$0x1] }
  0x18   : > { %457 = vst.msk [vmem:[#allocation3 + $0x8] sm:$0x1] %vm456_vm6, %v7643_v0  ;;  %461 = vst.msk [vmem:[#allocation3 + $0xd4] sm:$0x1] %vm456_vm6, %v7643_v0  ;;  %v358_v9 = vld [vmem:[#allocation2 + $0x3c] sm:$0x1] }
  0x19   : > { %348 = vst [vmem:[#allocation2 + $0xc] sm:$0x1] %v347_v3  ;;  %351 = vst [vmem:[#allocation2 + $0x18] sm:$0x1] %v350_v6  ;;  %v356_v10 = vsel %vm7728_vm3, 0, %v355_v8  ;;  %v359_v11 = vsel %vm7728_vm3, 0, %v358_v9 }
  0x1a   : > { %354 = vst [vmem:[#allocation2 + $0x24] sm:$0x1] %v353_v7  ;;  %v361_v12 = vld [vmem:[#allocation2 + $0x48] sm:$0x1]  ;;  %v364_v13 = vld [vmem:[#allocation2 + $0x54] sm:$0x1]  ;;  %vm7801_vm8 = vmand %vm456_vm6, %vm341_vm2 }
  0x1b   : > { %357 = vst [vmem:[#allocation2 + $0x30] sm:$0x1] %v356_v10  ;;  %360 = vst [vmem:[#allocation2 + $0x3c] sm:$0x1] %v359_v11  ;;  %v362_v14 = vsel %vm7728_vm3, 0, %v361_v12  ;;  %v365_v15 = vsel %vm7728_vm3, 0, %v364_v13 }
  0x1c   : > { %v367_v16 = vld [vmem:[#allocation2 + $0x60] sm:$0x1]  ;;  %v370_v17 = vld [vmem:[#allocation2 + $0x6c] sm:$0x1]  ;;  %363 = vst [vmem:[#allocation2 + $0x48] sm:$0x1] %v362_v14  ;;  %vm7843_vm9 = vmand %vm456_vm6, %vm397_vm4 }
  0x1d   : > { %366 = vst [vmem:[#allocation2 + $0x54] sm:$0x1] %v365_v15  ;;  %v368_v18 = vsel %vm7728_vm3, 0, %v367_v16  ;;  %v371_v19 = vsel %vm7728_vm3, 0, %v370_v17  ;;  %v373_v20 = vld [vmem:[#allocation2 + $0x78] sm:$0x1] }
  0x1e   : > { %v376_v21 = vld [vmem:[#allocation2 + $0x84] sm:$0x1]  ;;  %369 = vst [vmem:[#allocation2 + $0x60] sm:$0x1] %v368_v18  ;;  %372 = vst [vmem:[#allocation2 + $0x6c] sm:$0x1] %v371_v19 }
  0x1f   : > { %v374_v22 = vsel %vm7728_vm3, 0, %v373_v20  ;;  %v377_v23 = vsel %vm7728_vm3, 0, %v376_v21  ;;  %v379_v24 = vld [vmem:[#allocation2 + $0x90] sm:$0x1]  ;;  %v382_v25 = vld [vmem:[#allocation2 + $0x9c] sm:$0x1] }
  0x20   : > { %v343_v27 = vld [vmem:[#allocation2] sm:$0x1]  ;;  %375 = vst [vmem:[#allocation2 + $0x78] sm:$0x1] %v374_v22  ;;  %378 = vst [vmem:[#allocation2 + $0x84] sm:$0x1] %v377_v23 }
  0x21   : > { %v380_v28 = vsel %vm7728_vm3, 0, %v379_v24  ;;  %v383_v29 = vsel %vm7728_vm3, 0, %v382_v25  ;;  %v385_v30 = vld [vmem:[#allocation2 + $0xa8] sm:$0x1]  ;;  %v344_v31 = vsel %vm7728_vm3, 0, %v343_v27 }
  0x22   : > { %381 = vst [vmem:[#allocation2 + $0x90] sm:$0x1] %v380_v28  ;;  %384 = vst [vmem:[#allocation2 + $0x9c] sm:$0x1] %v383_v29  ;;  %v386_v32 = vsel %vm7728_vm3, 0, %v385_v30 }
  0x23   : > { %v388_v33 = vld [vmem:[#allocation2 + $0xb4] sm:$0x1]  ;;  %v391_v34 = vld [vmem:[#allocation2 + $0xc0] sm:$0x1]  ;;  %345 = vst [vmem:[#allocation2] sm:$0x1] %v344_v31 }
  0x24   : > { %387 = vst [vmem:[#allocation2 + $0xa8] sm:$0x1] %v386_v32  ;;  %v389_v35 = vsel %vm7728_vm3, 0, %v388_v33  ;;  %v392_v36 = vsel %vm7728_vm3, 0, %v391_v34  ;;  %v394_v37 = vld [vmem:[#allocation2 + $0xcc] sm:$0x1] }
  0x25   : > { %v399_v38 = vld [vmem:[#allocation2 + $0x8] sm:$0x1]  ;;  %390 = vst [vmem:[#allocation2 + $0xb4] sm:$0x1] %v389_v35  ;;  %393 = vst [vmem:[#allocation2 + $0xc0] sm:$0x1] %v392_v36 }
  0x26   : > { %v395_v39 = vsel %vm7728_vm3, 0, %v394_v37  ;;  %v400_v40 = vsel %vm7759_vm7, 0, %v399_v38  ;;  %v402_v41 = vld [vmem:[#allocation2 + $0x14] sm:$0x1]  ;;  %v405_v42 = vld [vmem:[#allocation2 + $0x20] sm:$0x1] }
  0x27   : > { %396 = vst [vmem:[#allocation2 + $0xcc] sm:$0x1] %v395_v39  ;;  %401 = vst [vmem:[#allocation2 + $0x8] sm:$0x1] %v400_v40  ;;  %v403_v43 = vsel %vm7759_vm7, 0, %v402_v41  ;;  %v406_v44 = vsel %vm7759_vm7, 0, %v405_v42 }
  0x28   : > { %v408_v45 = vld [vmem:[#allocation2 + $0x2c] sm:$0x1]  ;;  %v411_v46 = vld [vmem:[#allocation2 + $0x38] sm:$0x1]  ;;  %404 = vst [vmem:[#allocation2 + $0x14] sm:$0x1] %v403_v43 }
  0x29   : > { %407 = vst [vmem:[#allocation2 + $0x20] sm:$0x1] %v406_v44  ;;  %v409_v47 = vsel %vm7759_vm7, 0, %v408_v45  ;;  %v412_v48 = vsel %vm7759_vm7, 0, %v411_v46  ;;  %v414_v49 = vld [vmem:[#allocation2 + $0x44] sm:$0x1] }
  0x2a   : > { %v417_v50 = vld [vmem:[#allocation2 + $0x50] sm:$0x1]  ;;  %410 = vst [vmem:[#allocation2 + $0x2c] sm:$0x1] %v409_v47  ;;  %413 = vst [vmem:[#allocation2 + $0x38] sm:$0x1] %v412_v48 }
  0x2b   : > { %v415_v51 = vsel %vm7759_vm7, 0, %v414_v49  ;;  %v418_v52 = vsel %vm7759_vm7, 0, %v417_v50  ;;  %v420_v53 = vld [vmem:[#allocation2 + $0x5c] sm:$0x1]  ;;  %v423_v54 = vld [vmem:[#allocation2 + $0x68] sm:$0x1] }
  0x2c   : > { %416 = vst [vmem:[#allocation2 + $0x44] sm:$0x1] %v415_v51  ;;  %419 = vst [vmem:[#allocation2 + $0x50] sm:$0x1] %v418_v52  ;;  %v421_v55 = vsel %vm7759_vm7, 0, %v420_v53  ;;  %v424_v56 = vsel %vm7759_vm7, 0, %v423_v54 }
  0x2d   : > { %v426_v57 = vld [vmem:[#allocation2 + $0x74] sm:$0x1]  ;;  %v429_v58 = vld [vmem:[#allocation2 + $0x80] sm:$0x1]  ;;  %422 = vst [vmem:[#allocation2 + $0x5c] sm:$0x1] %v421_v55 }
  0x2e   : > { %425 = vst [vmem:[#allocation2 + $0x68] sm:$0x1] %v424_v56  ;;  %v427_v59 = vsel %vm7759_vm7, 0, %v426_v57  ;;  %v430_v60 = vsel %vm7759_vm7, 0, %v429_v58  ;;  %v432_v61 = vld [vmem:[#allocation2 + $0x8c] sm:$0x1] }
  0x2f   : > { %v435_v62 = vld [vmem:[#allocation2 + $0x98] sm:$0x1]  ;;  %428 = vst [vmem:[#allocation2 + $0x74] sm:$0x1] %v427_v59  ;;  %431 = vst [vmem:[#allocation2 + $0x80] sm:$0x1] %v430_v60 }
  0x30   : > { %v433_v0 = vsel %vm7759_vm7, 0, %v432_v61  ;;  %v436_v1 = vsel %vm7759_vm7, 0, %v435_v62  ;;  %v438_v2 = vld [vmem:[#allocation2 + $0xa4] sm:$0x1]  ;;  %v441_v3 = vld [vmem:[#allocation2 + $0xb0] sm:$0x1] }
  0x31   : > { %434 = vst [vmem:[#allocation2 + $0x8c] sm:$0x1] %v433_v0  ;;  %437 = vst [vmem:[#allocation2 + $0x98] sm:$0x1] %v436_v1  ;;  %v439_v4 = vsel %vm7759_vm7, 0, %v438_v2  ;;  %v442_v5 = vsel %vm7759_vm7, 0, %v441_v3 }
  0x32   : > { %v444_v6 = vld [vmem:[#allocation2 + $0xbc] sm:$0x1]  ;;  %v447_v7 = vld [vmem:[#allocation2 + $0xc8] sm:$0x1]  ;;  %440 = vst [vmem:[#allocation2 + $0xa4] sm:$0x1] %v439_v4 }
  0x33   : > { %443 = vst [vmem:[#allocation2 + $0xb0] sm:$0x1] %v442_v5  ;;  %v445_v8 = vsel %vm7759_vm7, 0, %v444_v6  ;;  %v448_v9 = vsel %vm7759_vm7, 0, %v447_v7  ;;  %v450_v10 = vld [vmem:[#allocation2 + $0xd4] sm:$0x1] }
  0x34   : > { %v464_v11 = vld [vmem:[#allocation3] sm:$0x1]  ;;  %446 = vst [vmem:[#allocation2 + $0xbc] sm:$0x1] %v445_v8  ;;  %449 = vst [vmem:[#allocation2 + $0xc8] sm:$0x1] %v448_v9 }
  0x35   : > { %v451_v12 = vsel %vm7759_vm7, 0, %v450_v10  ;;  %v465_v13 = vsel %vm7801_vm8, 0, %v464_v11  ;;  %v467_v14 = vld [vmem:[#allocation3 + $0xc] sm:$0x1]  ;;  %v470_v15 = vld [vmem:[#allocation3 + $0x18] sm:$0x1] }
  0x36   : > { %452 = vst [vmem:[#allocation2 + $0xd4] sm:$0x1] %v451_v12  ;;  %466 = vst [vmem:[#allocation3] sm:$0x1] %v465_v13  ;;  %v468_v16 = vsel %vm7801_vm8, 0, %v467_v14  ;;  %v471_v17 = vsel %vm7801_vm8, 0, %v470_v15 }
  0x37   : > { %v473_v18 = vld [vmem:[#allocation3 + $0x24] sm:$0x1]  ;;  %v476_v19 = vld [vmem:[#allocation3 + $0x30] sm:$0x1]  ;;  %469 = vst [vmem:[#allocation3 + $0xc] sm:$0x1] %v468_v16 }
  0x38   : > { %472 = vst [vmem:[#allocation3 + $0x18] sm:$0x1] %v471_v17  ;;  %v474_v20 = vsel %vm7801_vm8, 0, %v473_v18  ;;  %v477_v21 = vsel %vm7801_vm8, 0, %v476_v19  ;;  %v479_v22 = vld [vmem:[#allocation3 + $0x3c] sm:$0x1] }
  0x39   : > { %v482_v23 = vld [vmem:[#allocation3 + $0x48] sm:$0x1]  ;;  %475 = vst [vmem:[#allocation3 + $0x24] sm:$0x1] %v474_v20  ;;  %478 = vst [vmem:[#allocation3 + $0x30] sm:$0x1] %v477_v21 }
  0x3a   : > { %v480_v24 = vsel %vm7801_vm8, 0, %v479_v22  ;;  %v483_v25 = vsel %vm7801_vm8, 0, %v482_v23  ;;  %v485_v26 = vld [vmem:[#allocation3 + $0x54] sm:$0x1]  ;;  %v488_v27 = vld [vmem:[#allocation3 + $0x60] sm:$0x1] }
  0x3b   : > { %481 = vst [vmem:[#allocation3 + $0x3c] sm:$0x1] %v480_v24  ;;  %484 = vst [vmem:[#allocation3 + $0x48] sm:$0x1] %v483_v25  ;;  %v486_v28 = vsel %vm7801_vm8, 0, %v485_v26  ;;  %v489_v29 = vsel %vm7801_vm8, 0, %v488_v27 }
  0x3c   : > { %v491_v30 = vld [vmem:[#allocation3 + $0x6c] sm:$0x1]  ;;  %v494_v31 = vld [vmem:[#allocation3 + $0x78] sm:$0x1]  ;;  %487 = vst [vmem:[#allocation3 + $0x54] sm:$0x1] %v486_v28 }
  0x3d   : > { %490 = vst [vmem:[#allocation3 + $0x60] sm:$0x1] %v489_v29  ;;  %v492_v32 = vsel %vm7801_vm8, 0, %v491_v30  ;;  %v495_v33 = vsel %vm7801_vm8, 0, %v494_v31  ;;  %v497_v34 = vld [vmem:[#allocation3 + $0x84] sm:$0x1] }
  0x3e   : > { %v500_v35 = vld [vmem:[#allocation3 + $0x90] sm:$0x1]  ;;  %493 = vst [vmem:[#allocation3 + $0x6c] sm:$0x1] %v492_v32  ;;  %496 = vst [vmem:[#allocation3 + $0x78] sm:$0x1] %v495_v33 }
  0x3f   : > { %v498_v37 = vsel %vm7801_vm8, 0, %v497_v34  ;;  %v501_v38 = vsel %vm7801_vm8, 0, %v500_v35  ;;  %v503_v39 = vld [vmem:[#allocation3 + $0x9c] sm:$0x1]  ;;  %v506_v40 = vld [vmem:[#allocation3 + $0xa8] sm:$0x1] }
  0x40   : > { %499 = vst [vmem:[#allocation3 + $0x84] sm:$0x1] %v498_v37  ;;  %502 = vst [vmem:[#allocation3 + $0x90] sm:$0x1] %v501_v38  ;;  %v504_v41 = vsel %vm7801_vm8, 0, %v503_v39  ;;  %v507_v42 = vsel %vm7801_vm8, 0, %v506_v40 }
  0x41   : > { %v509_v43 = vld [vmem:[#allocation3 + $0xb4] sm:$0x1]  ;;  %v512_v44 = vld [vmem:[#allocation3 + $0xc0] sm:$0x1]  ;;  %505 = vst [vmem:[#allocation3 + $0x9c] sm:$0x1] %v504_v41 }
  0x42   : > { %508 = vst [vmem:[#allocation3 + $0xa8] sm:$0x1] %v507_v42  ;;  %v510_v45 = vsel %vm7801_vm8, 0, %v509_v43  ;;  %v513_v46 = vsel %vm7801_vm8, 0, %v512_v44  ;;  %v515_v47 = vld [vmem:[#allocation3 + $0xcc] sm:$0x1] }
  0x43   : > { %v519_v48 = vld [vmem:[#allocation3 + $0x8] sm:$0x1]  ;;  %511 = vst [vmem:[#allocation3 + $0xb4] sm:$0x1] %v510_v45  ;;  %514 = vst [vmem:[#allocation3 + $0xc0] sm:$0x1] %v513_v46 }
  0x44   : > { %v516_v49 = vsel %vm7801_vm8, 0, %v515_v47  ;;  %v520_v50 = vsel %vm7843_vm9, 0, %v519_v48  ;;  %v522_v51 = vld [vmem:[#allocation3 + $0x14] sm:$0x1]  ;;  %v525_v52 = vld [vmem:[#allocation3 + $0x20] sm:$0x1] }
  0x45   : > { %517 = vst [vmem:[#allocation3 + $0xcc] sm:$0x1] %v516_v49  ;;  %521 = vst [vmem:[#allocation3 + $0x8] sm:$0x1] %v520_v50  ;;  %v523_v53 = vsel %vm7843_vm9, 0, %v522_v51  ;;  %v526_v54 = vsel %vm7843_vm9, 0, %v525_v52 }
  0x46   : > { %v528_v55 = vld [vmem:[#allocation3 + $0x2c] sm:$0x1]  ;;  %v531_v56 = vld [vmem:[#allocation3 + $0x38] sm:$0x1]  ;;  %524 = vst [vmem:[#allocation3 + $0x14] sm:$0x1] %v523_v53 }
  0x47   : > { %527 = vst [vmem:[#allocation3 + $0x20] sm:$0x1] %v526_v54  ;;  %v529_v57 = vsel %vm7843_vm9, 0, %v528_v55  ;;  %v532_v58 = vsel %vm7843_vm9, 0, %v531_v56  ;;  %v534_v59 = vld [vmem:[#allocation3 + $0x44] sm:$0x1] }
  0x48   : > { %v537_v60 = vld [vmem:[#allocation3 + $0x50] sm:$0x1]  ;;  %530 = vst [vmem:[#allocation3 + $0x2c] sm:$0x1] %v529_v57  ;;  %533 = vst [vmem:[#allocation3 + $0x38] sm:$0x1] %v532_v58 }
  0x49   : > { %v535_v61 = vsel %vm7843_vm9, 0, %v534_v59  ;;  %v538_v62 = vsel %vm7843_vm9, 0, %v537_v60  ;;  %v540_v63 = vld [vmem:[#allocation3 + $0x5c] sm:$0x1]  ;;  %v543_v0 = vld [vmem:[#allocation3 + $0x68] sm:$0x1] }
  0x4a   : > { %536 = vst [vmem:[#allocation3 + $0x44] sm:$0x1] %v535_v61  ;;  %539 = vst [vmem:[#allocation3 + $0x50] sm:$0x1] %v538_v62  ;;  %v541_v1 = vsel %vm7843_vm9, 0, %v540_v63  ;;  %v544_v2 = vsel %vm7843_vm9, 0, %v543_v0 }
  0x4b   : > { %v546_v3 = vld [vmem:[#allocation3 + $0x74] sm:$0x1]  ;;  %v549_v4 = vld [vmem:[#allocation3 + $0x80] sm:$0x1]  ;;  %542 = vst [vmem:[#allocation3 + $0x5c] sm:$0x1] %v541_v1 }
  0x4c   : > { %545 = vst [vmem:[#allocation3 + $0x68] sm:$0x1] %v544_v2  ;;  %v547_v5 = vsel %vm7843_vm9, 0, %v546_v3  ;;  %v550_v6 = vsel %vm7843_vm9, 0, %v549_v4  ;;  %v552_v7 = vld [vmem:[#allocation3 + $0x8c] sm:$0x1] }
  0x4d   : > { %v555_v8 = vld [vmem:[#allocation3 + $0x98] sm:$0x1]  ;;  %548 = vst [vmem:[#allocation3 + $0x74] sm:$0x1] %v547_v5  ;;  %551 = vst [vmem:[#allocation3 + $0x80] sm:$0x1] %v550_v6 }
  0x4e   : > { %v553_v9 = vsel %vm7843_vm9, 0, %v552_v7  ;;  %v556_v10 = vsel %vm7843_vm9, 0, %v555_v8  ;;  %v558_v11 = vld [vmem:[#allocation3 + $0xa4] sm:$0x1]  ;;  %v561_v12 = vld [vmem:[#allocation3 + $0xb0] sm:$0x1] }
  0x4f   : > { %554 = vst [vmem:[#allocation3 + $0x8c] sm:$0x1] %v553_v9  ;;  %557 = vst [vmem:[#allocation3 + $0x98] sm:$0x1] %v556_v10  ;;  %v559_v13 = vsel %vm7843_vm9, 0, %v558_v11  ;;  %v562_v14 = vsel %vm7843_vm9, 0, %v561_v12 }
  0x50   : > { %v564_v15 = vld [vmem:[#allocation3 + $0xbc] sm:$0x1]  ;;  %v567_v16 = vld [vmem:[#allocation3 + $0xc8] sm:$0x1]  ;;  %560 = vst [vmem:[#allocation3 + $0xa4] sm:$0x1] %v559_v13 }
  0x51   : > { %563 = vst [vmem:[#allocation3 + $0xb0] sm:$0x1] %v562_v14  ;;  %v565_v17 = vsel %vm7843_vm9, 0, %v564_v15  ;;  %v568_v18 = vsel %vm7843_vm9, 0, %v567_v16  ;;  %v570_v19 = vld [vmem:[#allocation3 + $0xd4] sm:$0x1] }
  0x52   : > { %566 = vst [vmem:[#allocation3 + $0xbc] sm:$0x1] %v565_v17  ;;  %569 = vst [vmem:[#allocation3 + $0xc8] sm:$0x1] %v568_v18  ;;  %v571_v20 = vsel %vm7843_vm9, 0, %v570_v19 }
  0x53   : > { %572 = vst [vmem:[#allocation3 + $0xd4] sm:$0x1] %v571_v20 }
  0x54 PF: > { %v1048_v21 = vld [vmem:[%s7713_s12 + $0x4] sm:$0xf]  ;;  %v1047_v22 = vld [vmem:[%s7713_s12] sm:$0xf]  ;;  %v1049_v27 = vld [vmem:[%s7713_s12 + $0x8] sm:$0xf] }
  0x55   : > { %v1088_v23 = vshrl.u32 %v1048_v21, 16  ;;  %v1091_v24 = vshll.u32 %v1048_v21, 16  ;;  %v1080_v25 = vshrl.u32 %v1047_v22, 16  ;;  %v1083_v26 = vshll.u32 %v1047_v22, 16  ;;  %v1050_v32 = vld [vmem:[%s7713_s12 + $0xc] sm:$0xf] }
  0x56   : > { %v1097_v28 = vshrl.u32 %v1049_v27, 16  ;;  %v1100_v29 = vshll.u32 %v1049_v27, 16  ;;  %vm605_vm10 = vsmask.f32 256  ;;  %vm606_vm11 = vsmask.f32 4368 }
  0x57   : > { %v1090_v30 = vrot.slane %v1088_v23, 7  ;;  %v1082_v31 = vrot.slane %v1080_v25, 7  ;;  %v1051_v33 = vld [vmem:[%s7713_s12 + $0x10] sm:$0xf]  ;;  %v1105_v35 = vshrl.u32 %v1050_v32, 16  ;;  %v1108_v36 = vshll.u32 %v1050_v32, 16  ;;  %vm7904_vm12 = vmor %vm605_vm10, %vm606_vm11 }
  0x58   : > { %v1099_v34 = vrot.slane %v1097_v28, 7  ;;  %v1052_v37 = vld [vmem:[%s7713_s12 + $0x14] sm:$0xf]  ;;  %v1114_v38 = vshrl.u32 %v1051_v33, 16  ;;  %s7644_s19 = smov 4   ;;  %v1117_v55 = vshll.u32 %v1051_v33, 16 }
  0x59   : > { %v1095_v39 = vrot.slane %v1090_v30, 4  ;;  %v1093_v40 = vor.u32 %v1091_v24, %v1090_v30  ;;  %v1085_v41 = vor.u32 %v1083_v26, %v1082_v31  ;;  %v1086_v42 = vrot.slane %v1082_v31, 4  ;;  %v1053_v52 = vld [vmem:[%s7713_s12 + $0x18] sm:$0xf]  ;;  %v1054_v54 = vld [vmem:[%s7713_s12 + $0x1c] sm:$0xf] }
  0x5a   : > { %v1107_v44 = vrot.slane %v1105_v35, 7  ;;  %v1102_v45 = vor.u32 %v1100_v29, %v1099_v34  ;;  %v1103_v46 = vrot.slane %v1099_v34, 4  ;;  %v1122_v47 = vshrl.u32 %v1052_v37, 16  ;;  %v1055_v62 = vld [vmem:[%s7713_s12 + $0x20] sm:$0xf]  ;;  %s7645_s20 = smov 8  }
  0x5b   : > { %1355 = vrot.lane.b32.xlu1 %v1095_v39, %s7644_s19  ;;  %1351 = vrot.lane.b32.xlu0 %v1085_v41, %s7644_s19  ;;  %v1094_v48 = vsel %vm7904_vm12, %v1086_v42, %v1093_v40  ;;  %v1116_v50 = vrot.slane %v1114_v38, 7  ;;  %v1125_v51 = vshll.u32 %v1052_v37, 16  ;;  %v1131_v57 = vshrl.u32 %v1053_v52, 16  ;;  %v1056_v63 = vld [vmem:[%s7713_s12 + $0x24] sm:$0xf]  ;;  %s7646_s21 = smov 16  }
  0x5c   : > { %v1110_v49 = vor.u32 %v1108_v36, %v1107_v44  ;;  %v1124_v53 = vrot.slane %v1122_v47, 7  ;;  %v1112_v56 = vrot.slane %v1107_v44, 4  ;;  %v1139_v61 = vshrl.u32 %v1054_v54, 16  ;;  %v1057_v0 = vld [vmem:[%s7713_s12 + $0x28] sm:$0xf]  ;;  %s7647_s22 = smov 24  }
  0x5d   : > { %v1120_v59 = vrot.slane %v1116_v50, 4  ;;  %v1119_v1 = vor.u32 %v1117_v55, %v1116_v50  ;;  %v1058_v2 = vld [vmem:[%s7713_s12 + $0x2c] sm:$0xf]  ;;  %v1133_v3 = vrot.slane %v1131_v57, 7  ;;  %v1134_v4 = vshll.u32 %v1053_v52, 16  ;;  %s7648_s23 = smov 48  }
  0x5e   : > { %v1111_v58 = vsel %vm7904_vm12, %v1103_v46, %v1110_v49  ;;  %v1127_v60 = vor.u32 %v1125_v51, %v1124_v53  ;;  %v1142_v5 = vshll.u32 %v1054_v54, 16  ;;  %v1148_v6 = vshrl.u32 %v1055_v62, 16  ;;  %v1059_v11 = vld [vmem:[%s7713_s12 + $0x30] sm:$0xf]  ;;  %v7928_v14 = vld [vmem:[%s7713_s12 + $0x38] sm:$0xf] }
  0x5f   : > { %1357 = vrot.lane.b32.xlu1 %v1102_v45, %s7644_s19  ;;  %1353 = vrot.lane.b32.xlu0 %v1094_v48, %s7644_s19  ;;  %v1141_v8 = vrot.slane %v1139_v61, 7  ;;  %v1156_v9 = vshrl.u32 %v1056_v63, 16  ;;  %v1165_v10 = vshrl.u32 %v1057_v0, 16  ;;  %v1173_v12 = vshrl.u32 %v1058_v2, 16  ;;  %v1062_v15 = vld [vmem:[%s7713_s12 + $0x3c] sm:$0xf] }
  0x60   : > { %v1128_v7 = vsel %vm7904_vm12, %v1120_v59, %v1127_v60  ;;  %v1129_v13 = vrot.slane %v1124_v53, 4  ;;  %v1136_v16 = vor.u32 %v1134_v4, %v1133_v3  ;;  %v1137_v17 = vrot.slane %v1133_v3, 4  ;;  %v1060_v26 = vld [vmem:[%s7713_s12 + $0x34] sm:$0xf]  ;;  %v7940_v32 = vld [vmem:[%s7713_s12 + $0x48] sm:$0xf] }
  0x61   : > { %v1159_v18 = vshll.u32 %v1056_v63, 16  ;;  %v1182_v19 = vshrl.u32 %v1059_v11, 16  ;;  %v1144_v20 = vor.u32 %v1142_v5, %v1141_v8  ;;  %v1150_v21 = vrot.slane %v1148_v6, 7  ;;  %v1066_v37 = vld [vmem:[%s7713_s12 + $0x4c] sm:$0xf]  ;;  %s7649_s24 = smov 40  }
  0x62   : > { %v7933_v22 = vrot.slane %v1156_v9, 7  ;;  %v1167_v23 = vrot.slane %v1165_v10, 7  ;;  %v7935_v24 = vrot.slane %v1173_v12, 7  ;;  %v1176_v25 = vshll.u32 %v1058_v2, 16  ;;  %v1063_v41 = vld [vmem:[%s7713_s12 + $0x40] sm:$0xf] }
  0x63   : > { %1361 = vrot.lane.b32.xlu1 %v1112_v56, %s7644_s19  ;;  %1359 = vrot.lane.b32.xlu0 %v1111_v58, %s7644_s19  ;;  %v1199_v27 = vshrl.u32 %v7928_v14, 16  ;;  %v1207_v28 = vshrl.u32 %v1062_v15, 16  ;;  %v1146_v29 = vrot.slane %v1141_v8, 4  ;;  %v1151_v30 = vshll.u32 %v1055_v62, 16  ;;  %v1064_v47 = vld [vmem:[%s7713_s12 + $0x44] sm:$0xf] }
  0x64   : > { %v1154_v31 = vrot.slane %v1150_v21, 4  ;;  %v1161_v33 = vor.u32 %v1159_v18, %v7933_v22  ;;  %v7945_v34 = vrot.slane %v1182_v19, 7  ;;  %v1185_v35 = vshll.u32 %v1059_v11, 16  ;;  %v1067_v56 = vld [vmem:[%s7713_s12 + $0x50] sm:$0xf]  ;;  %s7650_s25 = smov 64  }
  0x65   : > { %v1168_v36 = vshll.u32 %v1057_v0, 16  ;;  %v1145_v38 = vsel %vm7904_vm12, %v1137_v17, %v1144_v20  ;;  %v1171_v39 = vrot.slane %v1167_v23, 4  ;;  %v1190_v40 = vshrl.u32 %v1060_v26, 16  ;;  %v7966_v57 = vld [vmem:[%s7713_s12 + $0x54] sm:$0xf]  ;;  %s7651_s26 = smov 32  }
  0x66   : > { %v1178_v42 = vor.u32 %v1176_v25, %v7935_v24  ;;  %v1201_v44 = vrot.slane %v1199_v27, 7  ;;  %v7952_v45 = vrot.slane %v1207_v28, 7  ;;  %v1210_v46 = vshll.u32 %v1062_v15, 16  ;;  %v7972_v62 = vld [vmem:[%s7713_s12 + $0x58] sm:$0xf]  ;;  %s7652_s28 = smov 56  }
  0x67   : > { %1365 = vrot.lane.b32.xlu1 %v1128_v7, %s7644_s19  ;;  %1363 = vrot.lane.b32.xlu0 %v1119_v1, %s7644_s19  ;;  %v1153_v48 = vor.u32 %v1151_v30, %v1150_v21  ;;  %v1163_v49 = vrot.slane %v7933_v22, 4  ;;  %v1233_v50 = vshrl.u32 %v7940_v32, 16  ;;  %v1241_v51 = vshrl.u32 %v1066_v37, 16  ;;  %v1070_v7 = vld [vmem:[%s7713_s12 + $0x5c] sm:$0xf] }
  0x68   : > { %v1162_v52 = vsel %vm7904_vm12, %v1154_v31, %v1161_v33  ;;  %v7962_v53 = vor.u32 %v1185_v35, %v7945_v34  ;;  %v1170_v54 = vor.u32 %v1168_v36, %v1167_v23  ;;  %v1216_v55 = vshrl.u32 %v1063_v41, 16 }
  0x69   : > { %v7968_v58 = vrot.slane %v1190_v40, 7  ;;  %v1180_v59 = vrot.slane %v7935_v24, 4  ;;  %v1193_v60 = vshll.u32 %v1060_v26, 16  ;;  %v1224_v61 = vshrl.u32 %v1064_v47, 16 }
  0x6a   : > { %v1179_v63 = vsel %vm7904_vm12, %v1171_v39, %v1178_v42  ;;  %v1205_v0 = vrot.slane %v1201_v44, 4  ;;  %v1212_v1 = vor.u32 %v1210_v46, %v7952_v45  ;;  %v1188_v2 = vrot.slane %v7945_v34, 4  ;;  %v8038_v46 = vld [vmem:[%s7713_s12 + $0x6c] sm:$0xf] }
  0x6b   : > { %1369 = vrot.lane.b32.xlu1 %v1136_v16, %s7644_s19  ;;  %1367 = vrot.lane.b32.xlu0 %v1129_v13, %s7644_s19  ;;  %v1235_v3 = vrot.slane %v1233_v50, 7  ;;  %v7978_v4 = vrot.slane %v1241_v51, 7  ;;  %v1244_v5 = vshll.u32 %v1066_v37, 16  ;;  %v1227_v6 = vshll.u32 %v1064_v47, 16  ;;  %v8018_v37 = vld [vmem:[%s7713_s12 + $0x64] sm:$0xf] }
  0x6c   : > { %v1218_v8 = vrot.slane %v1216_v55, 7  ;;  %v1250_v9 = vshrl.u32 %v1067_v56, 16  ;;  %v1258_v10 = vshrl.u32 %v7966_v57, 16  ;;  %v1267_v11 = vshrl.u32 %v7972_v62, 16  ;;  %v573_v51 = vld [vmem:[%s7718_s15] sm:$0xf] }
  0x6d   : > { %v1195_v12 = vor.u32 %v1193_v60, %v7968_v58  ;;  %v1219_v13 = vshll.u32 %v1063_v41, 16  ;;  %v1202_v15 = vshll.u32 %v7928_v14, 16  ;;  %v7987_v16 = vrot.slane %v1224_v61, 7  ;;  %v8057_v61 = vld [vmem:[%s7713_s12 + $0x74] sm:$0xf] }
  0x6e   : > { %v1197_v17 = vrot.slane %v7968_v58, 4  ;;  %v1214_v18 = vrot.slane %v7952_v45, 4  ;;  %v1222_v19 = vrot.slane %v1218_v8, 4  ;;  %v1275_v20 = vshrl.u32 %v1070_v7, 16 }
  0x6f   : > { %1373 = vrot.lane.b32.xlu1 %v1146_v29, %s7644_s19  ;;  %1371 = vrot.lane.b32.xlu0 %v1145_v38, %s7644_s19  ;;  %v1239_v21 = vrot.slane %v1235_v3, 4  ;;  %v1246_v22 = vor.u32 %v1244_v5, %v7978_v4  ;;  %v1229_v23 = vor.u32 %v1227_v6, %v7987_v16  ;;  %v1236_v24 = vshll.u32 %v7940_v32, 16  ;;  %v8011_v32 = vld [vmem:[%s7713_s12 + $0x60] sm:$0xf]  ;;  %v8021_v38 = vld [vmem:[%s7718_s15 + $0x4] sm:$0xf] }
  0x70   : > { %v7996_v14 = vrot.slane %v1250_v9, 7  ;;  %v1253_v25 = vshll.u32 %v1067_v56, 16  ;;  %v7998_v26 = vrot.slane %v1258_v10, 7  ;;  %v8000_v27 = vrot.slane %v1267_v11, 7  ;;  %v575_v5 = vld [vmem:[%s7718_s15 + $0x8] sm:$0xf] }
  0x71   : > { %v8004_v28 = vsel %vm7904_vm12, %v1205_v0, %v1212_v1  ;;  %v1196_v29 = vsel %vm7904_vm12, %v1188_v2, %v1195_v12  ;;  %v8008_v30 = vor.u32 %v1219_v13, %v1218_v8  ;;  %v1204_v31 = vor.u32 %v1202_v15, %v1201_v44  ;;  %v8035_v44 = vld [vmem:[%s7713_s12 + $0x68] sm:$0xf]  ;;  %v8074_v10 = vld [vmem:[%s7713_s12 + $0x70] sm:$0xf]  ;;  %v4367_v15 = vld [vmem:[#allocation3 + $0xbc] sm:$0x1] }
  0x72   : > { %v1231_v33 = vrot.slane %v7987_v16, 4  ;;  %v1248_v34 = vrot.slane %v7978_v4, 4  ;;  %v8015_v35 = vrot.slane %v1275_v20, 7  ;;  %v1278_v36 = vshll.u32 %v1070_v7, 16 }
  0x73   : > { %1375 = vrot.lane.b32.xlu0 %v1153_v48, %s7644_s19  ;;  %1377 = vrot.lane.b32.xlu1 %v1162_v52, %s7644_s19  ;;  %v8025_v39 = vsel %vm7904_vm12, %v1239_v21, %v1246_v22  ;;  %v8029_v40 = vsel %vm7904_vm12, %v1222_v19, %v1229_v23  ;;  %v8031_v41 = vor.u32 %v1236_v24, %v1235_v3  ;;  %v1261_v42 = vshll.u32 %v7966_v57, 16  ;;  %v932_v19 = vld [vmem:[#allocation2 + $0xc] sm:$0xf] }
  0x74   : > { %v8043_v47 = vor.u32 %v1253_v25, %v7996_v14  ;;  %v1265_v48 = vrot.slane %v7998_v26, 4  ;;  %v1256_v50 = vrot.slane %v7996_v14, 4  ;;  %v1284_v52 = vshrl.u32 %v8011_v32, 16  ;;  %v942_v25 = vld [vmem:[#allocation2 + $0x18] sm:$0xf] }
  0x75   : > { %v617_v55 = vshrl.u32 %v8021_v38, 16  ;;  %vm937_vm13 = vcmask 24576   ;;  %v1280_v56 = vor.u32 %v1278_v36, %v8015_v35  ;;  %v1270_v57 = vshll.u32 %v7972_v62, 16 }
  0x76   : > { %v1309_v60 = vshrl.u32 %v8038_v46, 16  ;;  %v1263_v0 = vor.u32 %v1261_v42, %v7998_v26  ;;  %v1292_v1 = vshrl.u32 %v8018_v37, 16  ;;  %v609_v3 = vshrl.u32 %v573_v51, 16  ;;  %vm8068_vm14 = vmand %vm937_vm13, %vm605_vm10 }
  0x77   : > { %1379 = vrot.lane.b32.xlu0 %v1163_v49, %s7644_s19  ;;  %1381 = vrot.lane.b32.xlu1 %v1170_v54, %s7644_s19  ;;  %v1273_v49 = vrot.slane %v8000_v27, 4  ;;  %v1287_v54 = vshll.u32 %v8011_v32, 16  ;;  %v619_v2 = vrot.slane %v617_v55, 7  ;;  %v1282_v62 = vrot.slane %v8015_v35, 4  ;;  %v8113_v55 = vld [vmem:[%s7713_s12 + $0x78] sm:$0xf] }
  0x78   : > { %v612_v7 = vshll.u32 %v573_v51, 16  ;;  %vm929_vm15 = vcmask 27648   ;;  %vm930_vm0 = vsmask.f32 7938  ;;  %v1286_v8 = vrot.slane %v1284_v52, 7 }
  0x79   : > { %v1312_v9 = vshll.u32 %v8038_v46, 16  ;;  %v611_v11 = vrot.slane %v609_v3, 7  ;;  %v8078_v13 = vrot.slane %v1309_v60, 7  ;;  %vm8082_vm1 = vmand %vm929_vm15, %vm930_vm0  ;;  %v626_v20 = vshrl.u32 %v575_v5, 16 }
  0x7a   : > { %v629_v21 = vshll.u32 %v575_v5, 16  ;;  %v1295_v22 = vshll.u32 %v8018_v37, 16  ;;  %v1326_v23 = vshrl.u32 %v8057_v61, 16  ;;  %v8096_v36 = vor.u32 %v1270_v57, %v8000_v27 }
  0x7b   : > { %1383 = vrot.lane.b32.xlu0 %v1179_v63, %s7644_s19  ;;  %1385 = vrot.lane.b32.xlu1 %v1180_v59, %s7644_s19  ;;  %v1301_v59 = vshrl.u32 %v8035_v44, 16  ;;  %v939_v63 = vld [vmem:[#allocation2 + $0x14] sm:$0x1]  ;;  %v614_v14 = vor.u32 %v612_v7, %v611_v11  ;;  %v628_v37 = vrot.slane %v626_v20, 7  ;;  %v615_v42 = vrot.slane %v611_v11, 4 }
  0x7c   : > { %v620_v46 = vshll.u32 %v8021_v38, 16  ;;  %v8101_v51 = vsel %vm7904_vm12, %v1273_v49, %v1280_v56  ;;  %v8103_v52 = vrot.slane %v1292_v1, 7  ;;  %v1318_v58 = vshrl.u32 %v8074_v10, 16  ;;  %v577_v1 = vld [vmem:[%s7718_s15 + $0x10] sm:$0xf] }
  0x7d   : > { %v8076_v12 = vrot.slane %v1301_v59, 7  ;;  %v8110_v27 = vsel %vm7904_vm12, %v1256_v50, %v1263_v0  ;;  %v631_v38 = vor.u32 %v629_v21, %v628_v37  ;;  %v1314_v56 = vor.u32 %v1312_v9, %v8078_v13  ;;  %v578_v9 = vld [vmem:[%s7718_s15 + $0x14] sm:$0xf]  ;;  %v946_v20 = vld [vmem:[#allocation2 + $0x20] sm:$0x1] }
  0x7e   : > { %v622_v57 = vor.u32 %v620_v46, %v619_v2  ;;  %v1297_v59 = vor.u32 %v1295_v22, %v8103_v52  ;;  %v8118_v60 = vrot.slane %v1326_v23, 7  ;;  %v8131_v50 = vor.u32 %v1287_v54, %v1286_v8  ;;  %v579_v22 = vld [vmem:[%s7718_s15 + $0x18] sm:$0xf] }
  0x7f   : > { %1387 = vrot.lane.b32.xlu0 %v7962_v53, %s7644_s19  ;;  %1389 = vrot.lane.b32.xlu1 %v1196_v29, %s7644_s19  ;;  %v624_v53 = vrot.slane %v619_v2, 4  ;;  %v576_v29 = vld [vmem:[%s7718_s15 + $0xc] sm:$0xf]  ;;  %v1307_v49 = vrot.slane %v8076_v12, 4  ;;  %v943_v0 = vsel %vm8082_vm1, %v631_v38, %v942_v25  ;;  %v1299_v5 = vrot.slane %v8103_v52, 4 }
  0x80   : > { %v623_v2 = vsel %vm7904_vm12, %v615_v42, %v622_v57  ;;  %v634_v3 = vshrl.u32 %v576_v29, 16  ;;  %v1321_v45 = vshll.u32 %v8074_v10, 16  ;;  %944 = vst [vmem:[#allocation2 + $0x18] sm:$0xf] %v943_v0  ;;  %v1335_v32 = vshrl.u32 %v8113_v55, 16 }
  0x81   : > { %v940_v24 = vsel %vm8068_vm14, %v624_v53, %v939_v63  ;;  %v8121_v63 = vld [vmem:[%s7713_s12 + $0x7c] sm:$0xf]  ;;  %936 = vst.msk [vmem:[#allocation2 + $0x10] sm:$0xf] %vm929_vm15, %v623_v2  ;;  %v632_v7 = vrot.slane %v628_v37, 4  ;;  %v8147_v53 = vsel %vm7904_vm12, %v1307_v49, %v1314_v56  ;;  %v643_v21 = vshrl.u32 %v577_v1, 16 }
  0x82   : > { %941 = vst [vmem:[#allocation2 + $0x14] sm:$0x1] %v940_v24  ;;  %v636_v54 = vrot.slane %v634_v3, 7  ;;  %v1316_v23 = vrot.slane %v8078_v13, 4  ;;  %v1343_v24 = vshrl.u32 %v8121_v63, 16  ;;  %v646_v42 = vshll.u32 %v577_v1, 16 }
  0x83   : > { %1391 = vrot.lane.b32.xlu0 %v1197_v17, %s7644_s19  ;;  %1393 = vrot.lane.b32.xlu1 %v1204_v31, %s7644_s19  ;;  %v933_v17 = vsel %vm8082_vm1, %v614_v14, %v932_v19  ;;  %v1290_v31 = vrot.slane %v1286_v8, 4  ;;  %v637_v8 = vshll.u32 %v576_v29, 16  ;;  %v1333_v19 = vrot.slane %v8118_v60, 4  ;;  %v949_v38 = vld [vmem:[#allocation2 + $0x24] sm:$0xf] }
  0x84   : > { %934 = vst [vmem:[#allocation2 + $0xc] sm:$0xf] %v933_v17  ;;  %v641_v14 = vrot.slane %v636_v54, 4  ;;  %v1346_v29 = vshll.u32 %v8121_v63, 16  ;;  %v645_v37 = vrot.slane %v643_v21, 7  ;;  %v651_v46 = vshrl.u32 %v578_v9, 16 }
  0x85   : > { %v8151_v11 = vsel %vm7904_vm12, %v1290_v31, %v1297_v59  ;;  %v639_v25 = vor.u32 %v637_v8, %v636_v54  ;;  %v8163_v17 = vrot.slane %v1335_v32, 7  ;;  %v654_v31 = vshll.u32 %v578_v9, 16  ;;  %v581_v57 = vld [vmem:[%s7718_s15 + $0x20] sm:$0xf]  ;;  %v582_v0 = vld [vmem:[%s7718_s15 + $0x24] sm:$0xf] }
  0x86   : > { %v1329_v49 = vshll.u32 %v8057_v61, 16  ;;  %v648_v56 = vor.u32 %v646_v42, %v645_v37  ;;  %v649_v59 = vrot.slane %v645_v37, 4  ;;  %v653_v1 = vrot.slane %v651_v46, 7  ;;  %v953_v32 = vld [vmem:[#allocation2 + $0x2c] sm:$0x1] }
  0x87   : > { %1395 = vrot.lane.b32.xlu0 %v8004_v28, %s7644_s19  ;;  %1397 = vrot.lane.b32.xlu1 %v1214_v18, %s7644_s19  ;;  %v8138_v28 = vrot.slane %v1318_v58, 7  ;;  %v1304_v18 = vshll.u32 %v8035_v44, 16  ;;  %v580_v58 = vld [vmem:[%s7718_s15 + $0x1c] sm:$0xf]  ;;  %v660_v2 = vshrl.u32 %v579_v22, 16  ;;  %v663_v3 = vshll.u32 %v579_v22, 16 }
  0x88   : > { %v668_v54 = vshrl.u32 %v580_v58, 16  ;;  %v656_v8 = vor.u32 %v654_v31, %v653_v1  ;;  %v658_v9 = vrot.slane %v653_v1, 4  ;;  %v956_v21 = vld [vmem:[#allocation2 + $0x30] sm:$0xf]  ;;  %v677_v16 = vshrl.u32 %v581_v57, 16 }
  0x89   : > { %v680_v37 = vshll.u32 %v581_v57, 16  ;;  %v685_v22 = vshrl.u32 %v582_v0, 16  ;;  %v583_v42 = vld [vmem:[%s7718_s15 + $0x28] sm:$0xf]  ;;  %v584_v31 = vld [vmem:[%s7718_s15 + $0x2c] sm:$0xf]  ;;  %v1331_v52 = vor.u32 %v1329_v49, %v8118_v60 }
  0x8a   : > { %v657_v46 = vsel %vm7904_vm12, %v649_v59, %v656_v8  ;;  %v694_v8 = vshrl.u32 %v583_v42, 16  ;;  %v596_v61 = vld [vmem:[%s7718_s15 + $0x5c] sm:$0xf]  ;;  %v8296_v49 = vld [vmem:[#allocation2 + $0x8] ss:$0 sps:$4 sm:$0x11]  }
  0x8b   : > { %1399 = vrot.lane.b32.xlu0 %v8008_v30, %s7644_s19  ;;  %1401 = vrot.lane.b32.xlu1 %v8029_v40, %s7644_s19  ;;  %v947_v30 = vsel %vm8068_vm14, %v641_v14, %v946_v20  ;;  %v640_v40 = vsel %vm7904_vm12, %v632_v7, %v639_v25  ;;  %v671_v7 = vshll.u32 %v580_v58, 16  ;;  %v950_v20 = vsel %vm8082_vm1, %v648_v56, %v949_v38  ;;  %v960_v14 = vld [vmem:[#allocation2 + $0x38] sm:$0x1]  ;;  %v585_v38 = vld [vmem:[%s7718_s15 + $0x30] sm:$0xf] }
  0x8c   : > { %948 = vst [vmem:[#allocation2 + $0x20] sm:$0x1] %v947_v30  ;;  %945 = vst.msk [vmem:[#allocation2 + $0x1c] sm:$0xf] %vm929_vm15, %v640_v40  ;;  %v670_v25 = vrot.slane %v668_v54, 7  ;;  %v954_v58 = vsel %vm8068_vm14, %v658_v9, %v953_v32  ;;  %v679_v30 = vrot.slane %v677_v16, 7 }
  0x8d   : > { %951 = vst [vmem:[#allocation2 + $0x24] sm:$0xf] %v950_v20  ;;  %v688_v40 = vshll.u32 %v582_v0, 16  ;;  %952 = vst.msk [vmem:[#allocation2 + $0x28] sm:$0xf] %vm929_vm15, %v657_v46  ;;  %v687_v32 = vrot.slane %v685_v22, 7 }
  0x8e   : > { %955 = vst [vmem:[#allocation2 + $0x2c] sm:$0x1] %v954_v58  ;;  %v675_v56 = vrot.slane %v670_v25, 4  ;;  %v673_v1 = vor.u32 %v671_v7, %v670_v25  ;;  %v682_v0 = vor.u32 %v680_v37, %v679_v30  ;;  %v683_v54 = vrot.slane %v679_v30, 4  ;;  %v970_v9 = vld [vmem:[#allocation2 + $0x48] sm:$0xf] }
  0x8f   : > { %1403 = vrot.lane.b32.xlu0 %v1231_v33, %s7644_s19  ;;  %1405 = vrot.lane.b32.xlu1 %v8031_v41, %s7644_s19  ;;  %v662_v33 = vrot.slane %v660_v2, 7  ;;  %v963_v41 = vld [vmem:[#allocation2 + $0x3c] sm:$0xf]  ;;  %v967_v2 = vld [vmem:[#allocation2 + $0x44] sm:$0x1]  ;;  %v696_v25 = vrot.slane %v694_v8, 7 }
  0x90   : > { %v961_v4 = vsel %vm8068_vm14, %v675_v56, %v960_v14  ;;  %v8200_v20 = vld [vmem:[%s7718_s15 + $0x34] sm:$0xf]  ;;  %v587_v7 = vld [vmem:[%s7718_s15 + $0x38] sm:$0xf]  ;;  %v964_v16 = vsel %vm8082_vm1, %v682_v0, %v963_v41  ;;  %v588_v37 = vld [vmem:[%s7718_s15 + $0x3c] sm:$0xf] }
  0x91   : > { %v665_v57 = vor.u32 %v663_v3, %v662_v33  ;;  %v666_v59 = vrot.slane %v662_v33, 4  ;;  %v697_v3 = vshll.u32 %v583_v42, 16  ;;  %962 = vst [vmem:[#allocation2 + $0x38] sm:$0x1] %v961_v4  ;;  %v692_v33 = vrot.slane %v687_v32, 4 }
  0x92   : > { %965 = vst [vmem:[#allocation2 + $0x3c] sm:$0xf] %v964_v16  ;;  %v702_v14 = vshrl.u32 %v584_v31, 16  ;;  %v705_v22 = vshll.u32 %v584_v31, 16  ;;  %v711_v42 = vshrl.u32 %v585_v38, 16  ;;  %v714_v46 = vshll.u32 %v585_v38, 16 }
  0x93   : > { %1407 = vrot.lane.b32.xlu0 %v8025_v39, %s7644_s19  ;;  %1409 = vrot.lane.b32.xlu1 %v1248_v34, %s7644_s19  ;;  %v957_v39 = vsel %vm8082_vm1, %v665_v57, %v956_v21  ;;  %v674_v34 = vsel %vm7904_vm12, %v666_v59, %v673_v1  ;;  %v690_v21 = vor.u32 %v688_v40, %v687_v32  ;;  %v700_v40 = vrot.slane %v696_v25, 4  ;;  %v977_v57 = vld [vmem:[#allocation2 + $0x54] sm:$0xf]  ;;  %v974_v59 = vld [vmem:[#allocation2 + $0x50] sm:$0x1] }
  0x94   : > { %958 = vst [vmem:[#allocation2 + $0x30] sm:$0xf] %v957_v39  ;;  %959 = vst.msk [vmem:[#allocation2 + $0x34] sm:$0xf] %vm929_vm15, %v674_v34  ;;  %v968_v58 = vsel %vm8068_vm14, %v692_v33, %v967_v2  ;;  %v699_v30 = vor.u32 %v697_v3, %v696_v25  ;;  %v713_v56 = vrot.slane %v711_v42, 7  ;;  %v728_v31 = vshrl.u32 %v587_v7, 16 }
  0x95   : > { %v691_v41 = vsel %vm7904_vm12, %v683_v54, %v690_v21  ;;  %969 = vst [vmem:[#allocation2 + $0x44] sm:$0x1] %v968_v58  ;;  %v731_v1 = vshll.u32 %v587_v7, 16  ;;  %v736_v2 = vshrl.u32 %v588_v37, 16  ;;  %v739_v0 = vshll.u32 %v588_v37, 16 }
  0x96   : > { %966 = vst.msk [vmem:[#allocation2 + $0x40] sm:$0xf] %vm929_vm15, %v691_v41  ;;  %v971_v38 = vsel %vm8082_vm1, %v699_v30, %v970_v9  ;;  %v716_v8 = vor.u32 %v714_v46, %v713_v56  ;;  %v981_v39 = vld [vmem:[#allocation2 + $0x5c] sm:$0x1]  ;;  %v589_v34 = vld [vmem:[%s7718_s15 + $0x40] sm:$0xf] }
  0x97   : > { %1411 = vrot.lane.b32.xlu0 %v8043_v47, %s7644_s19  ;;  %1413 = vrot.lane.b32.xlu1 %v8110_v27, %s7644_s19  ;;  %v704_v47 = vrot.slane %v702_v14, 7  ;;  %v719_v27 = vshrl.u32 %v8200_v20, 16  ;;  %972 = vst [vmem:[#allocation2 + $0x48] sm:$0xf] %v971_v38  ;;  %v730_v3 = vrot.slane %v728_v31, 7  ;;  %v738_v9 = vrot.slane %v736_v2, 7 }
  0x98   : > { %v717_v7 = vrot.slane %v713_v56, 4  ;;  %v722_v16 = vshll.u32 %v8200_v20, 16  ;;  %v984_v21 = vld [vmem:[#allocation2 + $0x60] sm:$0xf]  ;;  %v590_v25 = vld [vmem:[%s7718_s15 + $0x44] sm:$0xf] }
  0x99   : > { %v707_v32 = vor.u32 %v705_v22, %v704_v47  ;;  %v709_v54 = vrot.slane %v704_v47, 4  ;;  %v721_v4 = vrot.slane %v719_v27, 7  ;;  %v733_v37 = vor.u32 %v731_v1, %v730_v3  ;;  %v988_v42 = vld [vmem:[#allocation2 + $0x68] sm:$0x1]  ;;  %v592_v47 = vld [vmem:[%s7718_s15 + $0x4c] sm:$0xf] }
  0x9a   : > { %v734_v20 = vrot.slane %v730_v3, 4  ;;  %v741_v14 = vor.u32 %v739_v0, %v738_v9  ;;  %v743_v22 = vrot.slane %v738_v9, 4  ;;  %v745_v41 = vshrl.u32 %v589_v34, 16  ;;  %v593_v3 = vld [vmem:[%s7718_s15 + $0x50] sm:$0xf] }
  0x9b   : > { %1415 = vrot.lane.b32.xlu0 %v1265_v48, %s7644_s19  ;;  %1417 = vrot.lane.b32.xlu1 %v8096_v36, %s7644_s19  ;;  %v708_v26 = vsel %vm7904_vm12, %v700_v40, %v707_v32  ;;  %v978_v48 = vsel %vm8082_vm1, %v716_v8, %v977_v57  ;;  %v726_v36 = vrot.slane %v721_v4, 4  ;;  %v975_v33 = vsel %vm8068_vm14, %v709_v54, %v974_v59  ;;  %v591_v40 = vld [vmem:[%s7718_s15 + $0x48] sm:$0xf]  ;;  %v991_v59 = vld [vmem:[#allocation2 + $0x6c] sm:$0xf] }
  0x9c   : > { %973 = vst.msk [vmem:[#allocation2 + $0x4c] sm:$0xf] %vm929_vm15, %v708_v26  ;;  %979 = vst [vmem:[#allocation2 + $0x54] sm:$0xf] %v978_v48  ;;  %v724_v58 = vor.u32 %v722_v16, %v721_v4  ;;  %v748_v30 = vshll.u32 %v589_v34, 16  ;;  %v742_v57 = vsel %vm7904_vm12, %v734_v20, %v741_v14  ;;  %v985_v56 = vsel %vm8082_vm1, %v733_v37, %v984_v21 }
  0x9d   : > { %976 = vst [vmem:[#allocation2 + $0x50] sm:$0x1] %v975_v33  ;;  %v982_v46 = vsel %vm8068_vm14, %v726_v36, %v981_v39  ;;  %v989_v35 = vsel %vm8068_vm14, %v743_v22, %v988_v42  ;;  %987 = vst.msk [vmem:[#allocation2 + $0x64] sm:$0xf] %vm929_vm15, %v742_v57  ;;  %v747_v27 = vrot.slane %v745_v41, 7  ;;  %v762_v31 = vshrl.u32 %v591_v40, 16 }
  0x9e   : > { %983 = vst [vmem:[#allocation2 + $0x5c] sm:$0x1] %v982_v46  ;;  %986 = vst [vmem:[#allocation2 + $0x60] sm:$0xf] %v985_v56  ;;  %v765_v38 = vshll.u32 %v591_v40, 16  ;;  %v770_v2 = vshrl.u32 %v592_v47, 16  ;;  %v1306_v54 = vor.u32 %v1304_v18, %v8076_v12 }
  0x9f   : > { %1419 = vrot.lane.b32.xlu0 %v8101_v51, %s7644_s19  ;;  %1421 = vrot.lane.b32.xlu1 %v1282_v62, %s7644_s19  ;;  %v753_v51 = vshrl.u32 %v590_v25, 16  ;;  %v725_v62 = vsel %vm7904_vm12, %v717_v7, %v724_v58  ;;  %990 = vst [vmem:[#allocation2 + $0x68] sm:$0x1] %v989_v35  ;;  %v773_v0 = vshll.u32 %v592_v47, 16  ;;  %v756_v32 = vshll.u32 %v590_v25, 16 }
  0xa0   : > { %980 = vst.msk [vmem:[#allocation2 + $0x58] sm:$0xf] %vm929_vm15, %v725_v62  ;;  %v750_v8 = vor.u32 %v748_v30, %v747_v27  ;;  %v995_v39 = vld [vmem:[#allocation2 + $0x74] sm:$0x1]  ;;  %v764_v4 = vrot.slane %v762_v31, 7  ;;  %v751_v34 = vrot.slane %v747_v27, 4  ;;  %v1323_v30 = vor.u32 %v1321_v45, %v8138_v28 }
  0xa1   : > { %v755_v1 = vrot.slane %v753_v51, 7  ;;  %v772_v7 = vrot.slane %v770_v2, 7  ;;  %v779_v26 = vshrl.u32 %v593_v3, 16  ;;  %v1612_v48 = vld [vmem:[#allocation2] sm:$0xf]  ;;  %v782_v44 = vshll.u32 %v593_v3, 16 }
  0xa2   : > { %v8261_v36 = vld [vmem:[#allocation2 + $0x4] sm:$0xf]  ;;  %v768_v33 = vrot.slane %v764_v4, 4  ;;  %v998_v37 = vld [vmem:[#allocation2 + $0x78] sm:$0xf]  ;;  %v8275_v20 = vrot.slane %v1343_v24, 7 }
  0xa3   : > { %1423 = vrot.lane.b32.xlu0 %v8131_v50, %s7644_s19  ;;  %1425 = vrot.lane.b32.xlu1 %v8151_v11, %s7644_s19  ;;  %v760_v9 = vrot.slane %v755_v1, 4  ;;  %v758_v16 = vor.u32 %v756_v32, %v755_v1  ;;  %v992_v50 = vsel %vm8082_vm1, %v750_v8, %v991_v59  ;;  %v767_v11 = vor.u32 %v765_v38, %v764_v4  ;;  %v594_v46 = vld [vmem:[%s7718_s15 + $0x54] sm:$0xf]  ;;  %v1005_v58 = vld [vmem:[#allocation2 + $0x84] sm:$0xf] }
  0xa4   : > { %993 = vst [vmem:[#allocation2 + $0x6c] sm:$0xf] %v992_v50  ;;  %v775_v18 = vor.u32 %v773_v0, %v772_v7  ;;  %v777_v21 = vrot.slane %v772_v7, 4  ;;  %v1324_v14 = vrot.slane %v8138_v28, 4  ;;  %v781_v22 = vrot.slane %v779_v26, 7 }
  0xa5   : > { %v996_v12 = vsel %vm8068_vm14, %v760_v9, %v995_v39  ;;  %v759_v25 = vsel %vm7904_vm12, %v751_v34, %v758_v16  ;;  %v999_v42 = vsel %vm8082_vm1, %v767_v11, %v998_v37  ;;  %v787_v41 = vshrl.u32 %v594_v46, 16  ;;  %v1002_v47 = vld [vmem:[#allocation2 + $0x80] sm:$0x1]  ;;  %v595_v57 = vld [vmem:[%s7718_s15 + $0x58] sm:$0xf] }
  0xa6   : > { %997 = vst [vmem:[#allocation2 + $0x74] sm:$0x1] %v996_v12  ;;  %994 = vst.msk [vmem:[#allocation2 + $0x70] sm:$0xf] %vm929_vm15, %v759_v25  ;;  %v776_v24 = vsel %vm7904_vm12, %v768_v33, %v775_v18  ;;  %v784_v40 = vor.u32 %v782_v44, %v781_v22  ;;  %v1003_v51 = vsel %vm8068_vm14, %v777_v21, %v1002_v47  ;;  %v796_v35 = vshrl.u32 %v595_v57, 16 }
  0xa7   : > { %1427 = vrot.lane.b32.xlu0 %v1299_v5, %s7644_s19  ;;  %1429 = vrot.lane.b32.xlu1 %v1306_v54, %s7644_s19  ;;  %v8286_v5 = vcombine.low %v1612_v48, %v8261_v36  ;;  %1000 = vst [vmem:[#allocation2 + $0x78] sm:$0xf] %v999_v42  ;;  %1001 = vst.msk [vmem:[#allocation2 + $0x7c] sm:$0xf] %vm929_vm15, %v776_v24  ;;  %v789_v56 = vrot.slane %v787_v41, 7  ;;  %v799_v62 = vshll.u32 %v595_v57, 16 }
  0xa8   : > { %v1338_v10 = vshll.u32 %v8113_v55, 16  ;;  %v1006_v28 = vsel %vm8082_vm1, %v784_v40, %v1005_v58  ;;  %v1009_v45 = vld [vmem:[#allocation2 + $0x8c] sm:$0x1]  ;;  %1004 = vst [vmem:[#allocation2 + $0x80] sm:$0x1] %v1003_v51  ;;  %v804_v27 = vshrl.u32 %v596_v61, 16  ;;  %v1332_v38 = vsel %vm7904_vm12, %v1324_v14, %v1331_v52 }
  0xa9   : > { %v807_v31 = vshll.u32 %v596_v61, 16  ;;  %v1937_v59 = vshll.u32 %v8286_v5, 16  ;;  %1007 = vst [vmem:[#allocation2 + $0x84] sm:$0xf] %v1006_v28  ;;  %v798_v1 = vrot.slane %v796_v35, 7  ;;  %v1341_v13 = vrot.slane %v8163_v17, 4 }
  0xaa   : > { %v785_v55 = vrot.slane %v781_v22, 4  ;;  %v790_v2 = vshll.u32 %v594_v46, 16  ;;  %v1348_v0 = vor.u32 %v1346_v29, %v8275_v20  ;;  %v1942_v39 = vshll.u32 %v8296_v49, 16  ;;  %v597_v9 = vld [vmem:[%s7718_s15 + $0x60] sm:$0xf] }
  0xab   : > { %1431 = vrot.lane.b32.xlu0 %v8147_v53, %s7644_s19  ;;  %1433 = vrot.lane.b32.xlu1 %v1316_v23, %s7644_s19  ;;  %v794_v53 = vrot.slane %v789_v56, 4  ;;  %v806_v23 = vrot.slane %v804_v27, 7  ;;  %v801_v54 = vor.u32 %v799_v62, %v798_v1  ;;  %v802_v8 = vrot.slane %v798_v1, 4  ;;  %v1660_v26 = vld [vmem:[#allocation2] sm:$0xe] }
  0xac   : > { %v1340_v4 = vor.u32 %v1338_v10, %v8163_v17  ;;  %v792_v3 = vor.u32 %v790_v2, %v789_v56  ;;  %v1935_v63 = vshrl.u32 %v8286_v5, 16  ;;  %v1939_v29 = vrot.slane %v1937_v59, 1  ;;  %v1012_v11 = vld [vmem:[#allocation2 + $0x90] sm:$0xf]  ;;  %v598_v33 = vld [vmem:[%s7718_s15 + $0x64] sm:$0xf] }
  0xad   : > { %v1010_v32 = vsel %vm8068_vm14, %v794_v53, %v1009_v45  ;;  %v809_v34 = vor.u32 %v807_v31, %v806_v23  ;;  %v813_v7 = vshrl.u32 %v597_v9, 16  ;;  %v816_v16 = vshll.u32 %v597_v9, 16  ;;  %v1019_v14 = vld [vmem:[#allocation2 + $0x9c] sm:$0xf]  ;;  %v1023_v52 = vld [vmem:[#allocation2 + $0xa4] sm:$0x1] }
  0xae   : > { %1011 = vst [vmem:[#allocation2 + $0x8c] sm:$0x1] %v1010_v32  ;;  %v793_v50 = vsel %vm7904_vm12, %v785_v55, %v792_v3  ;;  %v811_v44 = vrot.slane %v806_v23, 4  ;;  %v1013_v12 = vsel %vm8082_vm1, %v801_v54, %v1012_v11  ;;  %v821_v18 = vshrl.u32 %v598_v33, 16  ;;  %v1016_v60 = vld [vmem:[#allocation2 + $0x98] sm:$0x1] }
  0xaf   : > { %1435 = vrot.lane.b32.xlu0 %v1323_v30, %s7644_s19  ;;  %1437 = vrot.lane.b32.xlu1 %v1332_v38, %s7644_s19  ;;  %v810_v48 = vsel %vm7904_vm12, %v802_v8, %v809_v34  ;;  %1008 = vst.msk [vmem:[#allocation2 + $0x88] sm:$0xf] %vm929_vm15, %v793_v50  ;;  %v815_v17 = vrot.slane %v813_v7, 7  ;;  %v1349_v21 = vsel %vm7904_vm12, %v1341_v13, %v1348_v0  ;;  %vm1933_vm2 = vsmask.f32 7424 }
  0xb0   : > { %1015 = vst.msk [vmem:[#allocation2 + $0x94] sm:$0xf] %vm929_vm15, %v810_v48  ;;  %v1944_v25 = vrot.slane %v1942_v39, 1  ;;  %v1350_v37 = vrot.slane %v8275_v20, 4  ;;  %1014 = vst [vmem:[#allocation2 + $0x90] sm:$0xf] %v1013_v12  ;;  %v1940_v22 = vor.u32 %v1939_v29, %v1935_v63  ;;  %v6822_v42 = vcombine.low %v1660_v26, %v8261_v36 }
  0xb1   : > { %v818_v46 = vor.u32 %v816_v16, %v815_v17  ;;  %v823_v24 = vrot.slane %v821_v18, 7  ;;  %v599_v58 = vld [vmem:[%s7718_s15 + $0x68] sm:$0xf]  ;;  %v1017_v40 = vsel %vm8068_vm14, %v811_v44, %v1016_v60  ;;  %v2208_v20 = vrot.slane %v8296_v49, 1  ;;  %v601_v31 = vld [vmem:[%s7718_s15 + $0x70] sm:$0xf] }
  0xb2   : > { %v830_v47 = vshrl.u32 %v599_v58, 16  ;;  %1018 = vst [vmem:[#allocation2 + $0x98] sm:$0x1] %v1017_v40  ;;  %v833_v36 = vshll.u32 %v599_v58, 16  ;;  %v1945_v56 = vsel %vm1933_vm2, %v1940_v22, %v1944_v25  ;;  %v2207_v51 = vrot.slane %v6822_v42, 1 }
  0xb3   : > { %1439 = vrot.lane.b32.xlu0 %v1333_v19, %s7644_s19  ;;  %1441 = vrot.lane.b32.xlu1 %v1340_v4, %s7644_s19  ;;  %v600_v19 = vld [vmem:[%s7718_s15 + $0x6c] sm:$0xf]  ;;  %v1020_v41 = vsel %vm8082_vm1, %v818_v46, %v1019_v14  ;;  %v828_v30 = vrot.slane %v823_v24, 4  ;;  %vm2206_vm3 = vcmask 1046528   ;;  %v819_v28 = vrot.slane %v815_v17, 4 }
  0xb4   : > { %1021 = vst [vmem:[#allocation2 + $0x9c] sm:$0xf] %v1020_v41  ;;  %v838_v57 = vshrl.u32 %v600_v19, 16  ;;  %v841_v61 = vshll.u32 %v600_v19, 16  ;;  %v832_v62 = vrot.slane %v830_v47, 7  ;;  %v824_v49 = vshll.u32 %v598_v33, 16 }
  0xb5   : > { %v1024_v35 = vsel %vm8068_vm14, %v828_v30, %v1023_v52  ;;  %v847_v53 = vshrl.u32 %v601_v31, 16  ;;  %v2209_v1 = vsel %vm2206_vm3, %v2207_v51, %v2208_v20  ;;  %v850_v13 = vshll.u32 %v601_v31, 16  ;;  %v1026_v0 = vld [vmem:[#allocation2 + $0xa8] sm:$0xf]  ;;  %v1033_v54 = vld [vmem:[#allocation2 + $0xb4] sm:$0xf] }
  0xb6   : > { %1025 = vst [vmem:[#allocation2 + $0xa4] sm:$0x1] %v1024_v35  ;;  %v840_v10 = vrot.slane %v838_v57, 7  ;;  %v835_v45 = vor.u32 %v833_v36, %v832_v62  ;;  %v836_v27 = vrot.slane %v832_v62, 4  ;;  %v826_v59 = vor.u32 %v824_v49, %v823_v24  ;;  %v602_v39 = vld [vmem:[%s7718_s15 + $0x74] sm:$0xf] }
  0xb7   : > { %1443 = vrot.lane.b32.xlu0 %v1349_v21, %s7644_s19  ;;  %1445 = vrot.lane.b32.xlu1 %v1350_v37, %s7644_s19  ;;  %v849_v2 = vrot.slane %v847_v53, 7  ;;  %v855_v34 = vshrl.u32 %v602_v39, 16  ;;  %v1030_v63 = vld [vmem:[#allocation2 + $0xb0] sm:$0x1]  ;;  %v603_v29 = vld [vmem:[%s7718_s15 + $0x78] sm:$0xf] }
  0xb8   : > { %v843_v38 = vor.u32 %v841_v61, %v840_v10  ;;  %v827_v55 = vsel %vm7904_vm12, %v819_v28, %v826_v59  ;;  %v845_v32 = vrot.slane %v840_v10, 4  ;;  %v1027_v8 = vsel %vm8082_vm1, %v835_v45, %v1026_v0  ;;  %v1037_v7 = vld [vmem:[#allocation2 + $0xbc] sm:$0x1]  ;;  %v1040_v24 = vld [vmem:[#allocation2 + $0xc0] sm:$0xf] }
  0xb9   : > { %1022 = vst.msk [vmem:[#allocation2 + $0xa0] sm:$0xf] %vm929_vm15, %v827_v55  ;;  %v852_v4 = vor.u32 %v850_v13, %v849_v2  ;;  %1028 = vst [vmem:[#allocation2 + $0xa8] sm:$0xf] %v1027_v8  ;;  %v857_v9 = vrot.slane %v855_v34, 7  ;;  %v864_v48 = vshrl.u32 %v603_v29, 16 }
  0xba   : > { %v844_v23 = vsel %vm7904_vm12, %v836_v27, %v843_v38  ;;  %v1031_v16 = vsel %vm8068_vm14, %v845_v32, %v1030_v63  ;;  %v604_v26 = vld [vmem:[%s7718_s15 + $0x7c] sm:$0xf]  ;;  %v867_v50 = vshll.u32 %v603_v29, 16  ;;  %v853_v21 = vrot.slane %v849_v2, 4  ;;  %v1504_v41 = vld [vmem:[#allocation2 + $0x14] sm:$0x1] }
  0xbb   : > { %2126 = vrot.lane.b32.xlu0 %v1945_v56, %s7645_s20  ;;  %1029 = vst.msk [vmem:[#allocation2 + $0xac] sm:$0xf] %vm929_vm15, %v844_v23  ;;  %v1034_v3 = vsel %vm8082_vm1, %v852_v4, %v1033_v54  ;;  %v862_v11 = vrot.slane %v857_v9, 4  ;;  %1032 = vst [vmem:[#allocation2 + $0xb0] sm:$0x1] %v1031_v16  ;;  %v872_v33 = vshrl.u32 %v604_v26, 16 }
  0xbc   : > { %1035 = vst [vmem:[#allocation2 + $0xb4] sm:$0xf] %v1034_v3  ;;  %v875_v44 = vshll.u32 %v604_v26, 16  ;;  %v866_v17 = vrot.slane %v864_v48, 7  ;;  %v858_v25 = vshll.u32 %v602_v39, 16  ;;  %vm1502_vm4 = vcmask 57376  }
  0xbd   : > { %v1038_v12 = vsel %vm8068_vm14, %v862_v11, %v1037_v7  ;;  %v874_v18 = vrot.slane %v872_v33, 7  ;;  %vm1495_vm5 = vcmask 60448   ;;  %vm8378_vm6 = vmand %vm1502_vm4, %vm605_vm10  ;;  %v1497_v40 = vld [vmem:[#allocation2 + $0xc] sm:$0xf]  ;;  %v1044_v36 = vld [vmem:[#allocation2 + $0xc8] sm:$0x1] }
  0xbe   : > { %1039 = vst [vmem:[#allocation2 + $0xbc] sm:$0x1] %v1038_v12  ;;  %v869_v37 = vor.u32 %v867_v50, %v866_v17  ;;  %v870_v14 = vrot.slane %v866_v17, 4  ;;  %v860_v42 = vor.u32 %v858_v25, %v857_v9  ;;  %vm8388_vm7 = vmand %vm1495_vm5, %vm930_vm0  ;;  %v1507_v51 = vld [vmem:[#allocation2 + $0x18] sm:$0xf]  ;;  %vm3651_vm8 = vcmask 1043456  }
  0xbf   : > { %2255 = vrot.lane.b32.xlu0 %v2209_v1, %s7646_s21  ;;  %v877_v22 = vor.u32 %v875_v44, %v874_v18  ;;  %v879_v58 = vrot.slane %v874_v18, 4  ;;  %v1511_v28 = vld [vmem:[#allocation2 + $0x20] sm:$0x1]  ;;  %v1514_v31 = vld [vmem:[#allocation2 + $0x24] sm:$0xf]  ;;  %vm3311_vm9 = vcmask 64512  }
  0xc0   : > { %v861_v52 = vsel %vm7904_vm12, %v853_v21, %v860_v42  ;;  %v1041_v19 = vsel %vm8082_vm1, %v869_v37, %v1040_v24  ;;  %v1521_v55 = vld [vmem:[#allocation2 + $0x30] sm:$0xf]  ;;  %v1518_v2 = vld [vmem:[#allocation2 + $0x2c] sm:$0x1]  ;;  %v1525_v29 = vld [vmem:[#allocation2 + $0x38] sm:$0x1] }
  0xc1   : > { %v878_v46 = vsel %vm7904_vm12, %v870_v14, %v877_v22  ;;  %1036 = vst.msk [vmem:[#allocation2 + $0xb8] sm:$0xf] %vm929_vm15, %v861_v52  ;;  %1042 = vst [vmem:[#allocation2 + $0xc0] sm:$0xf] %v1041_v19  ;;  %v1045_v56 = vsel %vm8068_vm14, %v879_v58, %v1044_v36  ;;  %v1528_v22 = vld [vmem:[#allocation2 + $0x3c] sm:$0xf] }
  0xc2   : > { %1043 = vst.msk [vmem:[#allocation2 + $0xc4] sm:$0xf] %vm929_vm15, %v878_v46  ;;  %1046 = vst [vmem:[#allocation2 + $0xc8] sm:$0x1] %v1045_v56  ;;  %vm3344_vm10 = vcmask 130048   ;;  %vm3377_vm11 = vcmask 195584  }
  0xc3   : > { %vm3410_vm13 = vcmask 261120   ;;  %vm3443_vm0 = vcmask 326656   ;;  %vm3476_vm4 = vcmask 392192  }
  0xcd   : > { %v1356_v47 = vpop.permute.xlu1 %1355  ;;  %v1352_v20 = vpop.permute.xlu0 %1351 }
  0xce   : > { %v1505_v57 = vsel %vm8378_vm6, %v1356_v47, %v1504_v41  ;;  %v1498_v61 = vsel %vm8388_vm7, %v1352_v20, %v1497_v40 }
  0xcf   : > { %1506 = vst [vmem:[#allocation2 + $0x14] sm:$0x1] %v1505_v57  ;;  %1499 = vst [vmem:[#allocation2 + $0xc] sm:$0xf] %v1498_v61 }
  0xd1   : > { %v1358_v35 = vpop.permute.xlu1 %1357  ;;  %v1354_v62 = vpop.permute.xlu0 %1353 }
  0xd2   : > { %v1508_v10 = vsel %vm8388_vm7, %v1358_v35, %v1507_v51  ;;  %1501 = vst.msk [vmem:[#allocation2 + $0x10] sm:$0xf] %vm1495_vm5, %v1354_v62 }
  0xd3   : > { %1509 = vst [vmem:[#allocation2 + $0x18] sm:$0xf] %v1508_v10 }
  0xd5   : > { %v1362_v49 = vpop.permute.xlu1 %1361  ;;  %v1360_v45 = vpop.permute.xlu0 %1359 }
  0xd6   : > { %v1512_v27 = vsel %vm8378_vm6, %v1362_v49, %v1511_v28  ;;  %1510 = vst.msk [vmem:[#allocation2 + $0x1c] sm:$0xf] %vm1495_vm5, %v1360_v45  ;;  %v1676_v53 = vld [vmem:[#allocation2 + $0xc] sm:$0xf] }
  0xd7   : > { %1513 = vst [vmem:[#allocation2 + $0x20] sm:$0x1] %v1512_v27  ;;  %v1724_v34 = vld [vmem:[#allocation2 + $0xc] sm:$0xe] }
  0xd8   : > { %v8422_v16 = vld [vmem:[#allocation2 + $0x14] ss:$0 sps:$4 sm:$0x11]   ;;  %v1661_v24 = vld [vmem:[#allocation2 + $0xc] sm:$0xe] }
  0xd9   : > { %v1366_v38 = vpop.permute.xlu1 %1365  ;;  %v1364_v59 = vpop.permute.xlu0 %1363  ;;  %v1677_v1 = vld [vmem:[#allocation2 + $0x10] sm:$0xf]  ;;  %v2720_v52 = vrot.slane %v8422_v16, 1  ;;  %v8448_v58 = vld [vmem:[#allocation2 + $0x14] ss:$0 sps:$4 sm:$0x11]  }
  0xda   : > { %1517 = vst.msk [vmem:[#allocation2 + $0x28] sm:$0xf] %vm1495_vm5, %v1366_v38  ;;  %v1515_v13 = vsel %vm8388_vm7, %v1364_v59, %v1514_v31  ;;  %v8407_v23 = vcombine.low %v1676_v53, %v1677_v1  ;;  %v1678_v0 = vld [vmem:[#allocation2 + $0x18] sm:$0xf]  ;;  %v6870_v26 = vcombine.low %v1724_v34, %v1677_v1  ;;  %v1615_v14 = vld [vmem:[#allocation2 + $0x10] sm:$0xf] }
  0xdb   : > { %1516 = vst [vmem:[#allocation2 + $0x24] sm:$0xf] %v1515_v13  ;;  %v1741_v32 = vld [vmem:[#allocation2 + $0x18] sm:$0xf]  ;;  %v6823_v20 = vcombine.low %v1661_v24, %v1615_v14  ;;  %v1614_v36 = vld [vmem:[#allocation2 + $0xc] sm:$0xf] }
  0xdc   : > { %2367 = vrot.lane.b32.xlu0 %v8407_v23, %s7647_s22  ;;  %v1789_v50 = vld [vmem:[#allocation2 + $0x18] sm:$0xe]  ;;  %v2719_v46 = vrot.slane %v6870_v26, 1  ;;  %v2450_v49 = vshll.u32 %v8407_v23, 16  ;;  %v2211_v27 = vrot.slane %v8448_v58, 1  ;;  %v8464_v31 = vcombine.low %v1614_v36, %v1615_v14 }
  0xdd   : > { %v1370_v54 = vpop.permute.xlu1 %1369  ;;  %v1368_v8 = vpop.permute.xlu0 %1367  ;;  %v8411_v39 = vld [vmem:[#allocation2 + $0x1c] sm:$0xf]  ;;  %v1725_v40 = vld [vmem:[#allocation2 + $0x18] sm:$0xe]  ;;  %v2210_v13 = vrot.slane %v6823_v20, 1 }
  0xde   : > { %v1742_v4 = vld [vmem:[#allocation2 + $0x1c] sm:$0xf]  ;;  %v1522_v3 = vsel %vm8388_vm7, %v1370_v54, %v1521_v55  ;;  %v1519_v9 = vsel %vm8378_vm6, %v1368_v8, %v1518_v2  ;;  %v8418_v63 = vcombine.low %v1678_v0, %v8411_v39  ;;  %v8426_v48 = vld [vmem:[#allocation2 + $0x20] ss:$0 sps:$4 sm:$0x11]   ;;  %v2721_v62 = vsel %vm2206_vm3, %v2719_v46, %v2720_v52 }
  0xdf   : > { %1523 = vst [vmem:[#allocation2 + $0x30] sm:$0xf] %v1522_v3  ;;  %1520 = vst [vmem:[#allocation2 + $0x2c] sm:$0x1] %v1519_v9  ;;  %v8420_v7 = vcombine.low %v1741_v32, %v1742_v4  ;;  %v6918_v42 = vcombine.low %v1789_v50, %v1742_v4  ;;  %v3232_v47 = vrot.slane %v8426_v48, 1  ;;  %v6871_v2 = vcombine.low %v1725_v40, %v8411_v39 }
  0xe0   : > { %2369 = vrot.lane.b32.xlu1 %v8418_v63, %s7647_s22  ;;  %v8451_v57 = vld [vmem:[#allocation2 + $0x1c] sm:$0xf]  ;;  %v1662_v35 = vld [vmem:[#allocation2 + $0x18] sm:$0xe]  ;;  %v1532_v3 = vld [vmem:[#allocation2 + $0x44] sm:$0x1] }
  0xe1   : > { %2879 = vrot.lane.b32.xlu0 %v8420_v7, %s7648_s23  ;;  %v1374_v11 = vpop.permute.xlu1 %1373  ;;  %v1372_v33 = vpop.permute.xlu0 %1371  ;;  %v8430_v44 = vld [vmem:[#allocation2 + $0x28] sm:$0xf]  ;;  %v3231_v10 = vrot.slane %v6918_v42, 1  ;;  %v8472_v55 = vld [vmem:[#allocation2 + $0x20] ss:$0 sps:$4 sm:$0x11]   ;;  %v6824_v0 = vcombine.low %v1662_v35, %v8451_v57 }
  0xe2   : > { %v8432_v17 = vld [vmem:[#allocation2 + $0x28] sm:$0xf]  ;;  %v1526_v12 = vsel %vm8378_vm6, %v1374_v11, %v1525_v29  ;;  %1524 = vst.msk [vmem:[#allocation2 + $0x34] sm:$0xf] %vm1495_vm5, %v1372_v33  ;;  %v1743_v18 = vld [vmem:[#allocation2 + $0x24] sm:$0xf]  ;;  %v2212_v11 = vsel %vm2206_vm3, %v2210_v13, %v2211_v27 }
  0xe3   : > { %v1680_v21 = vld [vmem:[#allocation2 + $0x24] sm:$0xf]  ;;  %1527 = vst [vmem:[#allocation2 + $0x38] sm:$0x1] %v1526_v12  ;;  %v8438_v25 = vcombine.low %v1743_v18, %v8430_v44  ;;  %v8476_v32 = vld [vmem:[#allocation2 + $0x28] sm:$0xf]  ;;  %v3233_v8 = vsel %vm2206_vm3, %v3231_v10, %v3232_v47 }
  0xe4   : > { %v8441_v37 = vcombine.low %v1680_v21, %v8432_v17  ;;  %v1790_v56 = vld [vmem:[#allocation2 + $0x24] sm:$0xe]  ;;  %v8482_v34 = vld [vmem:[#allocation2 + $0x20] ss:$0 sps:$4 sm:$0x11]   ;;  %v2455_v39 = vshll.u32 %v8422_v16, 16 }
  0xe5   : > { %2881 = vrot.lane.b32.xlu1 %v8438_v25, %s7648_s23  ;;  %v1376_v19 = vpop.permute.xlu0 %1375  ;;  %v1378_v41 = vpop.permute.xlu1 %1377  ;;  %v6919_v53 = vcombine.low %v1790_v56, %v8430_v44  ;;  %v1663_v54 = vld [vmem:[#allocation2 + $0x24] sm:$0xe]  ;;  %v1949_v29 = vshll.u32 %v8464_v31, 16  ;;  %v2452_v12 = vrot.slane %v2450_v49, 1  ;;  %v2962_v18 = vshll.u32 %v8420_v7, 16 }
  0xe6   : > { %2371 = vrot.lane.b32.xlu0 %v8441_v37, %s7647_s22  ;;  %v1529_v61 = vsel %vm8388_vm7, %v1376_v19, %v1528_v22  ;;  %1531 = vst.msk [vmem:[#allocation2 + $0x40] sm:$0xf] %vm1495_vm5, %v1378_v41  ;;  %v1682_v51 = vld [vmem:[#allocation2 + $0x30] sm:$0xf]  ;;  %v6825_v44 = vcombine.low %v1663_v54, %v8476_v32  ;;  %v2722_v21 = vrot.slane %v6871_v2, 1  ;;  %v2723_v14 = vrot.slane %v8472_v55, 1 }
  0xe7   : > { %1530 = vst [vmem:[#allocation2 + $0x3c] sm:$0xf] %v1529_v61  ;;  %v8457_v28 = vld [vmem:[#allocation2 + $0x2c] ss:$0 sps:$4 sm:$0x11]   ;;  %v3234_v33 = vrot.slane %v6919_v53, 1 }
  0xe8   : > { %v3235_v4 = vrot.slane %v8457_v28, 1  ;;  %v8485_v9 = vld [vmem:[#allocation2 + $0x2c] ss:$0 sps:$4 sm:$0x11]   ;;  %v2213_v22 = vrot.slane %v6824_v0, 1  ;;  %v2214_v42 = vrot.slane %v8482_v34, 1  ;;  %v2724_v35 = vsel %vm2206_vm3, %v2722_v21, %v2723_v14 }
  0xe9   : > { %v8461_v45 = vld [vmem:[#allocation2 + $0x34] sm:$0xf]  ;;  %v1380_v38 = vpop.permute.xlu0 %1379  ;;  %v8466_v59 = vpop.permute.xlu1 %1381  ;;  %v2448_v46 = vshrl.u32 %v8407_v23, 16  ;;  %v1616_v24 = vld [vmem:[#allocation2 + $0x18] sm:$0xf]  ;;  %v2217_v19 = vrot.slane %v8485_v9, 1 }
  0xea   : > { %2767 = vrot.lane.b32.xlu0 %v2721_v62, %s7649_s24  ;;  %v8470_v1 = vcombine.low %v1682_v51, %v8461_v45  ;;  %v3236_v16 = vsel %vm2206_vm3, %v3234_v33, %v3235_v4  ;;  %v1533_v52 = vsel %vm8378_vm6, %v1380_v38, %v1532_v3  ;;  %v2457_v41 = vrot.slane %v2455_v39, 1  ;;  %v1542_v23 = vld [vmem:[#allocation2 + $0x54] sm:$0xf]  ;;  %v8510_v27 = vld [vmem:[#allocation2 + $0x2c] ss:$0 sps:$4 sm:$0x11]  }
  0xeb   : > { %v1951_v40 = vrot.slane %v1949_v29, 1  ;;  %1534 = vst [vmem:[#allocation2 + $0x44] sm:$0x1] %v1533_v52  ;;  %v2462_v36 = vshll.u32 %v8418_v63, 16  ;;  %v2474_v61 = vshll.u32 %v8441_v37, 16  ;;  %v2216_v56 = vrot.slane %v6825_v44, 1 }
  0xec   : > { %2373 = vrot.lane.b32.xlu1 %v8470_v1, %s7647_s22  ;;  %v2453_v51 = vor.u32 %v2452_v12, %v2448_v46  ;;  %v1947_v62 = vshrl.u32 %v8464_v31, 16  ;;  %v1954_v10 = vshll.u32 %v8448_v58, 16  ;;  %v2964_v49 = vrot.slane %v2962_v18, 1  ;;  %v1535_v4 = vld [vmem:[#allocation2 + $0x48] sm:$0xf] }
  0xed   : > { %v1384_v26 = vpop.permute.xlu0 %1383  ;;  %v8489_v50 = vpop.permute.xlu1 %1385  ;;  %v2974_v38 = vshll.u32 %v8438_v25, 16  ;;  %v8515_v53 = vcombine.low %v1616_v24, %v8451_v57  ;;  %v2215_v13 = vsel %vm2206_vm3, %v2213_v22, %v2214_v42  ;;  %v2967_v2 = vshll.u32 %v8426_v48, 16  ;;  %v1546_v39 = vld [vmem:[#allocation2 + $0x5c] sm:$0x1]  ;;  %v1618_v57 = vld [vmem:[#allocation2 + $0x24] sm:$0xf] }
  0xee   : > { %3279 = vrot.lane.b32.xlu0 %v3233_v8, %s7650_s25  ;;  %1538 = vst.msk [vmem:[#allocation2 + $0x4c] sm:$0xf] %vm1495_vm5, %v1384_v26  ;;  %v2218_v0 = vsel %vm2206_vm3, %v2216_v56, %v2217_v19  ;;  %v1952_v54 = vor.u32 %v1951_v40, %v1947_v62  ;;  %v2960_v58 = vshrl.u32 %v8420_v7, 16  ;;  %v2458_v26 = vsel %vm1933_vm2, %v2453_v51, %v2457_v41  ;;  %v1745_v46 = vld [vmem:[#allocation2 + $0x30] sm:$0xf] }
  0xef   : > { %v2467_v48 = vshll.u32 %v8472_v55, 16  ;;  %v2476_v33 = vrot.slane %v2474_v61, 1  ;;  %v1956_v44 = vrot.slane %v1954_v10, 1  ;;  %v2460_v7 = vshrl.u32 %v8418_v63, 16  ;;  %v8542_v52 = vld [vmem:[#allocation2 + $0x34] sm:$0xf] }
  0xf0   : > { %2257 = vrot.lane.b32.xlu1 %v2212_v11, %s7646_s21  ;;  %v2464_v11 = vrot.slane %v2462_v36, 1  ;;  %v2965_v12 = vor.u32 %v2964_v49, %v2960_v58  ;;  %v2479_v18 = vshll.u32 %v8510_v27, 16  ;;  %v2969_v21 = vrot.slane %v2967_v2, 1  ;;  %v1556_v56 = vld [vmem:[#allocation2 + $0x6c] sm:$0xf] }
  0xf1   : > { %v1388_v47 = vpop.permute.xlu0 %1387  ;;  %v1390_v20 = vpop.permute.xlu1 %1389  ;;  %v2472_v14 = vshrl.u32 %v8441_v37, 16  ;;  %v1536_v22 = vsel %vm8388_vm7, %v8466_v59, %v1535_v4  ;;  %v8538_v42 = vcombine.low %v1618_v57, %v8476_v32  ;;  %v1957_v63 = vsel %vm1933_vm2, %v1952_v54, %v1956_v44  ;;  %v1726_v59 = vld [vmem:[#allocation2 + $0x24] sm:$0xe]  ;;  %v1549_v10 = vld [vmem:[#allocation2 + $0x60] sm:$0xf] }
  0xf2   : > { %3281 = vrot.lane.b32.xlu0 %v3236_v16, %s7650_s25  ;;  %1545 = vst.msk [vmem:[#allocation2 + $0x58] sm:$0xf] %vm1495_vm5, %v1390_v20  ;;  %v1543_v8 = vsel %vm8388_vm7, %v1388_v47, %v1542_v23  ;;  %v1539_v16 = vld [vmem:[#allocation2 + $0x50] sm:$0x1]  ;;  %1537 = vst [vmem:[#allocation2 + $0x48] sm:$0xf] %v1536_v22  ;;  %v2465_v19 = vor.u32 %v2464_v11, %v2460_v7  ;;  %v2970_v51 = vsel %vm1933_vm2, %v2965_v12, %v2969_v21 }
  0xf3   : > { %1544 = vst [vmem:[#allocation2 + $0x54] sm:$0xf] %v1543_v8  ;;  %v2469_v41 = vrot.slane %v2467_v48, 1  ;;  %v2477_v40 = vor.u32 %v2476_v33, %v2472_v14  ;;  %v1961_v47 = vshll.u32 %v8515_v53, 16  ;;  %v2481_v32 = vrot.slane %v2479_v18, 1 }
  0xf4   : > { %2769 = vrot.lane.b32.xlu1 %v2724_v35, %s7649_s24  ;;  %v2976_v20 = vrot.slane %v2974_v38, 1  ;;  %v2979_v36 = vshll.u32 %v8457_v28, 16  ;;  %v1540_v61 = vsel %vm8378_vm6, %v8489_v50, %v1539_v16  ;;  %v8553_v23 = vcombine.low %v1745_v46, %v8542_v52  ;;  %v1553_v8 = vld [vmem:[#allocation2 + $0x68] sm:$0x1]  ;;  %v1791_v22 = vld [vmem:[#allocation2 + $0x30] sm:$0xe] }
  0xf5   : > { %v1392_v3 = vpop.permute.xlu0 %1391  ;;  %v8524_v29 = vpop.permute.xlu1 %1393  ;;  %1541 = vst [vmem:[#allocation2 + $0x50] sm:$0x1] %v1540_v61  ;;  %v6872_v35 = vcombine.low %v1726_v59, %v8432_v17  ;;  %v2972_v28 = vshrl.u32 %v8438_v25, 16  ;;  %v2470_v50 = vsel %vm1933_vm2, %v2465_v19, %v2469_v41  ;;  %v1963_v38 = vrot.slane %v1961_v47, 1  ;;  %v1560_v25 = vld [vmem:[#allocation2 + $0x74] sm:$0x1] }
  0xf6   : > { %2259 = vrot.lane.b32.xlu0 %v2215_v13, %s7646_s21  ;;  %v1547_v55 = vsel %vm8378_vm6, %v1392_v3, %v1546_v39  ;;  %v1966_v13 = vshll.u32 %v8482_v34, 16  ;;  %v2482_v17 = vsel %vm1933_vm2, %v2477_v40, %v2481_v32  ;;  %v2981_v54 = vrot.slane %v2979_v36, 1  ;;  %v8573_v44 = vld [vmem:[#allocation2 + $0x38] ss:$0 sps:$4 sm:$0x11]  }
  0xf7   : > { %1548 = vst [vmem:[#allocation2 + $0x5c] sm:$0x1] %v1547_v55  ;;  %v1973_v58 = vshll.u32 %v8538_v42, 16  ;;  %v2726_v4 = vrot.slane %v8510_v27, 1  ;;  %v1959_v34 = vshrl.u32 %v8515_v53, 16  ;;  %v2986_v3 = vshll.u32 %v8553_v23, 16 }
  0xf8   : > { %2261 = vrot.lane.b32.xlu1 %v2218_v0, %s7646_s21  ;;  %v2977_v0 = vor.u32 %v2976_v20, %v2972_v28  ;;  %v1550_v39 = vsel %vm8388_vm7, %v8524_v29, %v1549_v10  ;;  %v2725_v57 = vrot.slane %v6872_v35, 1  ;;  %v1968_v33 = vrot.slane %v1966_v13, 1  ;;  %v1727_v46 = vld [vmem:[#allocation2 + $0x30] sm:$0xe]  ;;  %v1748_v47 = vld [vmem:[#allocation2 + $0x40] sm:$0xf] }
  0xf9   : > { %v1396_v37 = vpop.permute.xlu0 %1395  ;;  %v1398_v24 = vpop.permute.xlu1 %1397  ;;  %1551 = vst [vmem:[#allocation2 + $0x60] sm:$0xf] %v1550_v39  ;;  %v1964_v48 = vor.u32 %v1963_v38, %v1959_v34  ;;  %v2486_v7 = vshll.u32 %v8470_v1, 16  ;;  %v1975_v18 = vrot.slane %v1973_v58, 1  ;;  %v1978_v21 = vshll.u32 %v8485_v9, 16 }
  0xfa   : > { %2639 = vrot.lane.b32.xlu0 %v2458_v26, %s7651_s26  ;;  %1552 = vst.msk [vmem:[#allocation2 + $0x64] sm:$0xf] %vm1495_vm5, %v1396_v37  ;;  %v1554_v12 = vsel %vm8378_vm6, %v1398_v24, %v1553_v8  ;;  %v2982_v29 = vsel %vm1933_vm2, %v2977_v0, %v2981_v54  ;;  %v2727_v14 = vsel %vm2206_vm3, %v2725_v57, %v2726_v4  ;;  %v2988_v55 = vrot.slane %v2986_v3, 1  ;;  %v8587_v24 = vld [vmem:[#allocation2 + $0x38] ss:$0 sps:$4 sm:$0x11]  }
  0xfb   : > { %1555 = vst [vmem:[#allocation2 + $0x68] sm:$0x1] %v1554_v12  ;;  %v2991_v16 = vshll.u32 %v8573_v44, 16  ;;  %v1971_v37 = vshrl.u32 %v8538_v42, 16  ;;  %v1570_v9 = vld [vmem:[#allocation2 + $0x84] sm:$0xf]  ;;  %v1969_v41 = vsel %vm1933_vm2, %v1964_v48, %v1968_v33  ;;  %v6920_v35 = vcombine.low %v1791_v22, %v8542_v52 }
  0xfc   : > { %2128 = vrot.lane.b32.xlu1 %v1957_v63, %s7645_s20  ;;  %v1563_v63 = vld [vmem:[#allocation2 + $0x78] sm:$0xf]  ;;  %v2984_v40 = vshrl.u32 %v8553_v23, 16  ;;  %v1792_v32 = vld [vmem:[#allocation2 + $0x3c] sm:$0xe]  ;;  %v1980_v36 = vrot.slane %v1978_v21, 1 }
  0xfd   : > { %v1400_v62 = vpop.permute.xlu0 %1399  ;;  %v1402_v49 = vpop.permute.xlu1 %1401  ;;  %v1976_v20 = vor.u32 %v1975_v18, %v1971_v37  ;;  %v2488_v61 = vrot.slane %v2486_v7, 1  ;;  %v1574_v13 = vld [vmem:[#allocation2 + $0x8c] sm:$0x1]  ;;  %v8601_v0 = vld [vmem:[#allocation2 + $0x44] ss:$0 sps:$4 sm:$0x11]   ;;  %v6921_v52 = vcombine.low %v1792_v32, %v1748_v47 }
  0xfe   : > { %3151 = vrot.lane.b32.xlu0 %v2970_v51, %s7652_s28  ;;  %v1557_v2 = vsel %vm8388_vm7, %v1400_v62, %v1556_v56  ;;  %1559 = vst.msk [vmem:[#allocation2 + $0x70] sm:$0xf] %vm1495_vm5, %v1402_v49  ;;  %v2491_v56 = vshll.u32 %v8587_v24, 16  ;;  %v1747_v51 = vld [vmem:[#allocation2 + $0x3c] sm:$0xf]  ;;  %v2989_v28 = vor.u32 %v2988_v55, %v2984_v40  ;;  %v2993_v62 = vrot.slane %v2991_v16, 1 }
  0xff   : > { %1558 = vst [vmem:[#allocation2 + $0x6c] sm:$0xf] %v1557_v2  ;;  %v1567_v49 = vld [vmem:[#allocation2 + $0x80] sm:$0x1]  ;;  %v8603_v54 = vcombine.low %v1747_v51, %v1748_v47  ;;  %v1620_v8 = vld [vmem:[#allocation2 + $0x30] sm:$0xf] }
 0x100   : > { %2641 = vrot.lane.b32.xlu1 %v2470_v50, %s7651_s26  ;;  %v2484_v50 = vshrl.u32 %v8470_v1, 16  ;;  %v2493_v1 = vrot.slane %v2491_v56, 1  ;;  %v2994_v34 = vsel %vm1933_vm2, %v2989_v28, %v2993_v62  ;;  %v3237_v3 = vrot.slane %v6920_v35, 1  ;;  %v1621_v57 = vld [vmem:[#allocation2 + $0x34] sm:$0xf] }
 0x101   : > { %v1404_v26 = vpop.permute.xlu0 %1403  ;;  %v1406_v11 = vpop.permute.xlu1 %1405  ;;  %v3238_v39 = vrot.slane %v8573_v44, 1  ;;  %v8615_v48 = vld [vmem:[#allocation2 + $0x40] sm:$0xf]  ;;  %v3240_v12 = vrot.slane %v6921_v52, 1  ;;  %v3241_v7 = vrot.slane %v8601_v0, 1  ;;  %v2729_v22 = vrot.slane %v8587_v24, 1 }
 0x102   : > { %2643 = vrot.lane.b32.xlu0 %v2482_v17, %s7651_s26  ;;  %v1561_v27 = vsel %vm8378_vm6, %v1404_v26, %v1560_v25  ;;  %v1564_v10 = vsel %vm8388_vm7, %v1406_v11, %v1563_v63  ;;  %v6873_v17 = vcombine.low %v1727_v46, %v8461_v45  ;;  %v2489_v25 = vor.u32 %v2488_v61, %v2484_v50  ;;  %v1577_v45 = vld [vmem:[#allocation2 + $0x90] sm:$0xf]  ;;  %v1684_v11 = vld [vmem:[#allocation2 + $0x3c] sm:$0xf]  ;;  %v1581_v21 = vld [vmem:[#allocation2 + $0x98] sm:$0x1] }
 0x103   : > { %1562 = vst [vmem:[#allocation2 + $0x74] sm:$0x1] %v1561_v27  ;;  %1565 = vst [vmem:[#allocation2 + $0x78] sm:$0xf] %v1564_v10  ;;  %v1664_v26 = vld [vmem:[#allocation2 + $0x30] sm:$0xe]  ;;  %v8623_v55 = vcombine.low %v1620_v8, %v1621_v57  ;;  %v3239_v63 = vsel %vm2206_vm3, %v3237_v3, %v3238_v39  ;;  %v8628_v37 = vcombine.low %v1684_v11, %v8615_v48 }
 0x104   : > { %3153 = vrot.lane.b32.xlu1 %v2982_v29, %s7652_s28  ;;  %v2998_v29 = vshll.u32 %v8603_v54, 16  ;;  %v2494_v44 = vsel %vm1933_vm2, %v2489_v25, %v2493_v1  ;;  %v7396_v16 = vld [vmem:[#allocation2 + $0x38] ss:$0 sps:$4 sm:$0x11]   ;;  %v6826_v46 = vcombine.low %v1664_v26, %v1621_v57  ;;  %v2996_v24 = vshrl.u32 %v8603_v54, 16 }
 0x105   : > { %v1408_v59 = vpop.permute.xlu0 %1407  ;;  %v1410_v19 = vpop.permute.xlu1 %1409  ;;  %v3242_v47 = vsel %vm2206_vm3, %v3240_v12, %v3241_v7  ;;  %v1985_v56 = vshll.u32 %v8623_v55, 16  ;;  %v8643_v51 = vld [vmem:[#allocation2 + $0x44] ss:$0 sps:$4 sm:$0x11]   ;;  %v1584_v28 = vld [vmem:[#allocation2 + $0x9c] sm:$0xf] }
 0x106   : > { %2771 = vrot.lane.b32.xlu0 %v2727_v14, %s7649_s24  ;;  %1566 = vst.msk [vmem:[#allocation2 + $0x7c] sm:$0xf] %vm1495_vm5, %v1408_v59  ;;  %v1568_v4 = vsel %vm8378_vm6, %v1410_v19, %v1567_v49  ;;  %v2728_v14 = vrot.slane %v6873_v17, 1  ;;  %v1622_v59 = vld [vmem:[#allocation2 + $0x3c] sm:$0xf]  ;;  %v3000_v32 = vrot.slane %v2998_v29, 1 }
 0x107   : > { %1569 = vst [vmem:[#allocation2 + $0x80] sm:$0x1] %v1568_v4  ;;  %v2219_v62 = vrot.slane %v6826_v46, 1  ;;  %v2220_v10 = vrot.slane %v7396_v16, 1  ;;  %v2498_v49 = vshll.u32 %v8628_v37, 16  ;;  %v1990_v25 = vshll.u32 %v7396_v16, 16 }
 0x108   : > { %2130 = vrot.lane.b32.xlu1 %v1969_v41, %s7645_s20  ;;  %v2730_v61 = vsel %vm2206_vm3, %v2728_v14, %v2729_v22  ;;  %v1728_v4 = vld [vmem:[#allocation2 + $0x3c] sm:$0xe]  ;;  %v2503_v3 = vshll.u32 %v8643_v51, 16  ;;  %v1983_v39 = vshrl.u32 %v8623_v55, 16  ;;  %v1749_v57 = vld [vmem:[#allocation2 + $0x48] sm:$0xf] }
 0x109   : > { %v1412_v38 = vpop.permute.xlu0 %1411  ;;  %v1414_v2 = vpop.permute.xlu1 %1413  ;;  %v2221_v8 = vsel %vm2206_vm3, %v2219_v62, %v2220_v10  ;;  %v8664_v26 = vld [vmem:[#allocation2 + $0x4c] sm:$0xf]  ;;  %v1595_v29 = vld [vmem:[#allocation2 + $0xb0] sm:$0x1]  ;;  %v1665_v22 = vld [vmem:[#allocation2 + $0x3c] sm:$0xe]  ;;  %v6874_v16 = vcombine.low %v1728_v4, %v8615_v48 }
 0x10a   : > { %2883 = vrot.lane.b32.xlu0 %v8553_v23, %s7648_s23  ;;  %v1571_v58 = vsel %vm8388_vm7, %v1412_v38, %v1570_v9  ;;  %1573 = vst.msk [vmem:[#allocation2 + $0x88] sm:$0xf] %vm1495_vm5, %v1414_v2  ;;  %v1981_v23 = vsel %vm1933_vm2, %v1976_v20, %v1980_v36  ;;  %v8630_v9 = vld [vmem:[#allocation2 + $0x40] sm:$0xf]  ;;  %v3003_v20 = vshll.u32 %v8601_v0, 16  ;;  %v3001_v2 = vor.u32 %v3000_v32, %v2996_v24 }
 0x10b   : > { %1572 = vst [vmem:[#allocation2 + $0x84] sm:$0xf] %v1571_v58  ;;  %v8646_v35 = vcombine.low %v1622_v59, %v8630_v9  ;;  %v1588_v38 = vld [vmem:[#allocation2 + $0xa4] sm:$0x1]  ;;  %v1591_v58 = vld [vmem:[#allocation2 + $0xa8] sm:$0xf]  ;;  %v6890_v59 = vcombine.low %v1749_v57, %v8664_v26 }
 0x10c   : > { %2132 = vrot.lane.b32.xlu1 %v1981_v23, %s7645_s20  ;;  %v3005_v17 = vrot.slane %v3003_v20, 1  ;;  %v8651_v0 = vld [vmem:[#allocation2 + $0x44] ss:$0 sps:$4 sm:$0x11]   ;;  %v1987_v23 = vrot.slane %v1985_v56, 1  ;;  %v2505_v46 = vrot.slane %v2503_v3, 1 }
 0x10d   : > { %v1416_v33 = vpop.permute.xlu0 %1415  ;;  %v1418_v27 = vpop.permute.xlu1 %1417  ;;  %v1997_v1 = vshll.u32 %v8646_v35, 16  ;;  %v8676_v24 = vld [vmem:[#allocation2 + $0x4c] sm:$0xf]  ;;  %v1598_v56 = vld [vmem:[#allocation2 + $0xb4] sm:$0xf]  ;;  %v2732_v62 = vrot.slane %v8643_v51, 1 }
 0x10e   : > { %3155 = vrot.lane.b32.xlu0 %v2994_v34, %s7652_s28  ;;  %v1575_v18 = vsel %vm8378_vm6, %v1416_v33, %v1574_v13  ;;  %v1578_v19 = vsel %vm8388_vm7, %v1418_v27, %v1577_v45  ;;  %v2496_v45 = vshrl.u32 %v8628_v37, 16  ;;  %v2500_v34 = vrot.slane %v2498_v49, 1  ;;  %v8691_v49 = vld [vmem:[#allocation2 + $0x50] ss:$0 sps:$4 sm:$0x11]  }
 0x10f   : > { %1576 = vst [vmem:[#allocation2 + $0x8c] sm:$0x1] %v1575_v18  ;;  %1579 = vst [vmem:[#allocation2 + $0x90] sm:$0xf] %v1578_v19  ;;  %v3006_v27 = vsel %vm1933_vm2, %v3001_v2, %v3005_v17  ;;  %v1988_v18 = vor.u32 %v1987_v23, %v1983_v39  ;;  %v1999_v14 = vrot.slane %v1997_v1, 1  ;;  %v3010_v10 = vshll.u32 %v6890_v59, 16 }
 0x110   : > { %2645 = vrot.lane.b32.xlu1 %v2494_v44, %s7651_s26  ;;  %v1995_v44 = vshrl.u32 %v8646_v35, 16  ;;  %v1686_v19 = vld [vmem:[#allocation2 + $0x48] sm:$0xf]  ;;  %v1605_v17 = vld [vmem:[#allocation2 + $0xc0] sm:$0xf]  ;;  %v2223_v51 = vrot.slane %v8651_v0, 1 }
 0x111   : > { %v1420_v41 = vpop.permute.xlu0 %1419  ;;  %v1422_v40 = vpop.permute.xlu1 %1421  ;;  %v1793_v23 = vld [vmem:[#allocation2 + $0x48] sm:$0xe]  ;;  %v3012_v4 = vrot.slane %v3010_v10, 1  ;;  %v1752_v57 = vld [vmem:[#allocation2 + $0x58] sm:$0xf] }
 0x112   : > { %3283 = vrot.lane.b32.xlu0 %v3239_v63, %s7650_s25  ;;  %1580 = vst.msk [vmem:[#allocation2 + $0x94] sm:$0xf] %vm1495_vm5, %v1420_v41  ;;  %v1582_v36 = vsel %vm8378_vm6, %v1422_v40, %v1581_v21  ;;  %v1992_v21 = vrot.slane %v1990_v25, 1  ;;  %v2501_v63 = vor.u32 %v2500_v34, %v2496_v45  ;;  %v2000_v20 = vor.u32 %v1999_v14, %v1995_v44  ;;  %v1751_v44 = vld [vmem:[#allocation2 + $0x54] sm:$0xf] }
 0x113   : > { %1583 = vst [vmem:[#allocation2 + $0x98] sm:$0x1] %v1582_v36  ;;  %v6827_v36 = vcombine.low %v1665_v22, %v8630_v9  ;;  %v3015_v45 = vshll.u32 %v8691_v49, 16  ;;  %v1794_v30 = vld [vmem:[#allocation2 + $0x54] sm:$0xe] }
 0x114   : > { %2773 = vrot.lane.b32.xlu1 %v2730_v61, %s7649_s24  ;;  %v1993_v48 = vsel %vm1933_vm2, %v1988_v18, %v1992_v21  ;;  %v8686_v61 = vcombine.low %v1686_v19, %v8676_v24  ;;  %v8716_v14 = vld [vmem:[#allocation2 + $0x5c] ss:$0 sps:$4 sm:$0x11]   ;;  %v7435_v19 = vld [vmem:[%s10589_s2 + $0x20] ss:$0 sps:$4 sm:$0xff]  }
 0x115   : > { %v1424_v50 = vpop.permute.xlu0 %1423  ;;  %v1426_v13 = vpop.permute.xlu1 %1425  ;;  %v3017_v21 = vrot.slane %v3015_v45, 1  ;;  %v1666_v60 = vld [vmem:[#allocation2 + $0x48] sm:$0xe]  ;;  %7328 = vmatprep.subr.msk.bf16.mxu0 %vm3651_vm8, %v7435_v19  ;;  %v3027_v45 = vshll.u32 %v8716_v14, 16 }
 0x116   : > { %3285 = vrot.lane.b32.xlu0 %v3242_v47, %s7650_s25  ;;  %v1585_v52 = vsel %vm8388_vm7, %v1424_v50, %v1584_v28  ;;  %1587 = vst.msk [vmem:[#allocation2 + $0xa0] sm:$0xf] %vm1495_vm5, %v1426_v13  ;;  %v2731_v28 = vrot.slane %v6874_v16, 1  ;;  %v8694_v13 = vld [vmem:[#allocation2 + $0x50] ss:$0 sps:$4 sm:$0x11]  }
 0x117   : > { %1586 = vst [vmem:[#allocation2 + $0x9c] sm:$0xf] %v1585_v52  ;;  %v2510_v25 = vshll.u32 %v8686_v61, 16  ;;  %v2515_v39 = vshll.u32 %v8694_v13, 16 }
 0x118   : > { %2885 = vrot.lane.b32.xlu1 %v8603_v54, %s7648_s23  ;;  %v2002_v54 = vshll.u32 %v8651_v0, 16  ;;  %v2733_v1 = vsel %vm2206_vm3, %v2731_v28, %v2732_v62  ;;  %v2735_v28 = vrot.slane %v8694_v13, 1 }
 0x119   : > { %v1428_v11 = vpop.permute.xlu0 %1427  ;;  %v1430_v33 = vpop.permute.xlu1 %1429 }
 0x11a   : > { %2263 = vrot.lane.b32.xlu0 %v2221_v8, %s7646_s21  ;;  %v1589_v12 = vsel %vm8378_vm6, %v1428_v11, %v1588_v38  ;;  %v1592_v7 = vsel %vm8388_vm7, %v1430_v33, %v1591_v58  ;;  %v2004_v47 = vrot.slane %v2002_v54, 1  ;;  %v1602_v38 = vld [vmem:[#allocation2 + $0xbc] sm:$0x1]  ;;  %v2222_v58 = vrot.slane %v6827_v36, 1  ;;  %v1729_v54 = vld [vmem:[#allocation2 + $0x48] sm:$0xe] }
 0x11b   : > { %1590 = vst [vmem:[#allocation2 + $0xa4] sm:$0x1] %v1589_v12  ;;  %1593 = vst [vmem:[#allocation2 + $0xa8] sm:$0xf] %v1592_v7  ;;  %v3008_v8 = vshrl.u32 %v6890_v59, 16  ;;  %v2508_v12 = vshrl.u32 %v8686_v61, 16 }
 0x11c   : > { %3157 = vrot.lane.b32.xlu1 %v3006_v27, %s7652_s28  ;;  %v2005_v52 = vsel %vm1933_vm2, %v2000_v20, %v2004_v47  ;;  %v2224_v33 = vsel %vm2206_vm3, %v2222_v58, %v2223_v51  ;;  %v6922_v27 = vcombine.low %v1793_v23, %v8664_v26  ;;  %v2512_v7 = vrot.slane %v2510_v25, 1  ;;  %v1688_v36 = vld [vmem:[#allocation2 + $0x54] sm:$0xf]  ;;  %v8744_v58 = vld [vmem:[#allocation2 + $0x58] sm:$0xf] }
 0x11d   : > { %v1432_v41 = vpop.permute.xlu0 %1431  ;;  %v1434_v40 = vpop.permute.xlu1 %1433  ;;  %v3013_v18 = vor.u32 %v3012_v4, %v3008_v8  ;;  %v6875_v26 = vcombine.low %v1729_v54, %v8676_v24  ;;  %v6891_v47 = vcombine.low %v1751_v44, %v1752_v57  ;;  %v6923_v20 = vcombine.low %v1794_v30, %v1752_v57 }
 0x11e   : > { %2375 = vrot.lane.b32.xlu0 %v8628_v37, %s7647_s22  ;;  %1594 = vst.msk [vmem:[#allocation2 + $0xac] sm:$0xf] %vm1495_vm5, %v1432_v41  ;;  %v1596_v32 = vsel %vm8378_vm6, %v1434_v40, %v1595_v29  ;;  %v2506_v37 = vsel %vm1933_vm2, %v2501_v63, %v2505_v46  ;;  %v1609_v29 = vld [vmem:[#allocation2 + $0xc8] sm:$0x1]  ;;  %v2517_v63 = vrot.slane %v2515_v39, 1  ;;  %v2513_v41 = vor.u32 %v2512_v7, %v2508_v12 }
 0x11f   : > { %1597 = vst [vmem:[#allocation2 + $0xb0] sm:$0x1] %v1596_v32  ;;  %v3243_v40 = vrot.slane %v6922_v27, 1  ;;  %v1624_v32 = vld [vmem:[#allocation2 + $0x48] sm:$0xf]  ;;  %v3018_v24 = vsel %vm1933_vm2, %v3013_v18, %v3017_v21  ;;  %v3653_v51 = vsel %vm3651_vm8, %v7435_v19, 0 }
 0x120   : > { %2134 = vrot.lane.b32.xlu1 %v1993_v48, %s7645_s20  ;;  %v1625_v48 = vld [vmem:[#allocation2 + $0x4c] sm:$0xf]  ;;  %v2518_v10 = vsel %vm1933_vm2, %v2513_v41, %v2517_v63  ;;  %7249 = vmatpush3.bf16.msra.mxu0 %v3653_v51  ;;  %v3020_v8 = vshrl.u32 %v6891_v47, 16  ;;  %v7418_v18 = vld [vmem:[#allocation2 + $0x5c] ss:$0 sps:$4 sm:$0x11]  }
 0x121   : > { %v1436_v50 = vpop.permute.xlu0 %1435  ;;  %v1438_v9 = vpop.permute.xlu1 %1437  ;;  %v8733_v62 = vcombine.low %v1624_v32, %v1625_v48  ;;  %v6828_v13 = vcombine.low %v1666_v60, %v1625_v48  ;;  %v7444_v12 = vld [vmem:[%s10589_s2 + $0x8] sm:$0xff]   ;;  %v8771_v63 = vld [vmem:[#allocation2 + $0x64] sm:$0xf]  ;;  %v1667_v41 = vld [vmem:[#allocation2 + $0x54] sm:$0xe]  ;;  %v2026_v48 = vshll.u32 %v7418_v18, 16 }
 0x122   : > { %2647 = vrot.lane.b32.xlu0 %v2506_v37, %s7651_s26  ;;  %v1599_v2 = vsel %vm8388_vm7, %v1436_v50, %v1598_v56  ;;  %1601 = vst.msk [vmem:[#allocation2 + $0xb8] sm:$0xf] %vm1495_vm5, %v1438_v9  ;;  %v8730_v56 = vld [vmem:[#allocation2 + $0x58] sm:$0xf]  ;;  %v2734_v37 = vrot.slane %v6875_v26, 1  ;;  %v3247_v50 = vrot.slane %v8716_v14, 1 }
 0x123   : > { %1600 = vst [vmem:[#allocation2 + $0xb4] sm:$0xf] %v1599_v2  ;;  %v7413_v9 = vld [vmem:[#allocation2 + $0x50] ss:$0 sps:$4 sm:$0x11]   ;;  %v3246_v2 = vrot.slane %v6923_v20, 1 }
 0x124   : > { %2136 = vrot.lane.b32.xlu1 %v2005_v52, %s7645_s20  ;;  %v1626_v52 = vld [vmem:[#allocation2 + $0x54] sm:$0xf]  ;;  %v2736_v23 = vsel %vm2206_vm3, %v2734_v37, %v2735_v28  ;;  %v2009_v25 = vshll.u32 %v8733_v62, 16  ;;  %v2225_v39 = vrot.slane %v6828_v13, 1  ;;  %v2226_v57 = vrot.slane %v7413_v9, 1 }
 0x125   : > { %v1440_v34 = vpop.permute.xlu0 %1439  ;;  %v1442_v3 = vpop.permute.xlu1 %1441  ;;  %v2014_v54 = vshll.u32 %v7413_v9, 16  ;;  %v1753_v26 = vld [vmem:[#allocation2 + $0x60] sm:$0xf]  ;;  %v1691_v28 = vld [vmem:[#allocation2 + $0x64] sm:$0xf]  ;;  %vm6394_vm8 = vcmask 1041408  }
 0x126   : > { %2775 = vrot.lane.b32.xlu0 %v2733_v1, %s7649_s24  ;;  %v1603_v0 = vsel %vm8378_vm6, %v1440_v34, %v1602_v38  ;;  %v1606_v11 = vsel %vm8388_vm7, %v1442_v3, %v1605_v17  ;;  %v3022_v38 = vshll.u32 %v6891_v47, 16  ;;  %v6844_v17 = vcombine.low %v1688_v36, %v8730_v56  ;;  %v7441_v1 = vld [vmem:[%s10589_s2 + $0x10] sm:$0xff]   ;;  %v7421_v13 = vld [vmem:[#allocation2 + $0x68] ss:$0 sps:$4 sm:$0x11]  }
 0x127   : > { %1604 = vst [vmem:[#allocation2 + $0xbc] sm:$0x1] %v1603_v0  ;;  %1607 = vst [vmem:[#allocation2 + $0xc0] sm:$0xf] %v1606_v11  ;;  %v8755_v34 = vcombine.low %v1626_v52, %v8744_v58  ;;  %v3248_v3 = vsel %vm2206_vm3, %v3246_v2, %v3247_v50  ;;  %v2011_v27 = vrot.slane %v2009_v25, 1  ;;  %v2227_v44 = vsel %vm2206_vm3, %v2225_v39, %v2226_v57 }
 0x128   : > { %2265 = vrot.lane.b32.xlu1 %v2224_v33, %s7646_s21  ;;  %v3024_v4 = vrot.slane %v3022_v38, 1  ;;  %v8759_v0 = vld [vmem:[#allocation2 + $0x5c] ss:$0 sps:$4 sm:$0x11]   ;;  %v2522_v11 = vshll.u32 %v6844_v17, 16  ;;  %v2007_v33 = vshrl.u32 %v8733_v62, 16  ;;  %v6892_v37 = vcombine.low %v1753_v26, %v8771_v63 }
 0x129   : > { %v1444_v22 = vpop.permute.xlu0 %1443  ;;  %v1446_v16 = vpop.permute.xlu1 %1445  ;;  %v2021_v21 = vshll.u32 %v8755_v34, 16  ;;  %v2520_v30 = vshrl.u32 %v6844_v17, 16  ;;  %v2016_v19 = vrot.slane %v2014_v54, 1  ;;  %v6829_v50 = vcombine.low %v1667_v41, %v8744_v58  ;;  %v7422_v58 = vld [vmem:[#allocation2 + $0x68] ss:$0 sps:$4 sm:$0x11]  }
 0x12a   : > { %2887 = vrot.lane.b32.xlu0 %v6890_v59, %s7648_s23  ;;  %1608 = vst.msk [vmem:[#allocation2 + $0xc4] sm:$0xf] %vm1495_vm5, %v1444_v22  ;;  %v1610_v46 = vsel %vm8378_vm6, %v1446_v16, %v1609_v29  ;;  %v3244_v59 = vrot.slane %v8691_v49, 1  ;;  %v3025_v7 = vor.u32 %v3024_v4, %v3020_v8  ;;  %v3029_v29 = vrot.slane %v3027_v45, 1  ;;  %v1730_v16 = vld [vmem:[#allocation2 + $0x54] sm:$0xe] }
 0x12b   : > { %1611 = vst [vmem:[#allocation2 + $0xc8] sm:$0x1] %v1610_v46  ;;  %v2524_v14 = vrot.slane %v2522_v11, 1  ;;  %v2527_v22 = vshll.u32 %v8759_v0, 16  ;;  %v2012_v46 = vor.u32 %v2011_v27, %v2007_v33  ;;  %v2023_v32 = vrot.slane %v2021_v21, 1 }
 0x12c   : > { %2377 = vrot.lane.b32.xlu1 %v8686_v61, %s7647_s22  ;;  %v7438_v61 = vld [vmem:[%s10589_s2 + $0x18] sm:$0xff]   ;;  %v3245_v49 = vsel %vm2206_vm3, %v3243_v40, %v3244_v59  ;;  %v7447_v40 = vld [vmem:[%s10589_s2] sm:$0xff]   ;;  %v3030_v59 = vsel %vm1933_vm2, %v3025_v7, %v3029_v29  ;;  %v6876_v36 = vcombine.low %v1730_v16, %v8730_v56  ;;  %v2738_v56 = vrot.slane %v8759_v0, 1  ;;  %v1755_v21 = vld [vmem:[#allocation2 + $0x6c] sm:$0xf] }
 0x12d   : > { %7250 = vmatprep.subr.bf16.mxu0 %v7438_v61  ;;  %v2525_v20 = vor.u32 %v2524_v14, %v2520_v30  ;;  %v2529_v60 = vrot.slane %v2527_v22, 1  ;;  %v3034_v52 = vshll.u32 %v6892_v37, 16  ;;  %v2229_v25 = vrot.slane %v7418_v18, 1  ;;  %v1795_v39 = vld [vmem:[#allocation2 + $0x60] sm:$0xe] }
 0x12e   : > { %3159 = vrot.lane.b32.xlu0 %v3018_v24, %s7652_s28  ;;  %7251 = vmatpush3.bf16.msra.mxu0 %v7438_v61  ;;  %v1690_v24 = vld [vmem:[#allocation2 + $0x60] sm:$0xf]  ;;  %v2017_v61 = vsel %vm1933_vm2, %v2012_v46, %v2016_v19  ;;  %v2737_v2 = vrot.slane %v6876_v36, 1  ;;  %v3032_v4 = vshrl.u32 %v6892_v37, 16  ;;  %v2539_v33 = vshll.u32 %v7422_v58, 16 }
 0x12f   : > { %7252 = vmatprep.subr.bf16.mxu0 %v7441_v1  ;;  %v6845_v38 = vcombine.low %v1690_v24, %v1691_v28  ;;  %v2530_v9 = vsel %vm1933_vm2, %v2525_v20, %v2529_v60  ;;  %v3036_v45 = vrot.slane %v3034_v52, 1  ;;  %v1731_v27 = vld [vmem:[#allocation2 + $0x60] sm:$0xe]  ;;  %v6924_v29 = vcombine.low %v1795_v39, %v8771_v63  ;;  %v1756_v18 = vld [vmem:[#allocation2 + $0x70] sm:$0xf] }
 0x130   : > { %2649 = vrot.lane.b32.xlu1 %v2518_v10, %s7651_s26  ;;  %v2739_v8 = vsel %vm2206_vm3, %v2737_v2, %v2738_v56  ;;  %v6877_v30 = vcombine.low %v1731_v27, %v1691_v28  ;;  %v2541_v22 = vrot.slane %v2539_v33, 1  ;;  %v7425_v16 = vld [vmem:[#allocation2 + $0x74] ss:$0 sps:$4 sm:$0x11]   ;;  %v6893_v26 = vcombine.low %v1755_v21, %v1756_v18  ;;  %v1668_v63 = vld [vmem:[#allocation2 + $0x60] sm:$0xe] }
 0x131   : > { %v2532_v0 = vshrl.u32 %v6845_v38, 16  ;;  %v3249_v19 = vrot.slane %v6924_v29, 1  ;;  %v3250_v41 = vrot.slane %v7421_v13, 1  ;;  %v2741_v60 = vrot.slane %v7422_v58, 1  ;;  %v8813_v56 = vld [vmem:[#allocation2 + $0x70] sm:$0xf] }
 0x132   : > { %3287 = vrot.lane.b32.xlu0 %v3245_v49, %s7650_s25  ;;  %7253 = vmatpush3.bf16.msra.mxu0 %v7441_v1  ;;  %v2028_v49 = vrot.slane %v2026_v48, 1  ;;  %v2534_v1 = vshll.u32 %v6845_v38, 16  ;;  %v8803_v48 = vld [vmem:[#allocation2 + $0x70] sm:$0xf]  ;;  %v2740_v20 = vrot.slane %v6877_v30, 1  ;;  %v3253_v28 = vrot.slane %v7425_v16, 1 }
 0x133   : > { %7254 = vmatprep.subr.bf16.mxu0 %v7444_v12  ;;  %v7429_v36 = vld [vmem:[#allocation2 + $0x68] ss:$0 sps:$4 sm:$0x11]   ;;  %v3044_v52 = vshrl.u32 %v6893_v26, 16  ;;  %vm3509_vm5 = vcmask 457728   ;;  %vm3542_vm6 = vcmask 523264  }
 0x134   : > { %2777 = vrot.lane.b32.xlu1 %v2736_v23, %s7649_s24  ;;  %v2228_v23 = vrot.slane %v6829_v50, 1  ;;  %v2536_v11 = vrot.slane %v2534_v1, 1  ;;  %v3251_v50 = vsel %vm2206_vm3, %v3249_v19, %v3250_v41  ;;  %v8827_v39 = vld [vmem:[#allocation2 + $0x74] ss:$0 sps:$4 sm:$0x11]   ;;  %vm3618_vm7 = vcmask 588800  }
 0x135   : > { %v8831_v33 = vld [vmem:[#allocation2 + $0x74] ss:$0 sps:$4 sm:$0x11]  }
 0x136   : > { %3289 = vrot.lane.b32.xlu0 %v3248_v3, %s7650_s25  ;;  %7255 = vmatpush3.bf16.msra.mxu0 %v7444_v12  ;;  %v3039_v3 = vshll.u32 %v7421_v13, 16  ;;  %v2230_v57 = vsel %vm2206_vm3, %v2228_v23, %v2229_v25  ;;  %v3037_v12 = vor.u32 %v3036_v45, %v3032_v4  ;;  %v2537_v14 = vor.u32 %v2536_v11, %v2532_v0 }
 0x137   : > { %7256 = vmatprep.subr.bf16.mxu0 %v7447_v40  ;;  %v2742_v13 = vsel %vm2206_vm3, %v2740_v20, %v2741_v60  ;;  %v3051_v25 = vshll.u32 %v7425_v16, 16  ;;  %v2038_v11 = vshll.u32 %v7429_v36, 16  ;;  %v1757_v16 = vld [vmem:[#allocation2 + $0x78] sm:$0xf]  ;;  %v1669_v20 = vld [vmem:[#allocation2 + $0x6c] sm:$0xe] }
 0x138   : > { %2889 = vrot.lane.b32.xlu1 %v6891_v47, %s7648_s23  ;;  %v2019_v47 = vshrl.u32 %v8755_v34, 16  ;;  %v3041_v7 = vrot.slane %v3039_v3, 1  ;;  %v2232_v3 = vrot.slane %v7429_v36, 1 }
 0x139   : > { %v2040_v41 = vrot.slane %v2038_v11, 1 }
 0x13a   : > { %2267 = vrot.lane.b32.xlu0 %v2227_v44, %s7646_s21  ;;  %v2024_v10 = vor.u32 %v2023_v32, %v2019_v47  ;;  %7257 = vmatpush3.bf16.msra.mxu0 %v7447_v40  ;;  %v1796_v44 = vld [vmem:[#allocation2 + $0x6c] sm:$0xe]  ;;  %v3042_v46 = vsel %vm1933_vm2, %v3037_v12, %v3041_v7  ;;  %v1629_v47 = vld [vmem:[#allocation2 + $0x64] sm:$0xf]  ;;  %v3053_v7 = vrot.slane %v3051_v25, 1 }
 0x13b   : > { %v6925_v40 = vcombine.low %v1796_v44, %v1756_v18  ;;  %v1692_v32 = vld [vmem:[#allocation2 + $0x6c] sm:$0xf] }
 0x13c   : > { %3161 = vrot.lane.b32.xlu1 %v3030_v59, %s7652_s28  ;;  %v2029_v51 = vsel %vm1933_vm2, %v2024_v10, %v2028_v49  ;;  %v1628_v59 = vld [vmem:[#allocation2 + $0x60] sm:$0xf]  ;;  %v3046_v10 = vshll.u32 %v6893_v26, 16  ;;  %v1630_v49 = vld [vmem:[#allocation2 + $0x6c] sm:$0xf]  ;;  %v6846_v2 = vcombine.low %v1692_v32, %v8803_v48 }
 0x13d   : > { %v8821_v1 = vcombine.low %v1630_v49, %v8813_v56  ;;  %v8852_v49 = vld [vmem:[#allocation2 + $0x7c] sm:$0xf] }
 0x13e   : > { %2379 = vrot.lane.b32.xlu0 %v6844_v17, %s7647_s22  ;;  %v8788_v17 = vpop.permute.xlu0 %2126  ;;  %v3048_v23 = vrot.slane %v3046_v10, 1  ;;  %v2544_v44 = vshrl.u32 %v6846_v2, 16  ;;  %v1694_v10 = vld [vmem:[#allocation2 + $0x78] sm:$0xf] }
 0x13f   : > { %v2045_v18 = vshll.u32 %v8821_v1, 16  ;;  %v6847_v25 = vcombine.low %v1694_v10, %v8852_v49 }
 0x140   : > { %2138 = vrot.lane.b32.xlu1 %v2017_v61, %s7645_s20  ;;  %v8808_v61 = vcombine.low %v1628_v59, %v1629_v47  ;;  %v3049_v12 = vor.u32 %v3048_v23, %v3044_v52  ;;  %v6831_v23 = vcombine.low %v1669_v20, %v8813_v56  ;;  %v1798_v20 = vld [vmem:[#allocation2 + $0x84] sm:$0xe] }
 0x141   : > { %v2047_v32 = vrot.slane %v2045_v18, 1 }
 0x142   : > { %2651 = vrot.lane.b32.xlu0 %v2530_v9, %s7651_s26  ;;  %v8796_v54 = vpop.permute.xlu0 %2255  ;;  %v6830_v9 = vcombine.low %v1668_v63, %v1629_v47  ;;  %v2033_v58 = vshll.u32 %v8808_v61, 16  ;;  %v2031_v0 = vshrl.u32 %v8808_v61, 16  ;;  %v2043_v63 = vshrl.u32 %v8821_v1, 16 }
 0x143   : > { %v2234_v11 = vrot.slane %v6831_v23, 1 }
 0x144   : > { %2140 = vrot.lane.b32.xlu1 %v2029_v51, %s7645_s20  ;;  %v2231_v45 = vrot.slane %v6830_v9, 1  ;;  %v2035_v29 = vrot.slane %v2033_v58, 1  ;;  %v2048_v52 = vor.u32 %v2047_v32, %v2043_v63  ;;  %v1760_v63 = vld [vmem:[#allocation2 + $0x88] sm:$0xf] }
 0x146   : > { %2779 = vrot.lane.b32.xlu0 %v2739_v8, %s7649_s24  ;;  %v2233_v21 = vsel %vm2206_vm3, %v2231_v45, %v2232_v3  ;;  %v2036_v47 = vor.u32 %v2035_v29, %v2031_v0  ;;  %v1797_v29 = vld [vmem:[#allocation2 + $0x78] sm:$0xe] }
 0x148   : > { %2269 = vrot.lane.b32.xlu1 %v2230_v57, %s7646_s21  ;;  %v2546_v57 = vshll.u32 %v6846_v2, 16 }
 0x14a   : > { %2891 = vrot.lane.b32.xlu0 %v6892_v37, %s7648_s23  ;;  %v2542_v37 = vsel %vm1933_vm2, %v2537_v14, %v2541_v22  ;;  %v2548_v30 = vrot.slane %v2546_v57, 1  ;;  %v2551_v14 = vshll.u32 %v8827_v39, 16  ;;  %v1732_v22 = vld [vmem:[#allocation2 + $0x6c] sm:$0xe] }
 0x14b   : > { %v8870_v57 = vld [vmem:[#allocation2 + $0x80] ss:$0 sps:$4 sm:$0x11]  }
 0x14c   : > { %2381 = vrot.lane.b32.xlu1 %v6845_v38, %s7647_s22  ;;  %v3252_v38 = vrot.slane %v6925_v40, 1  ;;  %v2050_v40 = vshll.u32 %v8831_v33, 16  ;;  %v2549_v60 = vor.u32 %v2548_v30, %v2544_v44  ;;  %v2553_v36 = vrot.slane %v2551_v14, 1  ;;  %v1733_v14 = vld [vmem:[#allocation2 + $0x78] sm:$0xe] }
 0x14d   : > { %v3313_v30 = vsel %vm3311_vm9, %v8286_v5, %v8788_v17 }
 0x14e   : > { %3163 = vrot.lane.b32.xlu0 %v3042_v46, %s7652_s28  ;;  %v8805_v24 = vpop.permute.xlu0 %2367  ;;  %v3254_v4 = vsel %vm2206_vm3, %v3252_v38, %v3253_v28  ;;  %v8840_v46 = vld [vmem:[#allocation2 + $0x7c] sm:$0xf]  ;;  %v2052_v38 = vrot.slane %v2050_v40, 1  ;;  %v2554_v58 = vsel %vm1933_vm2, %v2549_v60, %v2553_v36  ;;  %v3346_v5 = vsel %vm3344_vm10, %v3313_v30, %v8796_v54  ;;  %v1759_v60 = vld [vmem:[#allocation2 + $0x84] sm:$0xf] }
 0x14f   : > { %v6894_v28 = vcombine.low %v1757_v16, %v8840_v46  ;;  %v6926_v16 = vcombine.low %v1797_v29, %v8840_v46  ;;  %v6879_v46 = vcombine.low %v1733_v14, %v8852_v49  ;;  %v8895_v36 = vld [vmem:[#allocation2 + $0x8c] ss:$0 sps:$4 sm:$0x11]  }
 0x150   : > { %2653 = vrot.lane.b32.xlu1 %v2542_v37, %s7651_s26  ;;  %v6878_v37 = vcombine.low %v1732_v22, %v8803_v48  ;;  %v8862_v48 = vld [vmem:[#allocation2 + $0x80] ss:$0 sps:$4 sm:$0x11]   ;;  %v2053_v0 = vsel %vm1933_vm2, %v2048_v52, %v2052_v38 }
 0x151   : > { %v3058_v45 = vshll.u32 %v6894_v28, 16  ;;  %v3056_v18 = vshrl.u32 %v6894_v28, 16  ;;  %v3063_v44 = vshll.u32 %v8862_v48, 16  ;;  %v3255_v54 = vrot.slane %v6926_v16, 1 }
 0x152   : > { %3291 = vrot.lane.b32.xlu0 %v3251_v50, %s7650_s25  ;;  %v8823_v8 = vpop.permute.xlu1 %2369  ;;  %v3256_v38 = vrot.slane %v8862_v48, 1  ;;  %v1696_v48 = vld [vmem:[#allocation2 + $0x84] sm:$0xf] }
 0x153   : > { %v8817_v51 = vpop.permute.xlu0 %2879  ;;  %v3065_v32 = vrot.slane %v3063_v44, 1  ;;  %v7452_v44 = vld [vmem:[#allocation2 + $0x80] ss:$0 sps:$4 sm:$0x11]  }
 0x154   : > { %2781 = vrot.lane.b32.xlu1 %v2742_v13, %s7649_s24  ;;  %v2041_v13 = vsel %vm1933_vm2, %v2036_v47, %v2040_v41 }
 0x156   : > { %3293 = vrot.lane.b32.xlu0 %v3254_v4, %s7650_s25  ;;  %v2743_v4 = vrot.slane %v6878_v37, 1 }
 0x157   : > { %v8842_v19 = vpop.permute.xlu1 %2881 }
 0x158   : > { %v8833_v27 = vpop.permute.xlu0 %2371  ;;  %2893 = vrot.lane.b32.xlu1 %v6893_v26, %s7648_s23  ;;  %v3054_v26 = vsel %vm1933_vm2, %v3049_v12, %v3053_v7  ;;  %v2235_v12 = vrot.slane %v8831_v33, 1  ;;  %v2558_v7 = vshll.u32 %v6847_v25, 16  ;;  %v2563_v33 = vshll.u32 %v8870_v57, 16 }
 0x15a   : > { %2271 = vrot.lane.b32.xlu0 %v2233_v21, %s7646_s21  ;;  %v3060_v21 = vrot.slane %v3058_v45, 1  ;;  %v2236_v40 = vsel %vm2206_vm3, %v2234_v11, %v2235_v12  ;;  %v2560_v47 = vrot.slane %v2558_v7, 1  ;;  %v2565_v10 = vrot.slane %v2563_v33, 1  ;;  %v8911_v7 = vld [vmem:[#allocation2 + $0x88] sm:$0xf] }
 0x15b   : > { %v2746_v11 = vrot.slane %v6879_v46, 1  ;;  %v2747_v12 = vrot.slane %v8870_v57, 1 }
 0x15c   : > { %v8845_v59 = vpop.permute.xlu0 %2767  ;;  %3165 = vrot.lane.b32.xlu1 %v3054_v26, %s7652_s28  ;;  %v2556_v26 = vshrl.u32 %v6847_v25, 16  ;;  %v3061_v17 = vor.u32 %v3060_v21, %v3056_v18  ;;  %v3259_v18 = vrot.slane %v8895_v36, 1 }
 0x15e   : > { %2383 = vrot.lane.b32.xlu0 %v6846_v2, %s7647_s22  ;;  %v8855_v50 = vpop.permute.xlu1 %2373  ;;  %v2744_v2 = vrot.slane %v8827_v39, 1  ;;  %v2561_v23 = vor.u32 %v2560_v47, %v2556_v26  ;;  %v3066_v45 = vsel %vm1933_vm2, %v3061_v17, %v3065_v32  ;;  %v8928_v26 = vcombine.low %v1696_v48, %v8911_v7  ;;  %v1634_v47 = vld [vmem:[#allocation2 + $0x84] sm:$0xf] }
 0x15f   : > { %v2748_v17 = vsel %vm2206_vm3, %v2746_v11, %v2747_v12  ;;  %v2238_v32 = vrot.slane %v7452_v44, 1 }
 0x160   : > { %v8857_v9 = vpop.permute.xlu0 %3279  ;;  %2142 = vrot.lane.b32.xlu1 %v2041_v13, %s7645_s20  ;;  %v2745_v39 = vsel %vm2206_vm3, %v2743_v4, %v2744_v2  ;;  %v3379_v13 = vsel %vm3377_vm11, %v3346_v5, %v8805_v24  ;;  %v1632_v4 = vld [vmem:[#allocation2 + $0x78] sm:$0xf]  ;;  %v1633_v2 = vld [vmem:[#allocation2 + $0x7c] sm:$0xf]  ;;  %v2566_v14 = vsel %vm1933_vm2, %v2561_v23, %v2565_v10  ;;  %v2570_v23 = vshll.u32 %v8928_v26, 16 }
 0x161   : > { %v8917_v21 = vcombine.low %v1632_v4, %v1633_v2  ;;  %v8956_v4 = vld [vmem:[#allocation2 + $0x8c] ss:$0 sps:$4 sm:$0x11]  }
 0x162   : > { %2655 = vrot.lane.b32.xlu0 %v2554_v58, %s7651_s26  ;;  %v8868_v3 = vpop.permute.xlu1 %2257  ;;  %v6927_v58 = vcombine.low %v1798_v20, %v1760_v63  ;;  %v3075_v20 = vshll.u32 %v8895_v36, 16 }
 0x164   : > { %v8872_v56 = vpop.permute.xlu0 %3281  ;;  %2144 = vrot.lane.b32.xlu1 %v2053_v0, %s7645_s20  ;;  %v1670_v0 = vld [vmem:[#allocation2 + $0x78] sm:$0xe]  ;;  %v3258_v57 = vrot.slane %v6927_v58, 1 }
 0x166   : > { %2783 = vrot.lane.b32.xlu0 %v2745_v39, %s7649_s24  ;;  %v8883_v22 = vpop.permute.xlu1 %2769  ;;  %v3257_v39 = vsel %vm2206_vm3, %v3255_v54, %v3256_v38  ;;  %v3260_v36 = vsel %vm2206_vm3, %v3258_v57, %v3259_v18  ;;  %v2568_v18 = vshrl.u32 %v8928_v26, 16 }
 0x168   : > { %v8887_v41 = vpop.permute.xlu0 %2259  ;;  %2273 = vrot.lane.b32.xlu1 %v2236_v40, %s7646_s21  ;;  %v6832_v40 = vcombine.low %v1670_v0, %v1633_v2 }
 0x16a   : > { %2895 = vrot.lane.b32.xlu0 %v6894_v28, %s7648_s23  ;;  %v8897_v37 = vpop.permute.xlu1 %2261  ;;  %v8902_v28 = vcombine.low %v1759_v60, %v1760_v63  ;;  %v8930_v63 = vld [vmem:[#allocation2 + $0x88] sm:$0xf]  ;;  %v2057_v60 = vshll.u32 %v8917_v21, 16 }
 0x16c   : > { %v2640_v52 = vpop.permute.xlu0 %2639  ;;  %2385 = vrot.lane.b32.xlu1 %v6847_v25, %s7647_s22  ;;  %v3070_v33 = vshll.u32 %v8902_v28, 16  ;;  %v3068_v54 = vshrl.u32 %v8902_v28, 16  ;;  %v2059_v0 = vrot.slane %v2057_v60, 1  ;;  %v8982_v60 = vld [vmem:[#allocation2 + $0x94] sm:$0xf] }
 0x16d   : > { %v3412_v49 = vsel %vm3410_vm13, %v3379_v13, %v2640_v52  ;;  %v2237_v52 = vrot.slane %v6832_v40, 1 }
 0x16e   : > { %v3445_v24 = vsel %vm3443_vm0, %v3412_v49, %v8845_v59  ;;  %3167 = vrot.lane.b32.xlu0 %v3066_v45, %s7652_s28  ;;  %v2129_v29 = vpop.permute.xlu1 %2128  ;;  %v3072_v38 = vrot.slane %v3070_v33, 1  ;;  %v3077_v49 = vrot.slane %v3075_v20, 1  ;;  %v2055_v45 = vshrl.u32 %v8917_v21, 16 }
 0x16f   : > { %v3478_v25 = vsel %vm3476_vm4, %v3445_v24, %v8817_v51  ;;  %v3315_v59 = vsel %vm3311_vm9, %v8464_v31, %v2129_v29 }
 0x170   : > { %v3152_v30 = vpop.permute.xlu0 %3151  ;;  %v3348_v16 = vsel %vm3344_vm10, %v3315_v59, %v8868_v3  ;;  %2657 = vrot.lane.b32.xlu1 %v2566_v14, %s7651_s26  ;;  %v3073_v11 = vor.u32 %v3072_v38, %v3068_v54  ;;  %v1761_v59 = vld [vmem:[#allocation2 + $0x90] sm:$0xf]  ;;  %v2060_v57 = vor.u32 %v2059_v0, %v2055_v45 }
 0x171   : > { %v3511_v51 = vsel %vm3509_vm5, %v3478_v25, %v3152_v30  ;;  %v3381_v5 = vsel %vm3377_vm11, %v3348_v16, %v8823_v8  ;;  %v8946_v8 = vcombine.low %v1634_v47, %v8930_v63  ;;  %v1734_v25 = vld [vmem:[#allocation2 + $0x84] sm:$0xe]  ;;  %v8970_v30 = vld [vmem:[#allocation2 + $0x94] sm:$0xf] }
 0x172   : > { %3295 = vrot.lane.b32.xlu0 %v3257_v39, %s7650_s25  ;;  %v3544_v31 = vsel %vm3542_vm6, %v3511_v51, %v8857_v9  ;;  %v2642_v3 = vpop.permute.xlu1 %2641  ;;  %v8943_v9 = vld [vmem:[#allocation2 + $0x8c] ss:$0 sps:$4 sm:$0x11]   ;;  %v6880_v16 = vcombine.low %v1734_v25, %v8911_v7  ;;  %v3078_v40 = vsel %vm1933_vm2, %v3073_v11, %v3077_v49  ;;  %v6896_v20 = vcombine.low %v1761_v59, %v8970_v30  ;;  %v1698_v7 = vld [vmem:[#allocation2 + $0x90] sm:$0xf] }
 0x173   : > { %7258 = vmatprep.mubr.msk.bf16.mxu0 %vm3618_vm7, %v3544_v31  ;;  %v3414_v46 = vsel %vm3410_vm13, %v3381_v5, %v2642_v3  ;;  %v2575_v12 = vshll.u32 %v8943_v9, 16  ;;  %v2069_v29 = vshll.u32 %v8946_v8, 16  ;;  %v2067_v47 = vshrl.u32 %v8946_v8, 16  ;;  %v1671_v5 = vld [vmem:[#allocation2 + $0x84] sm:$0xe] }
 0x174   : > { %v2644_v10 = vpop.permute.xlu0 %2643  ;;  %v3447_v13 = vsel %vm3443_vm0, %v3414_v46, %v8883_v22  ;;  %2785 = vrot.lane.b32.xlu1 %v2748_v17, %s7649_s24  ;;  %v2062_v22 = vshll.u32 %v7452_v44, 16  ;;  %v2572_v44 = vrot.slane %v2570_v23, 1  ;;  %v2750_v46 = vrot.slane %v8943_v9, 1 }
 0x175   : > { %v3480_v58 = vsel %vm3476_vm4, %v3447_v13, %v8842_v19  ;;  %v2239_v19 = vsel %vm2206_vm3, %v2237_v52, %v2238_v32  ;;  %v2071_v31 = vrot.slane %v2069_v29, 1  ;;  %v2577_v32 = vrot.slane %v2575_v12, 1  ;;  %v9006_v29 = vld [vmem:[#allocation2 + $0x98] ss:$0 sps:$4 sm:$0x11]  }
 0x176   : > { %3297 = vrot.lane.b32.xlu0 %v3260_v36, %s7650_s25  ;;  %v3154_v2 = vpop.permute.xlu1 %3153  ;;  %v2064_v33 = vrot.slane %v2062_v22, 1  ;;  %v2573_v17 = vor.u32 %v2572_v44, %v2568_v18  ;;  %v2749_v13 = vrot.slane %v6880_v16, 1  ;;  %v6833_v36 = vcombine.low %v1671_v5, %v8930_v63 }
 0x177   : > { %v3513_v48 = vsel %vm3509_vm5, %v3480_v58, %v3154_v2  ;;  %v2072_v58 = vor.u32 %v2071_v31, %v2067_v47  ;;  %v3082_v9 = vshll.u32 %v6896_v20, 16  ;;  %v2241_v22 = vrot.slane %v8956_v4, 1  ;;  %v1763_v47 = vld [vmem:[#allocation2 + $0x9c] sm:$0xf] }
 0x178   : > { %v2772_v24 = vpop.permute.xlu0 %2771  ;;  %2897 = vrot.lane.b32.xlu1 %v8902_v28, %s7648_s23  ;;  %v3546_v39 = vsel %vm3542_vm6, %v3513_v48, %v8872_v56  ;;  %v2074_v28 = vshll.u32 %v8956_v4, 16  ;;  %v2065_v38 = vsel %vm1933_vm2, %v2060_v57, %v2064_v33  ;;  %v2751_v63 = vsel %vm2206_vm3, %v2749_v13, %v2750_v46  ;;  %v1799_v4 = vld [vmem:[#allocation2 + $0x90] sm:$0xe] }
 0x179   : > { %7259 = vmatmul.mubr.msk.bf16.vlgmr.msra.gmra.mxu0 %vm3618_vm7, %v3546_v39  ;;  %v2240_v0 = vrot.slane %v6833_v36, 1  ;;  %v3080_v39 = vshrl.u32 %v6896_v20, 16  ;;  %v3084_v18 = vrot.slane %v3082_v9, 1  ;;  %v1735_v57 = vld [vmem:[#allocation2 + $0x90] sm:$0xe] }
 0x17a   : > { %2275 = vrot.lane.b32.xlu0 %v2239_v19, %s7646_s21  ;;  %v2131_v14 = vpop.permute.xlu1 %2130  ;;  %v2076_v2 = vrot.slane %v2074_v28, 1  ;;  %v1636_v36 = vld [vmem:[#allocation2 + $0x90] sm:$0xf] }
 0x17b   : > { %v3317_v56 = vsel %vm3311_vm9, %v8515_v53, %v2131_v14  ;;  %v2242_v28 = vsel %vm2206_vm3, %v2240_v0, %v2241_v22  ;;  %v3085_v31 = vor.u32 %v3084_v18, %v3080_v39  ;;  %v1638_v39 = vld [vmem:[#allocation2 + $0x9c] sm:$0xf]  ;;  %v9046_v18 = vld [vmem:[#allocation2 + $0xa0] sm:$0xf] }
 0x17c   : > { %v2884_v51 = vpop.permute.xlu0 %2883  ;;  %v3350_v3 = vsel %vm3344_vm10, %v3317_v56, %v8887_v41  ;;  %3169 = vrot.lane.b32.xlu1 %v3078_v40, %s7652_s28  ;;  %v2077_v12 = vsel %vm1933_vm2, %v2072_v58, %v2076_v2  ;;  %v2587_v56 = vshll.u32 %v9006_v29, 16  ;;  %v1764_v40 = vld [vmem:[#allocation2 + $0xa0] sm:$0xf]  ;;  %v2753_v58 = vrot.slane %v9006_v29, 1  ;;  %v1700_v2 = vld [vmem:[#allocation2 + $0x9c] sm:$0xf] }
 0x17d   : > { %v3383_v53 = vsel %vm3377_vm11, %v3350_v3, %v8833_v27  ;;  %v6849_v27 = vcombine.low %v1698_v7, %v8982_v60  ;;  %v1800_v3 = vld [vmem:[#allocation2 + $0x9c] sm:$0xe]  ;;  %v7466_v7 = vld [vmem:[#allocation2 + $0xa4] ss:$0 sps:$4 sm:$0x11]  }
 0x17e   : > { %2387 = vrot.lane.b32.xlu0 %v8928_v26, %s7647_s22  ;;  %v3416_v54 = vsel %vm3410_vm13, %v3383_v53, %v2644_v10  ;;  %v2133_v41 = vpop.permute.xlu1 %2132  ;;  %v2578_v26 = vsel %vm1933_vm2, %v2573_v17, %v2577_v32  ;;  %v8997_v10 = vld [vmem:[#allocation2 + $0x98] ss:$0 sps:$4 sm:$0x11]   ;;  %v6881_v32 = vcombine.low %v1735_v57, %v8982_v60  ;;  %v9023_v53 = vcombine.low %v1763_v47, %v1764_v40  ;;  %v1672_v60 = vld [vmem:[#allocation2 + $0x90] sm:$0xe] }
 0x17f   : > { %v3449_v52 = vsel %vm3443_vm0, %v3416_v54, %v2772_v24  ;;  %v3319_v48 = vsel %vm3311_vm9, %v8538_v42, %v2133_v41  ;;  %v2582_v25 = vshll.u32 %v6849_v27, 16  ;;  %v3087_v44 = vshll.u32 %v8997_v10, 16 }
 0x180   : > { %v3156_v23 = vpop.permute.xlu0 %3155  ;;  %v3482_v49 = vsel %vm3476_vm4, %v3449_v52, %v2884_v51  ;;  %2146 = vrot.lane.b32.xlu1 %v2065_v38, %s7645_s20  ;;  %v3352_v42 = vsel %vm3344_vm10, %v3319_v48, %v8897_v37  ;;  %v2580_v14 = vshrl.u32 %v6849_v27, 16  ;;  %v6928_v51 = vcombine.low %v1799_v4, %v8970_v30  ;;  %v1637_v52 = vld [vmem:[#allocation2 + $0x94] sm:$0xf] }
 0x181   : > { %v3515_v24 = vsel %vm3509_vm5, %v3482_v49, %v3156_v23  ;;  %v2584_v16 = vrot.slane %v2582_v25, 1  ;;  %v3089_v5 = vrot.slane %v3087_v44, 1  ;;  %v3385_v37 = vsel %vm3377_vm11, %v3352_v42, %v8855_v50  ;;  %v9034_v49 = vld [vmem:[#allocation2 + $0xa0] sm:$0xf] }
 0x182   : > { %2659 = vrot.lane.b32.xlu0 %v2578_v26, %s7651_s26  ;;  %v2646_v45 = vpop.permute.xlu1 %2645  ;;  %v2589_v54 = vrot.slane %v2587_v56, 1  ;;  %v3261_v41 = vrot.slane %v6928_v51, 1  ;;  %v3262_v38 = vrot.slane %v8997_v10, 1  ;;  %v2752_v9 = vrot.slane %v6881_v32, 1 }
 0x183   : > { %v2585_v30 = vor.u32 %v2584_v16, %v2580_v14  ;;  %v3418_v13 = vsel %vm3410_vm13, %v3385_v37, %v2646_v45  ;;  %v3090_v50 = vsel %vm1933_vm2, %v3085_v31, %v3089_v5  ;;  %v3094_v45 = vshll.u32 %v9023_v53, 16  ;;  %v9065_v32 = vld [vmem:[#allocation2 + $0xa4] ss:$0 sps:$4 sm:$0x11]  }
 0x184   : > { %v3284_v11 = vpop.permute.xlu0 %3283  ;;  %2148 = vrot.lane.b32.xlu1 %v2077_v12, %s7645_s20  ;;  %v3263_v48 = vsel %vm2206_vm3, %v3261_v41, %v3262_v38  ;;  %v6834_v25 = vcombine.low %v1672_v60, %v1637_v52  ;;  %v3092_v4 = vshrl.u32 %v9023_v53, 16  ;;  %v2754_v57 = vsel %vm2206_vm3, %v2752_v9, %v2753_v58  ;;  %v9076_v60 = vld [vmem:[#allocation2 + $0xac] sm:$0xf] }
 0x185   : > { %v3548_v19 = vsel %vm3542_vm6, %v3515_v24, %v3284_v11  ;;  %v2590_v22 = vsel %vm1933_vm2, %v2585_v30, %v2589_v54  ;;  %v9041_v24 = vcombine.low %v1636_v36, %v1637_v52  ;;  %v7470_v11 = vld [vmem:[#allocation2 + $0x98] ss:$0 sps:$4 sm:$0x11]   ;;  %v3096_v42 = vrot.slane %v3094_v45, 1  ;;  %v1765_v52 = vld [vmem:[#allocation2 + $0xa8] sm:$0xf] }
 0x186   : > { %2787 = vrot.lane.b32.xlu0 %v2751_v63, %s7649_s24  ;;  %7262 = vmatprep.mubr.msk.bf16.mxu0 %vm3618_vm7, %v3548_v19  ;;  %v2774_v59 = vpop.permute.xlu1 %2773  ;;  %v6850_v19 = vcombine.low %v1700_v2, %v9034_v49  ;;  %v9056_v16 = vcombine.low %v1638_v39, %v9046_v18  ;;  %v2243_v51 = vrot.slane %v6834_v25, 1 }
 0x187   : > { %v3451_v23 = vsel %vm3443_vm0, %v3418_v13, %v2774_v59  ;;  %v3099_v59 = vshll.u32 %v7466_v7, 16  ;;  %v3097_v37 = vor.u32 %v3096_v42, %v3092_v4  ;;  %v2079_v30 = vshrl.u32 %v9041_v24, 16  ;;  %v1736_v13 = vld [vmem:[#allocation2 + $0x9c] sm:$0xe] }
 0x188   : > { %v3286_v33 = vpop.permute.xlu0 %3285  ;;  %2277 = vrot.lane.b32.xlu1 %v2242_v28, %s7646_s21  ;;  %v9053_v28 = vld [vmem:[#allocation2 + $0xa4] ss:$0 sps:$4 sm:$0x11]   ;;  %v2594_v47 = vshll.u32 %v6850_v19, 16  ;;  %v2093_v38 = vshll.u32 %v9056_v16, 16 }
 0x189   : > { %v2599_v41 = vshll.u32 %v9053_v28, 16  ;;  %v2756_v39 = vrot.slane %v9053_v28, 1 }
 0x18a   : > { %2899 = vrot.lane.b32.xlu0 %v6896_v20, %s7648_s23  ;;  %v2886_v17 = vpop.permute.xlu1 %2885  ;;  %v6929_v20 = vcombine.low %v1800_v3, %v1764_v40  ;;  %v2244_v40 = vrot.slane %v7470_v11, 1  ;;  %v3101_v3 = vrot.slane %v3099_v59, 1  ;;  %v2596_v36 = vrot.slane %v2594_v47, 1 }
 0x18b   : > { %v3484_v26 = vsel %vm3476_vm4, %v3451_v23, %v2886_v17  ;;  %v2086_v17 = vshll.u32 %v7470_v11, 16  ;;  %v2095_v45 = vrot.slane %v2093_v38, 1  ;;  %v6898_v11 = vcombine.low %v1765_v52, %v9076_v60 }
 0x18c   : > { %v9025_v46 = vpop.permute.xlu0 %2263  ;;  %2389 = vrot.lane.b32.xlu1 %v6849_v27, %s7647_s22  ;;  %v3265_v27 = vrot.slane %v7466_v7, 1  ;;  %v3264_v29 = vrot.slane %v6929_v20, 1  ;;  %v2592_v20 = vshrl.u32 %v6850_v19, 16  ;;  %v3102_v58 = vsel %vm1933_vm2, %v3097_v37, %v3101_v3 }
 0x18d   : > { %v2088_v2 = vrot.slane %v2086_v17, 1  ;;  %v2247_v47 = vrot.slane %v9065_v32, 1 }
 0x18e   : > { %3171 = vrot.lane.b32.xlu0 %v3090_v50, %s7652_s28  ;;  %v3158_v10 = vpop.permute.xlu1 %3157  ;;  %v3266_v56 = vsel %vm2206_vm3, %v3264_v29, %v3265_v27  ;;  %v2245_v50 = vsel %vm2206_vm3, %v2243_v51, %v2244_v40  ;;  %v2091_v27 = vshrl.u32 %v9056_v16, 16  ;;  %v9087_v29 = vld [vmem:[#allocation2 + $0xac] sm:$0xf] }
 0x18f   : > { %v3517_v63 = vsel %vm3509_vm5, %v3484_v26, %v3158_v10  ;;  %v2098_v26 = vshll.u32 %v9065_v32, 16 }
 0x190   : > { %v2376_v0 = vpop.permute.xlu0 %2375  ;;  %2661 = vrot.lane.b32.xlu1 %v2590_v22, %s7651_s26  ;;  %v3550_v12 = vsel %vm3542_vm6, %v3517_v63, %v3286_v33  ;;  %v2081_v33 = vshll.u32 %v9041_v24, 16  ;;  %v1673_v63 = vld [vmem:[#allocation2 + $0x9c] sm:$0xe]  ;;  %v2597_v22 = vor.u32 %v2596_v36, %v2592_v20  ;;  %v2096_v59 = vor.u32 %v2095_v45, %v2091_v27  ;;  %v1737_v20 = vld [vmem:[#allocation2 + $0xa8] sm:$0xe] }
 0x191   : > { %7263 = vmatmul.mubr.msk.bf16.gmra.mxu0 %vm3618_vm7, %v3550_v12  ;;  %v1702_v12 = vld [vmem:[#allocation2 + $0xa8] sm:$0xf]  ;;  %v2100_v25 = vrot.slane %v2098_v26, 1  ;;  %v1802_v45 = vld [vmem:[#allocation2 + $0xb4] sm:$0xe] }
 0x192   : > { %3299 = vrot.lane.b32.xlu0 %v3263_v48, %s7650_s25  ;;  %v2135_v44 = vpop.permute.xlu1 %2134  ;;  %v2083_v54 = vrot.slane %v2081_v33, 1  ;;  %v2601_v48 = vrot.slane %v2599_v41, 1  ;;  %v6851_v33 = vcombine.low %v1702_v12, %v9087_v29  ;;  %v3104_v41 = vshrl.u32 %v6898_v11, 16  ;;  %v7484_v12 = vld [vmem:[#allocation2 + $0xbc] ss:$0 sps:$4 sm:$0x11]  }
 0x193   : > { %v3321_v31 = vsel %vm3311_vm9, %v8623_v55, %v2135_v44  ;;  %v6835_v44 = vcombine.low %v1673_v63, %v9046_v18  ;;  %v2101_v17 = vsel %vm1933_vm2, %v2096_v59, %v2100_v25  ;;  %v1674_v59 = vld [vmem:[#allocation2 + $0xa8] sm:$0xe] }
 0x194   : > { %v2648_v14 = vpop.permute.xlu0 %2647  ;;  %2789 = vrot.lane.b32.xlu1 %v2754_v57, %s7649_s24  ;;  %v3354_v55 = vsel %vm3344_vm10, %v3321_v31, %v9025_v46  ;;  %v6882_v46 = vcombine.low %v1736_v13, %v9034_v49  ;;  %v2084_v9 = vor.u32 %v2083_v54, %v2079_v30  ;;  %v9103_v31 = vld [vmem:[#allocation2 + $0xb0] ss:$0 sps:$4 sm:$0x11]   ;;  %v2606_v54 = vshll.u32 %v6851_v33, 16 }
 0x195   : > { %v2246_v40 = vrot.slane %v6835_v44, 1 }
 0x196   : > { %3301 = vrot.lane.b32.xlu0 %v3266_v56, %s7650_s25  ;;  %v9063_v5 = vpop.permute.xlu1 %2136  ;;  %v2089_v42 = vsel %vm1933_vm2, %v2084_v9, %v2088_v2  ;;  %v2755_v57 = vrot.slane %v6882_v46, 1  ;;  %v2602_v56 = vsel %vm1933_vm2, %v2597_v22, %v2601_v48  ;;  %v2608_v2 = vrot.slane %v2606_v54, 1  ;;  %v1768_v46 = vld [vmem:[#allocation2 + $0xb8] sm:$0xf] }
 0x197   : > { %v2248_v52 = vsel %vm2206_vm3, %v2246_v40, %v2247_v47  ;;  %v3323_v27 = vsel %vm3311_vm9, %v8646_v35, %v9063_v5 }
 0x198   : > { %v2776_v7 = vpop.permute.xlu0 %2775  ;;  %2901 = vrot.lane.b32.xlu1 %v9023_v53, %s7648_s23  ;;  %v3387_v53 = vsel %vm3377_vm11, %v3354_v55, %v2376_v0  ;;  %v2757_v30 = vsel %vm2206_vm3, %v2755_v57, %v2756_v39  ;;  %v1801_v55 = vld [vmem:[#allocation2 + $0xa8] sm:$0xe] }
 0x199   : > { %v3420_v49 = vsel %vm3410_vm13, %v3387_v53, %v2648_v14  ;;  %v3106_v14 = vshll.u32 %v6898_v11, 16  ;;  %v6930_v26 = vcombine.low %v1801_v55, %v9076_v60  ;;  %v1767_v53 = vld [vmem:[#allocation2 + $0xb4] sm:$0xf]  ;;  %v6883_v60 = vcombine.low %v1737_v20, %v9087_v29  ;;  %v1641_v29 = vld [vmem:[#allocation2 + $0xac] sm:$0xf] }
 0x19a   : > { %2279 = vrot.lane.b32.xlu0 %v2245_v50, %s7646_s21  ;;  %v9078_v23 = vpop.permute.xlu1 %2265  ;;  %v3453_v51 = vsel %vm3443_vm0, %v3420_v49, %v2776_v7  ;;  %v2611_v50 = vshll.u32 %v9103_v31, 16  ;;  %v9124_v49 = vcombine.low %v1767_v53, %v1768_v46  ;;  %v3123_v20 = vshll.u32 %v7484_v12, 16 }
 0x19b   : > { %v3108_v38 = vrot.slane %v3106_v14, 1  ;;  %v3356_v63 = vsel %vm3344_vm10, %v3323_v27, %v9078_v23  ;;  %v9136_v14 = vld [vmem:[#allocation2 + $0xb8] sm:$0xf] }
 0x19c   : > { %v2888_v10 = vpop.permute.xlu0 %2887  ;;  %3173 = vrot.lane.b32.xlu1 %v3102_v58, %s7652_s28  ;;  %v2604_v58 = vshrl.u32 %v6851_v33, 16  ;;  %v2613_v48 = vrot.slane %v2611_v50, 1 }
 0x19d   : > { %v3486_v18 = vsel %vm3476_vm4, %v3453_v51, %v2888_v10  ;;  %v3109_v10 = vor.u32 %v3108_v38, %v3104_v41  ;;  %v1642_v38 = vld [vmem:[#allocation2 + $0xb4] sm:$0xf] }
 0x19e   : > { %2391 = vrot.lane.b32.xlu0 %v6850_v19, %s7647_s22  ;;  %v2378_v0 = vpop.permute.xlu1 %2377  ;;  %v9097_v19 = vld [vmem:[#allocation2 + $0xb0] ss:$0 sps:$4 sm:$0x11]   ;;  %v2609_v44 = vor.u32 %v2608_v2, %v2604_v58  ;;  %v9155_v2 = vld [vmem:[#allocation2 + $0xbc] ss:$0 sps:$4 sm:$0x11]  }
 0x19f   : > { %v3111_v13 = vshll.u32 %v9097_v19, 16  ;;  %v3389_v25 = vsel %vm3377_vm11, %v3356_v63, %v2378_v0  ;;  %v3268_v35 = vrot.slane %v9097_v19, 1  ;;  %v2759_v0 = vrot.slane %v9103_v31, 1  ;;  %v7488_v31 = vld [vmem:[#allocation2 + $0xb0] ss:$0 sps:$4 sm:$0x11]  }
 0x1a0   : > { %v3160_v4 = vpop.permute.xlu0 %3159  ;;  %2150 = vrot.lane.b32.xlu1 %v2089_v42, %s7645_s20  ;;  %v1640_v42 = vld [vmem:[#allocation2 + $0xa8] sm:$0xf] }
 0x1a1   : > { %v3519_v37 = vsel %vm3509_vm5, %v3486_v18, %v3160_v4  ;;  %v3113_v9 = vrot.slane %v3111_v13, 1  ;;  %v3267_v4 = vrot.slane %v6930_v26, 1  ;;  %v2758_v18 = vrot.slane %v6883_v60, 1  ;;  %v9148_v13 = vld [vmem:[#allocation2 + $0xb8] sm:$0xf] }
 0x1a2   : > { %2663 = vrot.lane.b32.xlu0 %v2602_v56, %s7651_s26  ;;  %v2650_v28 = vpop.permute.xlu1 %2649  ;;  %v1704_v56 = vld [vmem:[#allocation2 + $0xb4] sm:$0xf]  ;;  %v9158_v26 = vcombine.low %v1642_v38, %v9148_v13  ;;  %v9167_v60 = vld [vmem:[#allocation2 + $0xbc] ss:$0 sps:$4 sm:$0x11]   ;;  %v2762_v38 = vrot.slane %v9155_v2, 1 }
 0x1a3   : > { %v3422_v5 = vsel %vm3410_vm13, %v3389_v25, %v2650_v28  ;;  %v3114_v23 = vsel %vm1933_vm2, %v3109_v10, %v3113_v9  ;;  %v3118_v28 = vshll.u32 %v9124_v49, 16  ;;  %v6852_v41 = vcombine.low %v1704_v56, %v9136_v14 }
 0x1a4   : > { %v3288_v3 = vpop.permute.xlu0 %3287  ;;  %2152 = vrot.lane.b32.xlu1 %v2101_v17, %s7645_s20  ;;  %v9143_v17 = vcombine.low %v1640_v42, %v1641_v29  ;;  %v2760_v58 = vsel %vm2206_vm3, %v2758_v18, %v2759_v0  ;;  %v2250_v10 = vrot.slane %v7488_v31, 1 }
 0x1a5   : > { %v3552_v7 = vsel %vm3542_vm6, %v3519_v37, %v3288_v3  ;;  %v2614_v37 = vsel %vm1933_vm2, %v2609_v44, %v2613_v48  ;;  %v3269_v3 = vsel %vm2206_vm3, %v3267_v4, %v3268_v35  ;;  %v3120_v50 = vrot.slane %v3118_v28, 1 }
 0x1a6   : > { %2791 = vrot.lane.b32.xlu0 %v2757_v30, %s7649_s24  ;;  %7266 = vmatprep.mubr.msk.bf16.mxu0 %vm3618_vm7, %v3552_v7  ;;  %v2778_v32 = vpop.permute.xlu1 %2777  ;;  %v6836_v7 = vcombine.low %v1674_v59, %v1641_v29  ;;  %v2618_v9 = vshll.u32 %v6852_v41, 16  ;;  %v2110_v48 = vshll.u32 %v7488_v31, 16  ;;  %v2103_v25 = vshrl.u32 %v9143_v17, 16  ;;  %v1769_v29 = vld [vmem:[#allocation2 + $0xc0] sm:$0xf] }
 0x1a7   : > { %v3455_v57 = vsel %vm3443_vm0, %v3422_v5, %v2778_v32  ;;  %v3116_v32 = vshrl.u32 %v9124_v49, 16  ;;  %v2623_v4 = vshll.u32 %v9155_v2, 16  ;;  %v2117_v35 = vshll.u32 %v9158_v26, 16  ;;  %v1738_v5 = vld [vmem:[#allocation2 + $0xb4] sm:$0xe] }
 0x1a8   : > { %v3290_v36 = vpop.permute.xlu0 %3289  ;;  %2281 = vrot.lane.b32.xlu1 %v2248_v52, %s7646_s21  ;;  %v2249_v53 = vrot.slane %v6836_v7, 1  ;;  %v2620_v42 = vrot.slane %v2618_v9, 1  ;;  %v9178_v59 = vld [vmem:[#allocation2 + $0xc4] sm:$0xf]  ;;  %v2112_v56 = vrot.slane %v2110_v48, 1  ;;  %v2253_v9 = vrot.slane %v9167_v60, 1 }
 0x1a9   : > { %v3121_v63 = vor.u32 %v3120_v50, %v3116_v32  ;;  %v2119_v28 = vrot.slane %v2117_v35, 1  ;;  %v6900_v31 = vcombine.low %v1769_v29, %v9178_v59 }
 0x1aa   : > { %2903 = vrot.lane.b32.xlu0 %v6898_v11, %s7648_s23  ;;  %v2890_v22 = vpop.permute.xlu1 %2889  ;;  %v6931_v11 = vcombine.low %v1802_v45, %v1768_v46 }
 0x1ab   : > { %v3488_v19 = vsel %vm3476_vm4, %v3455_v57, %v2890_v22  ;;  %v3125_v22 = vrot.slane %v3123_v20, 1 }
 0x1ac   : > { %v9127_v39 = vpop.permute.xlu0 %2267  ;;  %2393 = vrot.lane.b32.xlu1 %v6851_v33, %s7647_s22  ;;  %v3271_v33 = vrot.slane %v7484_v12, 1  ;;  %v3270_v54 = vrot.slane %v6931_v11, 1  ;;  %v2616_v11 = vshrl.u32 %v6852_v41, 16 }
 0x1ad   : > { %v3126_v0 = vsel %vm1933_vm2, %v3121_v63, %v3125_v22 }
 0x1ae   : > { %3175 = vrot.lane.b32.xlu0 %v3114_v23, %s7652_s28  ;;  %v3162_v51 = vpop.permute.xlu1 %3161  ;;  %v3272_v46 = vsel %vm2206_vm3, %v3270_v54, %v3271_v33  ;;  %v2251_v23 = vsel %vm2206_vm3, %v2249_v53, %v2250_v10  ;;  %v2115_v33 = vshrl.u32 %v9158_v26, 16  ;;  %v9189_v54 = vld [vmem:[#allocation2 + $0xc4] sm:$0xf] }
 0x1af   : > { %v3521_v40 = vsel %vm3509_vm5, %v3488_v19, %v3162_v51  ;;  %v2122_v19 = vshll.u32 %v9167_v60, 16  ;;  %v1771_v60 = vld [vmem:[#allocation2 + $0xcc] sm:$0xf] }
 0x1b0   : > { %v2380_v47 = vpop.permute.xlu0 %2379  ;;  %2665 = vrot.lane.b32.xlu1 %v2614_v37, %s7651_s26  ;;  %v3554_v30 = vsel %vm3542_vm6, %v3521_v40, %v3290_v36  ;;  %v2105_v36 = vshll.u32 %v9143_v17, 16  ;;  %v1675_v40 = vld [vmem:[#allocation2 + $0xb4] sm:$0xe]  ;;  %v2621_v37 = vor.u32 %v2620_v42, %v2616_v11  ;;  %v2120_v20 = vor.u32 %v2119_v28, %v2115_v33 }
 0x1b1   : > { %7267 = vmatmul.mubr.msk.bf16.gmra.mxu0 %vm3618_vm7, %v3554_v30  ;;  %v1706_v30 = vld [vmem:[#allocation2 + $0xc0] sm:$0xf]  ;;  %v2124_v7 = vrot.slane %v2122_v19, 1 }
 0x1b2   : > { %3303 = vrot.lane.b32.xlu0 %v3269_v3, %s7650_s25  ;;  %v2139_v55 = vpop.permute.xlu1 %2138  ;;  %v2107_v44 = vrot.slane %v2105_v36, 1  ;;  %v2625_v3 = vrot.slane %v2623_v4, 1  ;;  %v6853_v36 = vcombine.low %v1706_v30, %v9189_v54  ;;  %v3128_v4 = vshrl.u32 %v6900_v31, 16 }
 0x1b3   : > { %v3325_v27 = vsel %vm3311_vm9, %v8733_v62, %v2139_v55  ;;  %v6837_v55 = vcombine.low %v1675_v40, %v9148_v13  ;;  %v2125_v48 = vsel %vm1933_vm2, %v2120_v20, %v2124_v7 }
 0x1b4   : > { %v2652_v52 = vpop.permute.xlu0 %2651  ;;  %2793 = vrot.lane.b32.xlu1 %v2760_v58, %s7649_s24  ;;  %v3358_v62 = vsel %vm3344_vm10, %v3325_v27, %v9127_v39  ;;  %v6884_v39 = vcombine.low %v1738_v5, %v9136_v14  ;;  %v2108_v18 = vor.u32 %v2107_v44, %v2103_v25  ;;  %v9205_v27 = vld [vmem:[#allocation2 + $0xc8] ss:$0 sps:$4 sm:$0x11]   ;;  %v2630_v44 = vshll.u32 %v6853_v36, 16 }
 0x1b5   : > { %v2252_v10 = vrot.slane %v6837_v55, 1  ;;  %v2635_v42 = vshll.u32 %v9205_v27, 16  ;;  %v2765_v20 = vrot.slane %v9205_v27, 1 }
 0x1b6   : > { %3305 = vrot.lane.b32.xlu0 %v3272_v46, %s7650_s25  ;;  %v9165_v45 = vpop.permute.xlu1 %2140  ;;  %v2113_v50 = vsel %vm1933_vm2, %v2108_v18, %v2112_v56  ;;  %v2761_v58 = vrot.slane %v6884_v39, 1  ;;  %v2626_v46 = vsel %vm1933_vm2, %v2621_v37, %v2625_v3  ;;  %v2628_v56 = vshrl.u32 %v6853_v36, 16 }
 0x1b7   : > { %v2632_v19 = vrot.slane %v2630_v44, 1  ;;  %v3327_v28 = vsel %vm3311_vm9, %v8755_v34, %v9165_v45  ;;  %v2637_v3 = vrot.slane %v2635_v42, 1  ;;  %v7503_v45 = vld [vmem:[#allocation2 + $0xd4] ss:$0 sps:$4 sm:$0x11]  }
 0x1b8   : > { %v2780_v12 = vpop.permute.xlu0 %2779  ;;  %2905 = vrot.lane.b32.xlu1 %v9124_v49, %s7648_s23  ;;  %v3391_v49 = vsel %vm3377_vm11, %v3358_v62, %v2380_v47  ;;  %v2763_v25 = vsel %vm2206_vm3, %v2761_v58, %v2762_v38  ;;  %v1803_v62 = vld [vmem:[#allocation2 + $0xc0] sm:$0xe]  ;;  %v4377_v58 = vld [vmem:[#allocation3] sm:$0xf]  ;;  %v3147_v27 = vshll.u32 %v7503_v45, 16 }
 0x1b9   : > { %v3424_v14 = vsel %vm3410_vm13, %v3391_v49, %v2652_v52  ;;  %v3130_v52 = vshll.u32 %v6900_v31, 16  ;;  %v6932_v39 = vcombine.low %v1803_v62, %v9178_v59  ;;  %v1739_v49 = vld [vmem:[#allocation2 + $0xc0] sm:$0xe]  ;;  %v2633_v7 = vor.u32 %v2632_v19, %v2628_v56 }
 0x1ba   : > { %2283 = vrot.lane.b32.xlu0 %v2251_v23, %s7646_s21  ;;  %v9180_v57 = vpop.permute.xlu1 %2269  ;;  %v3457_v53 = vsel %vm3443_vm0, %v3424_v14, %v2780_v12  ;;  %v9215_v23 = vld [vmem:[#allocation2 + $0xd0] sm:$0xf]  ;;  %v6885_v59 = vcombine.low %v1739_v49, %v9189_v54 }
 0x1bb   : > { %v3132_v35 = vrot.slane %v3130_v52, 1  ;;  %v6901_v33 = vcombine.low %v1771_v60, %v9215_v23  ;;  %v3360_v40 = vsel %vm3344_vm10, %v3327_v28, %v9180_v57  ;;  %v3273_v38 = vrot.slane %v6932_v39, 1 }
 0x1bc   : > { %v2892_v51 = vpop.permute.xlu0 %2891  ;;  %3177 = vrot.lane.b32.xlu1 %v3126_v0, %s7652_s28  ;;  %v2254_v0 = vsel %vm2206_vm3, %v2252_v10, %v2253_v9  ;;  %v4425_v10 = vld [vmem:[#allocation3] sm:$0xe] }
 0x1bd   : > { %v3490_v13 = vsel %vm3476_vm4, %v3457_v53, %v2892_v51  ;;  %v3133_v51 = vor.u32 %v3132_v35, %v3128_v4 }
 0x1be   : > { %2395 = vrot.lane.b32.xlu0 %v6852_v41, %s7647_s22  ;;  %v2382_v47 = vpop.permute.xlu1 %2381  ;;  %v9199_v41 = vld [vmem:[#allocation2 + $0xc8] ss:$0 sps:$4 sm:$0x11]  }
 0x1bf   : > { %v3135_v5 = vshll.u32 %v9199_v41, 16  ;;  %v3393_v30 = vsel %vm3377_vm11, %v3360_v40, %v2382_v47  ;;  %v3274_v55 = vrot.slane %v9199_v41, 1 }
 0x1c0   : > { %v3164_v32 = vpop.permute.xlu0 %3163  ;;  %2154 = vrot.lane.b32.xlu1 %v2113_v50, %s7645_s20  ;;  %v2764_v50 = vrot.slane %v6885_v59, 1 }
 0x1c1   : > { %v3523_v63 = vsel %vm3509_vm5, %v3490_v13, %v3164_v32  ;;  %v3137_v18 = vrot.slane %v3135_v5, 1  ;;  %v3275_v53 = vsel %vm2206_vm3, %v3273_v38, %v3274_v55 }
 0x1c2   : > { %2667 = vrot.lane.b32.xlu0 %v2626_v46, %s7651_s26  ;;  %v2654_v2 = vpop.permute.xlu1 %2653  ;;  %v4378_v46 = vld [vmem:[#allocation3 + $0x4] sm:$0xf]  ;;  %v2766_v62 = vsel %vm2206_vm3, %v2764_v50, %v2765_v20 }
 0x1c3   : > { %v3426_v32 = vsel %vm3410_vm13, %v3393_v30, %v2654_v2  ;;  %v3138_v34 = vsel %vm1933_vm2, %v3133_v51, %v3137_v18  ;;  %v9241_v13 = vcombine.low %v4377_v58, %v4378_v46  ;;  %v7506_v2 = vld [vmem:[#allocation3 + $0x8] ss:$0 sps:$4 sm:$0x11]   ;;  %v7020_v4 = vcombine.low %v4425_v10, %v4378_v46 }
 0x1c4   : > { %v3292_v22 = vpop.permute.xlu0 %3291  ;;  %2156 = vrot.lane.b32.xlu1 %v2125_v48, %s7645_s20  ;;  %v1804_v48 = vld [vmem:[#allocation2 + $0xcc] sm:$0xe]  ;;  %v4971_v49 = vrot.slane %v7506_v2, 1 }
 0x1c5   : > { %v3556_v12 = vsel %vm3542_vm6, %v3523_v63, %v3292_v22  ;;  %v3140_v63 = vshrl.u32 %v6901_v33, 16  ;;  %v4701_v44 = vshll.u32 %v9241_v13, 16  ;;  %v4970_v39 = vrot.slane %v7020_v4, 1 }
 0x1c6   : > { %2795 = vrot.lane.b32.xlu0 %v2763_v25, %s7649_s24  ;;  %7270 = vmatprep.mubr.msk.bf16.mxu0 %vm3618_vm7, %v3556_v12  ;;  %v2782_v11 = vpop.permute.xlu1 %2781  ;;  %v4699_v25 = vshrl.u32 %v9241_v13, 16  ;;  %v4706_v12 = vshll.u32 %v7506_v2, 16 }
 0x1c7   : > { %v3459_v57 = vsel %vm3443_vm0, %v3426_v32, %v2782_v11  ;;  %v4703_v60 = vrot.slane %v4701_v44, 1  ;;  %v4972_v59 = vsel %vm2206_vm3, %v4970_v39, %v4971_v49 }
 0x1c8   : > { %v3294_v29 = vpop.permute.xlu0 %3293  ;;  %2285 = vrot.lane.b32.xlu1 %v2254_v0, %s7646_s21  ;;  %v4708_v11 = vrot.slane %v4706_v12, 1  ;;  %v6933_v0 = vcombine.low %v1804_v48, %v9215_v23  ;;  %v3277_v23 = vrot.slane %v7503_v45, 1 }
 0x1c9   : > { %v4704_v19 = vor.u32 %v4703_v60, %v4699_v25 }
 0x1ca   : > { %2907 = vrot.lane.b32.xlu0 %v6900_v31, %s7648_s23  ;;  %v2894_v37 = vpop.permute.xlu1 %2893  ;;  %v3142_v31 = vshll.u32 %v6901_v33, 16 }
 0x1cb   : > { %v3492_v54 = vsel %vm3476_vm4, %v3459_v57, %v2894_v37  ;;  %v4709_v28 = vsel %vm1933_vm2, %v4704_v19, %v4708_v11 }
 0x1cc   : > { %v2272_v14 = vpop.permute.xlu0 %2271  ;;  %2397 = vrot.lane.b32.xlu1 %v6853_v36, %s7647_s22  ;;  %v2638_v36 = vsel %vm1933_vm2, %v2633_v7, %v2637_v3  ;;  %v3144_v22 = vrot.slane %v3142_v31, 1  ;;  %v3276_v3 = vrot.slane %v6933_v0, 1 }
 0x1ce   : > { %3179 = vrot.lane.b32.xlu0 %v3138_v34, %s7652_s28  ;;  %v3166_v47 = vpop.permute.xlu1 %3165  ;;  %v3145_v42 = vor.u32 %v3144_v22, %v3140_v63 }
 0x1cf   : > { %v3525_v41 = vsel %vm3509_vm5, %v3492_v54, %v3166_v47 }
 0x1d0   : > { %v2384_v52 = vpop.permute.xlu0 %2383  ;;  %2669 = vrot.lane.b32.xlu1 %v2638_v36, %s7651_s26  ;;  %v3558_v9 = vsel %vm3542_vm6, %v3525_v41, %v3294_v29  ;;  %v3149_v29 = vrot.slane %v3147_v27, 1 }
 0x1d1   : > { %7271 = vmatmul.mubr.msk.bf16.gmra.mxu0 %vm3618_vm7, %v3558_v9 }
 0x1d2   : > { %3307 = vrot.lane.b32.xlu0 %v3275_v53, %s7650_s25  ;;  %v2143_v35 = vpop.permute.xlu1 %2142  ;;  %v3150_v37 = vsel %vm1933_vm2, %v3145_v42, %v3149_v29 }
 0x1d3   : > { %v3329_v56 = vsel %vm3311_vm9, %v8808_v61, %v2143_v35 }
 0x1d4   : > { %v2656_v5 = vpop.permute.xlu0 %2655  ;;  %2797 = vrot.lane.b32.xlu1 %v2766_v62, %s7649_s24  ;;  %v3362_v40 = vsel %vm3344_vm10, %v3329_v56, %v2272_v14  ;;  %v3278_v14 = vsel %vm2206_vm3, %v3276_v3, %v3277_v23  ;;  %s7653_s24 = smov 12  }
 0x1d5   : > { %v3395_v30 = vsel %vm3377_vm11, %v3362_v40, %v2384_v52 }
 0x1d6   : > { %v2145_v51 = vpop.permute.xlu1 %2144  ;;  %4890 = vrot.lane.b32.xlu0 %v4709_v28, %s7644_s19 }
 0x1d7   : > { %v3331_v20 = vsel %vm3311_vm9, %v8821_v1, %v2145_v51 }
 0x1d8   : > { %v2784_v18 = vpop.permute.xlu0 %2783  ;;  %2909 = vrot.lane.b32.xlu1 %v6901_v33, %s7648_s23  ;;  %v3428_v33 = vsel %vm3410_vm13, %v3395_v30, %v2656_v5 }
 0x1d9   : > { %v3461_v32 = vsel %vm3443_vm0, %v3428_v33, %v2784_v18 }
 0x1da   : > { %v2274_v61 = vpop.permute.xlu1 %2273  ;;  %5018 = vrot.lane.b32.xlu0 %v4972_v59, %s7645_s20 }
 0x1db   : > { %v3364_v58 = vsel %vm3344_vm10, %v3331_v20, %v2274_v61 }
 0x1dc   : > { %v2896_v7 = vpop.permute.xlu0 %2895  ;;  %3181 = vrot.lane.b32.xlu1 %v3150_v37, %s7652_s28  ;;  %s7655_s28 = smov 28  }
 0x1dd   : > { %v3494_v34 = vsel %vm3476_vm4, %v3461_v32, %v2896_v7 }
 0x1de   : > { %v2386_v38 = vpop.permute.xlu1 %2385 }
 0x1df   : > { %v3397_v41 = vsel %vm3377_vm11, %v3364_v58, %v2386_v38 }
 0x1e0   : > { %v3168_v55 = vpop.permute.xlu0 %3167  ;;  %3309 = vrot.lane.b32.xlu1 %v3278_v14, %s7650_s25  ;;  %s7654_s25 = smov 20  }
 0x1e1   : > { %v3527_v31 = vsel %vm3509_vm5, %v3494_v34, %v3168_v55 }
 0x1e2   : > { %v2658_v45 = vpop.permute.xlu1 %2657 }
 0x1e3   : > { %v3430_v36 = vsel %vm3410_vm13, %v3397_v41, %v2658_v45 }
 0x1e4   : > { %v3296_v57 = vpop.permute.xlu0 %3295 }
 0x1e5   : > { %v3560_v54 = vsel %vm3542_vm6, %v3527_v31, %v3296_v57 }
 0x1e6   : > { %7274 = vmatprep.mubr.msk.bf16.mxu0 %vm3618_vm7, %v3560_v54  ;;  %v2786_v47 = vpop.permute.xlu1 %2785 }
 0x1e7   : > { %v3463_v53 = vsel %vm3443_vm0, %v3430_v36, %v2786_v47 }
 0x1e8   : > { %v3298_v50 = vpop.permute.xlu0 %3297 }
 0x1ea   : > { %v2898_v46 = vpop.permute.xlu1 %2897 }
 0x1eb   : > { %v3496_v2 = vsel %vm3476_vm4, %v3463_v53, %v2898_v46 }
 0x1ec   : > { %v2276_v52 = vpop.permute.xlu0 %2275 }
 0x1ee   : > { %v3170_v10 = vpop.permute.xlu1 %3169 }
 0x1ef   : > { %v3529_v9 = vsel %vm3509_vm5, %v3496_v2, %v3170_v10 }
 0x1f0   : > { %v2388_v63 = vpop.permute.xlu0 %2387  ;;  %v3562_v22 = vsel %vm3542_vm6, %v3529_v9, %v3298_v50 }
 0x1f1   : > { %7275 = vmatmul.mubr.msk.bf16.gmra.mxu0 %vm3618_vm7, %v3562_v22 }
 0x1f2   : > { %v2147_v1 = vpop.permute.xlu1 %2146 }
 0x1f3   : > { %v3333_v48 = vsel %vm3311_vm9, %v8917_v21, %v2147_v1 }
 0x1f4   : > { %v2660_v27 = vpop.permute.xlu0 %2659  ;;  %v3366_v12 = vsel %vm3344_vm10, %v3333_v48, %v2276_v52 }
 0x1f5   : > { %v3399_v35 = vsel %vm3377_vm11, %v3366_v12, %v2388_v63 }
 0x1f6   : > { %v2149_v25 = vpop.permute.xlu1 %2148  ;;  %v3432_v62 = vsel %vm3410_vm13, %v3399_v35, %v2660_v27 }
 0x1f7   : > { %v3335_v51 = vsel %vm3311_vm9, %v8946_v8, %v2149_v25 }
 0x1f8   : > { %v2788_v44 = vpop.permute.xlu0 %2787 }
 0x1f9   : > { %v3465_v42 = vsel %vm3443_vm0, %v3432_v62, %v2788_v44 }
 0x1fa   : > { %v2278_v4 = vpop.permute.xlu1 %2277 }
 0x1fb   : > { %v3368_v18 = vsel %vm3344_vm10, %v3335_v51, %v2278_v4 }
 0x1fc   : > { %v2900_v5 = vpop.permute.xlu0 %2899 }
 0x1fd   : > { %v3498_v29 = vsel %vm3476_vm4, %v3465_v42, %v2900_v5  ;;  %v9329_v42 = vld [vmem:[%s10590_s3] ss:$0 sm:$0xff] }
 0x1fe   : > { %v2390_v60 = vpop.permute.xlu1 %2389 }
 0x1ff   : > { %v3401_v40 = vsel %vm3377_vm11, %v3368_v18, %v2390_v60 }
 0x200   : > { %v3172_v11 = vpop.permute.xlu0 %3171 }
 0x201   : > { %v3531_v56 = vsel %vm3509_vm5, %v3498_v29, %v3172_v11 }
 0x202   : > { %v2662_v0 = vpop.permute.xlu1 %2661 }
 0x203   : > { %v3434_v3 = vsel %vm3410_vm13, %v3401_v40, %v2662_v0 }
 0x204   : > { %v3300_v21 = vpop.permute.xlu0 %3299 }
 0x205   : > { %v3564_v19 = vsel %vm3542_vm6, %v3531_v56, %v3300_v21 }
 0x206   : > { %7278 = vmatprep.mubr.msk.bf16.mxu0 %vm3618_vm7, %v3564_v19  ;;  %v2790_v39 = vpop.permute.xlu1 %2789 }
 0x207   : > { %v3467_v23 = vsel %vm3443_vm0, %v3434_v3, %v2790_v39 }
 0x208   : > { %v3302_v49 = vpop.permute.xlu0 %3301 }
 0x20a   : > { %v2902_v28 = vpop.permute.xlu1 %2901 }
 0x20b   : > { %v3500_v59 = vsel %vm3476_vm4, %v3467_v23, %v2902_v28 }
 0x20c   : > { %v2280_v37 = vpop.permute.xlu0 %2279 }
 0x20e   : > { %v3174_v61 = vpop.permute.xlu1 %3173 }
 0x20f   : > { %v3533_v30 = vsel %vm3509_vm5, %v3500_v59, %v3174_v61 }
 0x210   : > { %v2392_v7 = vpop.permute.xlu0 %2391  ;;  %v3566_v14 = vsel %vm3542_vm6, %v3533_v30, %v3302_v49 }
 0x211   : > { %7279 = vmatmul.mubr.msk.bf16.gmra.mxu0 %vm3618_vm7, %v3566_v14 }
 0x212   : > { %v2151_v8 = vpop.permute.xlu1 %2150 }
 0x213   : > { %v3337_v38 = vsel %vm3311_vm9, %v9041_v24, %v2151_v8 }
 0x214   : > { %v2664_v33 = vpop.permute.xlu0 %2663  ;;  %v3370_v34 = vsel %vm3344_vm10, %v3337_v38, %v2280_v37 }
 0x215   : > { %v3403_v31 = vsel %vm3377_vm11, %v3370_v34, %v2392_v7 }
 0x216   : > { %v2153_v55 = vpop.permute.xlu1 %2152  ;;  %v3436_v54 = vsel %vm3410_vm13, %v3403_v31, %v2664_v33  ;;  %v4272_v31 = vld [vmem:[#allocation3 + $0x18] sm:$0xf] }
 0x217   : > { %v3339_v2 = vsel %vm3311_vm9, %v9056_v16, %v2153_v55 }
 0x218   : > { %v2792_v32 = vpop.permute.xlu0 %2791 }
 0x219   : > { %v3469_v20 = vsel %vm3443_vm0, %v3436_v54, %v2792_v32 }
 0x21a   : > { %v2282_v45 = vpop.permute.xlu1 %2281 }
 0x21b   : > { %v3372_v10 = vsel %vm3344_vm10, %v3339_v2, %v2282_v45 }
 0x21c   : > { %v2904_v57 = vpop.permute.xlu0 %2903 }
 0x21d   : > { %v3502_v58 = vsel %vm3476_vm4, %v3469_v20, %v2904_v57 }
 0x21e   : > { %v2394_v47 = vpop.permute.xlu1 %2393 }
 0x21f   : > { %v3405_v63 = vsel %vm3377_vm11, %v3372_v10, %v2394_v47 }
 0x220   : > { %v3176_v50 = vpop.permute.xlu0 %3175 }
 0x221   : > { %v3535_v41 = vsel %vm3509_vm5, %v3502_v58, %v3176_v50 }
 0x222   : > { %v2666_v46 = vpop.permute.xlu1 %2665 }
 0x223   : > { %v3438_v1 = vsel %vm3410_vm13, %v3405_v63, %v2666_v46  ;;  %v4276_v63 = vld [vmem:[#allocation3 + $0x20] sm:$0x1] }
 0x224   : > { %v3304_v24 = vpop.permute.xlu0 %3303 }
 0x225   : > { %v3568_v52 = vsel %vm3542_vm6, %v3535_v41, %v3304_v24  ;;  %v4265_v41 = vld [vmem:[#allocation3 + $0xc] sm:$0xf] }
 0x226   : > { %7282 = vmatprep.mubr.msk.bf16.mxu0 %vm3618_vm7, %v3568_v52  ;;  %v2794_v36 = vpop.permute.xlu1 %2793 }
 0x227   : > { %v3471_v27 = vsel %vm3443_vm0, %v3438_v1, %v2794_v36 }
 0x228   : > { %v3306_v53 = vpop.permute.xlu0 %3305 }
 0x22a   : > { %v2906_v9 = vpop.permute.xlu1 %2905 }
 0x22b   : > { %v3504_v48 = vsel %vm3476_vm4, %v3471_v27, %v2906_v9 }
 0x22c   : > { %v2284_v22 = vpop.permute.xlu0 %2283 }
 0x22e   : > { %v3178_v25 = vpop.permute.xlu1 %3177 }
 0x22f   : > { %v3537_v44 = vsel %vm3509_vm5, %v3504_v48, %v3178_v25 }
 0x230   : > { %v2396_v12 = vpop.permute.xlu0 %2395  ;;  %v3570_v4 = vsel %vm3542_vm6, %v3537_v44, %v3306_v53 }
 0x231   : > { %7283 = vmatmul.mubr.msk.bf16.gmra.mxu0 %vm3618_vm7, %v3570_v4 }
 0x232   : > { %v2155_v16 = vpop.permute.xlu1 %2154 }
 0x233   : > { %v3341_v5 = vsel %vm3311_vm9, %v9143_v17, %v2155_v16 }
 0x234   : > { %v2668_v35 = vpop.permute.xlu0 %2667  ;;  %v3374_v60 = vsel %vm3344_vm10, %v3341_v5, %v2284_v22 }
 0x235   : > { %v3407_v0 = vsel %vm3377_vm11, %v3374_v60, %v2396_v12 }
 0x236   : > { %v9323_v62 = vpop.permute.xlu1 %2156  ;;  %v3440_v51 = vsel %vm3410_vm13, %v3407_v0, %v2668_v35  ;;  %v4269_v35 = vld [vmem:[#allocation3 + $0x14] sm:$0x1] }
 0x237   : > { %v3343_v0 = vsel %vm3311_vm9, %v9158_v26, %v9323_v62 }
 0x238   : > { %v2796_v11 = vpop.permute.xlu0 %2795 }
 0x239   : > { %v7260_v29 = vpop.f32.mrf.mxu0  ;;  %v3473_v61 = vsel %vm3443_vm0, %v3440_v51, %v2796_v11 }
 0x23a   : > { %v3698_v56 = vadd.f32 %v7260_v29, %v9329_v42  ;;  %v2286_v21 = vpop.permute.xlu1 %2285 }
 0x23b   : > { %v3689_v39 = vpop.f32.mrf.mxu0 }
 0x23c   : > { %v2908_v19 = vpop.permute.xlu0 %2907  ;;  %v3818_v49 = vmax.f32 %v3698_v56, 0.0  ;;  %v3690_v17 = vadd.f32 %v9329_v42, %v3689_v39  ;;  %v3376_v56 = vsel %vm3344_vm10, %v3343_v0, %v2286_v21 }
 0x23d   : > { %v7261_v18 = vpop.f32.mrf.mxu0  ;;  %v3506_v8 = vsel %vm3476_vm4, %v3473_v61, %v2908_v19 }
 0x23e   : > { %v7160_v28 = vpack.c.bf16 %v3818_v49, %v3818_v49  ;;  %v3816_v40 = vmax.f32 %v3690_v17, 0.0  ;;  %v3701_v37 = vadd.f32 %v7261_v18, %v9329_v42  ;;  %v2398_v3 = vpop.permute.xlu1 %2397 }
 0x23f   : > { %v3692_v59 = vpop.f32.mrf.mxu0  ;;  %v3409_v49 = vsel %vm3377_vm11, %v3376_v56, %v2398_v3 }
 0x240   : > { %v3180_v23 = vpop.permute.xlu0 %3179  ;;  %v3962_v30 = vshrl.u32 %v7160_v28, 16  ;;  %v7158_v7 = vpack.c.bf16 %v3816_v40, %v3816_v40  ;;  %v3819_v14 = vmax.f32 %v3701_v37, 0.0  ;;  %v3693_v33 = vadd.f32 %v9329_v42, %v3692_v59 }
 0x241   : > { %v3965_v55 = vshll.u32 %v7160_v28, 16  ;;  %v3539_v57 = vsel %vm3509_vm5, %v3506_v8, %v3180_v23 }
 0x242   : > { %v3964_v38 = vrot.slane %v3962_v30, 7  ;;  %v3945_v32 = vshrl.u32 %v7158_v7, 16  ;;  %v7161_v34 = vpack.c.bf16 %v3819_v14, %v3819_v14  ;;  %v2670_v45 = vpop.permute.xlu1 %2669  ;;  %v3817_v54 = vmax.f32 %v3693_v33, 0.0 }
 0x243   : > { %v3948_v58 = vshll.u32 %v7158_v7, 16  ;;  %v3442_v51 = vsel %vm3410_vm13, %v3409_v49, %v2670_v45 }
 0x244   : > { %v3308_v47 = vpop.permute.xlu0 %3307  ;;  %v3967_v50 = vor.u32 %v3965_v55, %v3964_v38  ;;  %v3947_v20 = vrot.slane %v3945_v32, 7  ;;  %v3970_v46 = vshrl.u32 %v7161_v34, 16  ;;  %v7159_v24 = vpack.c.bf16 %v3817_v54, %v3817_v54 }
 0x245   : > { %v3572_v52 = vsel %vm3542_vm6, %v3539_v57, %v3308_v47  ;;  %v3973_v10 = vshll.u32 %v7161_v34, 16  ;;  %v3968_v1 = vrot.slane %v3964_v38, 4 }
 0x246   : > { %v4273_v36 = vsel %vm8082_vm1, %v3967_v50, %v4272_v31  ;;  %v3950_v53 = vor.u32 %v3948_v58, %v3947_v20  ;;  %v3972_v2 = vrot.slane %v3970_v46, 7  ;;  %7286 = vmatprep.mubr.msk.bf16.mxu0 %vm3618_vm7, %v3572_v52  ;;  %v2798_v9 = vpop.permute.xlu1 %2797  ;;  %v3953_v22 = vshrl.u32 %v7159_v24, 16 }
 0x247   : > { %4274 = vst [vmem:[#allocation3 + $0x18] sm:$0xf] %v4273_v36  ;;  %v3956_v12 = vshll.u32 %v7159_v24, 16  ;;  %v3951_v60 = vrot.slane %v3947_v20, 4  ;;  %v3475_v18 = vsel %vm3443_vm0, %v3442_v51, %v2798_v9  ;;  %vm6074_vm0 = vcmask 31744  }
 0x248   : > { %v4266_v27 = vsel %vm8082_vm1, %v3950_v53, %v4265_v41  ;;  %v3975_v48 = vor.u32 %v3973_v10, %v3972_v2  ;;  %v3977_v25 = vrot.slane %v3972_v2, 4  ;;  %v3955_v44 = vrot.slane %v3953_v22, 7 }
 0x249   : > { %4267 = vst [vmem:[#allocation3 + $0xc] sm:$0xf] %v4266_v27 }
 0x24a   : > { %v3976_v4 = vsel %vm7904_vm12, %v3968_v1, %v3975_v48  ;;  %v4277_v16 = vsel %vm8068_vm14, %v3977_v25, %v4276_v63  ;;  %v2910_v5 = vpop.permute.xlu1 %2909  ;;  %v3958_v11 = vor.u32 %v3956_v12, %v3955_v44  ;;  %v3960_v29 = vrot.slane %v3955_v44, 4 }
 0x24b   : > { %4275 = vst.msk [vmem:[#allocation3 + $0x1c] sm:$0xf] %vm929_vm15, %v3976_v4  ;;  %4278 = vst [vmem:[#allocation3 + $0x20] sm:$0x1] %v4277_v16  ;;  %v3508_v26 = vsel %vm3476_vm4, %v3475_v18, %v2910_v5  ;;  %vm6139_vm4 = vcmask 97280  }
 0x24c   : > { %v3959_v19 = vsel %vm7904_vm12, %v3951_v60, %v3958_v11  ;;  %v4270_v39 = vsel %vm8068_vm14, %v3960_v29, %v4269_v35 }
 0x24d   : > { %4268 = vst.msk [vmem:[#allocation3 + $0x10] sm:$0xf] %vm929_vm15, %v3959_v19  ;;  %4271 = vst [vmem:[#allocation3 + $0x14] sm:$0x1] %v4270_v39 }
 0x24e   : > { %v3182_v17 = vpop.permute.xlu1 %3181  ;;  %v4506_v28 = vld [vmem:[#allocation3 + $0x18] sm:$0xf] }
 0x24f   : > { %v4443_v21 = vld [vmem:[#allocation3 + $0x18] sm:$0xf]  ;;  %v3541_v23 = vsel %vm3509_vm5, %v3508_v26, %v3182_v17  ;;  %v4286_v17 = vld [vmem:[#allocation3 + $0x30] sm:$0xf]  ;;  %vm6204_vm5 = vcmask 162816  }
 0x250   : > { %v4490_v40 = vld [vmem:[#allocation3 + $0x18] sm:$0xe]  ;;  %v4441_v57 = vld [vmem:[#allocation3 + $0xc] sm:$0xf] }
 0x251   : > { %v7264_v62 = vpop.f32.mrf.mxu0  ;;  %v4554_v37 = vld [vmem:[#allocation3 + $0x18] sm:$0xe]  ;;  %v4379_v24 = vld [vmem:[#allocation3 + $0xc] sm:$0xf] }
 0x252   : > { %v3714_v59 = vadd.f32 %v7264_v62, %v9329_v42  ;;  %v3310_v3 = vpop.permute.xlu1 %3309  ;;  %v4507_v61 = vld [vmem:[#allocation3 + $0x1c] sm:$0xf]  ;;  %v4381_v7 = vld [vmem:[#allocation3 + $0x18] sm:$0xf]  ;;  %v4426_v9 = vld [vmem:[#allocation3 + $0xc] sm:$0xe] }
 0x253   : > { %v4444_v30 = vld [vmem:[#allocation3 + $0x1c] sm:$0xf]  ;;  %v3574_v14 = vsel %vm3542_vm6, %v3541_v23, %v3310_v3  ;;  %v3705_v8 = vpop.f32.mrf.mxu0  ;;  %v9367_v33 = vcombine.low %v4506_v28, %v4507_v61  ;;  %v9371_v55 = vld [vmem:[#allocation3 + $0x20] ss:$0 sps:$4 sm:$0x11]   ;;  %v7116_v47 = vcombine.low %v4554_v37, %v4507_v61  ;;  %vm6269_vm6 = vcmask 228352  }
 0x254   : > { %v9369_v38 = vcombine.low %v4443_v21, %v4444_v30  ;;  %v7069_v32 = vcombine.low %v4490_v40, %v4444_v30  ;;  %v4427_v34 = vld [vmem:[#allocation3 + $0x18] sm:$0xe]  ;;  %v3822_v45 = vmax.f32 %v3714_v59, 0.0  ;;  %v3706_v31 = vadd.f32 %v9329_v42, %v3705_v8  ;;  %7287 = vmatmul.mubr.msk.bf16.gmra.mxu0 %vm3618_vm7, %v3574_v14  ;;  %v9375_v54 = vld [vmem:[#allocation3 + $0x20] ss:$0 sps:$4 sm:$0x11]  }
 0x255   : > { %v4382_v50 = vld [vmem:[#allocation3 + $0x1c] sm:$0xf]  ;;  %5642 = vrot.lane.b32.xlu0 %v9367_v33, %s7647_s22  ;;  %v7265_v20 = vpop.f32.mrf.mxu0  ;;  %v9381_v58 = vld [vmem:[#allocation3 + $0x10] sm:$0xf]  ;;  %v5486_v41 = vrot.slane %v9371_v55, 1  ;;  %v5994_v25 = vrot.slane %v7116_v47, 1 }
 0x256   : > { %5132 = vrot.lane.b32.xlu1 %v9369_v38, %s7653_s24  ;;  %v5485_v46 = vrot.slane %v7069_v32, 1  ;;  %v4380_v52 = vld [vmem:[#allocation3 + $0x10] sm:$0xf]  ;;  %v9384_v36 = vcombine.low %v4381_v7, %v4382_v50  ;;  %v7164_v53 = vpack.c.bf16 %v3822_v45, %v3822_v45  ;;  %v3820_v2 = vmax.f32 %v3706_v31, 0.0  ;;  %v4279_v37 = vld [vmem:[#allocation3 + $0x24] sm:$0xf] }
 0x257   : > { %v3717_v10 = vadd.f32 %v7265_v20, %v9329_v42  ;;  %v9387_v63 = vld [vmem:[#allocation3 + $0x14] ss:$0 sps:$4 sm:$0x11]   ;;  %v7022_v22 = vcombine.low %v4427_v34, %v4382_v50  ;;  %v3708_v1 = vpop.f32.mrf.mxu0  ;;  %v9390_v27 = vcombine.low %v4441_v57, %v9381_v58  ;;  %v5995_v44 = vrot.slane %v9375_v54, 1  ;;  %v4290_v45 = vld [vmem:[#allocation3 + $0x38] sm:$0x1] }
 0x258   : > { %v5487_v48 = vsel %vm2206_vm3, %v5485_v46, %v5486_v41  ;;  %v3996_v12 = vshrl.u32 %v7164_v53, 16  ;;  %v7162_v4 = vpack.c.bf16 %v3820_v2, %v3820_v2  ;;  %v9394_v35 = vcombine.low %v4379_v24, %v4380_v52  ;;  %v9396_v5 = vld [vmem:[#allocation3 + $0x20] ss:$0 sps:$4 sm:$0x11]  }
 0x259   : > { %v3823_v16 = vmax.f32 %v3717_v10, 0.0  ;;  %v3999_v60 = vshll.u32 %v7164_v53, 16  ;;  %v3709_v11 = vadd.f32 %v9329_v42, %v3708_v1  ;;  %5130 = vrot.lane.b32.xlu0 %v9390_v27, %s7653_s24  ;;  %v7021_v29 = vcombine.low %v4426_v9, %v4380_v52  ;;  %v9407_v7 = vld [vmem:[#allocation3 + $0x14] ss:$0 sps:$4 sm:$0x11]  }
 0x25a   : > { %5532 = vrot.lane.b32.xlu1 %v5487_v48, %s7654_s25  ;;  %v4974_v0 = vrot.slane %v9387_v63, 1  ;;  %v3998_v56 = vrot.slane %v3996_v12, 7  ;;  %v3979_v19 = vshrl.u32 %v7162_v4, 16  ;;  %v5996_v49 = vsel %vm2206_vm3, %v5994_v25, %v5995_v44  ;;  %v4489_v52 = vld [vmem:[#allocation3 + $0xc] sm:$0xe] }
 0x25b   : > { %v7165_v39 = vpack.c.bf16 %v3823_v16, %v3823_v16  ;;  %v3821_v51 = vmax.f32 %v3709_v11, 0.0  ;;  %v4973_v18 = vrot.slane %v7021_v29, 1  ;;  %v4976_v28 = vrot.slane %v7022_v22, 1  ;;  %v4283_v48 = vld [vmem:[#allocation3 + $0x2c] sm:$0x1] }
 0x25c   : > { %v4977_v26 = vrot.slane %v9396_v5, 1  ;;  %v4001_v62 = vor.u32 %v3999_v60, %v3998_v56  ;;  %v3981_v21 = vrot.slane %v3979_v19, 7  ;;  %v3982_v40 = vshll.u32 %v7162_v4, 16 }
 0x25d   : > { %v4004_v23 = vshrl.u32 %v7165_v39, 16  ;;  %v4002_v59 = vrot.slane %v3998_v56, 4  ;;  %v4007_v3 = vshll.u32 %v7165_v39, 16  ;;  %v7163_v61 = vpack.c.bf16 %v3821_v51, %v3821_v51  ;;  %6042 = vrot.lane.b32.xlu0 %v5996_v49, %s7651_s26 }
 0x25e   : > { %v4975_v30 = vsel %vm2206_vm3, %v4973_v18, %v4974_v0  ;;  %v4287_v14 = vsel %vm8082_vm1, %v4001_v62, %v4286_v17  ;;  %v3984_v8 = vor.u32 %v3982_v40, %v3981_v21  ;;  %v4978_v34 = vsel %vm2206_vm3, %v4976_v28, %v4977_v26 }
 0x25f   : > { %v4006_v32 = vrot.slane %v4004_v23, 7  ;;  %5020 = vrot.lane.b32.xlu1 %v4975_v30, %s7645_s20  ;;  %4288 = vst [vmem:[#allocation3 + $0x30] sm:$0xf] %v4287_v14  ;;  %v3987_v31 = vshrl.u32 %v7163_v61, 16  ;;  %v3990_v57 = vshll.u32 %v7163_v61, 16  ;;  %v5223_v47 = vshrl.u32 %v9369_v38, 16 }
 0x260   : > { %v5225_v50 = vshll.u32 %v9369_v38, 16  ;;  %v4280_v20 = vsel %vm8082_vm1, %v3984_v8, %v4279_v37  ;;  %v5230_v24 = vshll.u32 %v9371_v55, 16  ;;  %v7068_v10 = vcombine.low %v4489_v52, %v9381_v58 }
 0x261   : > { %v4009_v46 = vor.u32 %v4007_v3, %v4006_v32  ;;  %v4011_v41 = vrot.slane %v4006_v32, 4  ;;  %4281 = vst [vmem:[#allocation3 + $0x24] sm:$0xf] %v4280_v20  ;;  %v3989_v53 = vrot.slane %v3987_v31, 7  ;;  %5022 = vrot.lane.b32.xlu0 %v4978_v34, %s7645_s20  ;;  %v5483_v9 = vrot.slane %v9407_v7, 1 }
 0x262   : > { %v5227_v2 = vrot.slane %v5225_v50, 1  ;;  %v3985_v22 = vrot.slane %v3981_v21, 4  ;;  %v5232_v25 = vrot.slane %v5230_v24, 1  ;;  %v5482_v4 = vrot.slane %v7068_v10, 1 }
 0x263   : > { %v4010_v38 = vsel %vm7904_vm12, %v4002_v59, %v4009_v46  ;;  %v4291_v1 = vsel %vm8068_vm14, %v4011_v41, %v4290_v45  ;;  %v3992_v55 = vor.u32 %v3990_v57, %v3989_v53  ;;  %v3994_v44 = vrot.slane %v3989_v53, 4 }
 0x264   : > { %4289 = vst.msk [vmem:[#allocation3 + $0x34] sm:$0xf] %vm929_vm15, %v4010_v38  ;;  %4292 = vst [vmem:[#allocation3 + $0x38] sm:$0x1] %v4291_v1  ;;  %v5228_v12 = vor.u32 %v5227_v2, %v5223_v47  ;;  %v4723_v58 = vshrl.u32 %v9384_v36, 16  ;;  %v4725_v16 = vshll.u32 %v9384_v36, 16  ;;  %v5484_v19 = vsel %vm2206_vm3, %v5482_v4, %v5483_v9 }
 0x265   : > { %v4730_v60 = vshll.u32 %v9396_v5, 16  ;;  %v5725_v11 = vshll.u32 %v9367_v33, 16  ;;  %v3993_v29 = vsel %vm7904_vm12, %v3985_v22, %v3992_v55  ;;  %v4284_v0 = vsel %vm8068_vm14, %v3994_v44, %v4283_v48  ;;  %5530 = vrot.lane.b32.xlu0 %v5484_v19, %s7654_s25 }
 0x266   : > { %v5233_v56 = vsel %vm1933_vm2, %v5228_v12, %v5232_v25  ;;  %4282 = vst.msk [vmem:[#allocation3 + $0x28] sm:$0xf] %vm929_vm15, %v3993_v29  ;;  %4285 = vst [vmem:[#allocation3 + $0x2c] sm:$0x1] %v4284_v0  ;;  %v4727_v5 = vrot.slane %v4725_v16, 1  ;;  %v5723_v39 = vshrl.u32 %v9367_v33, 16 }
 0x267   : > { %5404 = vrot.lane.b32.xlu1 %v5233_v56, %s7646_s21  ;;  %v5727_v49 = vrot.slane %v5725_v11, 1  ;;  %v5730_v17 = vshll.u32 %v9375_v54, 16  ;;  %v4732_v51 = vrot.slane %v4730_v60, 1  ;;  %v5213_v18 = vshll.u32 %v9390_v27, 16  ;;  %v4510_v40 = vld [vmem:[#allocation3 + $0x30] sm:$0xf] }
 0x268   : > { %v4728_v28 = vor.u32 %v4727_v5, %v4723_v58  ;;  %v4713_v21 = vshll.u32 %v9394_v35, 16  ;;  %v4447_v37 = vld [vmem:[#allocation3 + $0x30] sm:$0xf]  ;;  %v5218_v59 = vshll.u32 %v9407_v7, 16  ;;  %v4718_v14 = vshll.u32 %v9387_v63, 16 }
 0x269   : > { %v5728_v26 = vor.u32 %v5727_v49, %v5723_v39  ;;  %v5732_v62 = vrot.slane %v5730_v17, 1  ;;  %v5215_v23 = vrot.slane %v5213_v18, 1  ;;  %v5211_v7 = vshrl.u32 %v9390_v27, 16  ;;  %v4556_v45 = vld [vmem:[#allocation3 + $0x30] sm:$0xe] }
 0x26a   : > { %v4733_v3 = vsel %vm1933_vm2, %v4728_v28, %v4732_v51  ;;  %v4715_v54 = vrot.slane %v4713_v21, 1  ;;  %v4711_v34 = vshrl.u32 %v9394_v35, 16  ;;  %v5220_v47 = vrot.slane %v5218_v59, 1  ;;  %v4492_v20 = vld [vmem:[#allocation3 + $0x30] sm:$0xe] }
 0x26b   : > { %v5733_v33 = vsel %vm1933_vm2, %v5728_v26, %v5732_v62  ;;  %v4511_v61 = vld [vmem:[#allocation3 + $0x34] sm:$0xf]  ;;  %4894 = vrot.lane.b32.xlu1 %v4733_v3, %s7644_s19  ;;  %v9455_v31 = vld [vmem:[#allocation3 + $0x38] ss:$0 sps:$4 sm:$0x11]   ;;  %v5216_v57 = vor.u32 %v5215_v23, %v5211_v7  ;;  %v4720_v46 = vrot.slane %v4718_v14, 1 }
 0x26c   : > { %v4448_v30 = vld [vmem:[#allocation3 + $0x34] sm:$0xf]  ;;  %5914 = vrot.lane.b32.xlu0 %v5733_v33, %s7655_s28  ;;  %v9449_v8 = vcombine.low %v4510_v40, %v4511_v61  ;;  %v4716_v50 = vor.u32 %v4715_v54, %v4711_v34  ;;  %v7118_v63 = vcombine.low %v4556_v45, %v4511_v61  ;;  %v7526_v24 = vld [vmem:[#allocation3 + $0x38] ss:$0 sps:$4 sm:$0x11]   ;;  %v6001_v9 = vrot.slane %v9455_v31, 1 }
 0x26d   : > { %v9451_v32 = vcombine.low %v4447_v37, %v4448_v30  ;;  %v9457_v41 = vld [vmem:[#allocation3 + $0x28] sm:$0xf]  ;;  %v7071_v52 = vcombine.low %v4492_v20, %v4448_v30  ;;  %v4386_v53 = vld [vmem:[#allocation3 + $0x34] sm:$0xf]  ;;  %v4429_v2 = vld [vmem:[#allocation3 + $0x30] sm:$0xe]  ;;  %v5221_v48 = vsel %vm1933_vm2, %v5216_v57, %v5220_v47 }
 0x26e   : > { %v4509_v27 = vld [vmem:[#allocation3 + $0x28] sm:$0xf]  ;;  %v4445_v10 = vld [vmem:[#allocation3 + $0x24] sm:$0xf]  ;;  %v7024_v38 = vcombine.low %v4429_v2, %v4386_v53  ;;  %v4721_v25 = vsel %vm1933_vm2, %v4716_v50, %v4720_v46  ;;  %v6000_v12 = vrot.slane %v7118_v63, 1  ;;  %v5492_v11 = vrot.slane %v7526_v24, 1 }
 0x26f   : > { %5136 = vrot.lane.b32.xlu1 %v9451_v32, %s7653_s24  ;;  %v9464_v22 = vld [vmem:[#allocation3 + $0x38] ss:$0 sps:$4 sm:$0x11]   ;;  %v5249_v1 = vshll.u32 %v9451_v32, 16  ;;  %v4508_v44 = vld [vmem:[#allocation3 + $0x24] sm:$0xf]  ;;  %v9474_v19 = vcombine.low %v4445_v10, %v9457_v41 }
 0x270   : > { %5646 = vrot.lane.b32.xlu0 %v9449_v8, %s7647_s22  ;;  %v4384_v4 = vld [vmem:[#allocation3 + $0x28] sm:$0xf]  ;;  %v5247_v58 = vshrl.u32 %v9451_v32, 16  ;;  %v5491_v60 = vrot.slane %v7071_v52, 1  ;;  %v4982_v29 = vrot.slane %v7024_v38, 1  ;;  %v4983_v5 = vrot.slane %v9464_v22, 1 }
 0x271   : > { %v7268_v55 = vpop.f32.mrf.mxu0  ;;  %v4428_v0 = vld [vmem:[#allocation3 + $0x24] sm:$0xe]  ;;  %v9477_v39 = vld [vmem:[#allocation3 + $0x2c] ss:$0 sps:$4 sm:$0x11]   ;;  %v9480_v18 = vcombine.low %v4508_v44, %v4509_v27  ;;  %v5251_v62 = vrot.slane %v5249_v1, 1  ;;  %v6002_v40 = vsel %vm2206_vm3, %v6000_v12, %v6001_v9 }
 0x272   : > { %v3730_v16 = vadd.f32 %v7268_v55, %v9329_v42  ;;  %v7023_v49 = vcombine.low %v4428_v0, %v4384_v4  ;;  %v4385_v28 = vld [vmem:[#allocation3 + $0x30] sm:$0xf]  ;;  %v4555_v26 = vld [vmem:[#allocation3 + $0x24] sm:$0xe]  ;;  %v5254_v3 = vshll.u32 %v7526_v24, 16  ;;  %v5493_v54 = vsel %vm2206_vm3, %v5491_v60, %v5492_v11 }
 0x273   : > { %4892 = vrot.lane.b32.xlu1 %v4721_v25, %s7644_s19  ;;  %v3721_v56 = vpop.f32.mrf.mxu0  ;;  %v9483_v37 = vcombine.low %v4385_v28, %v4386_v53  ;;  %v9485_v23 = vld [vmem:[#allocation3 + $0x2c] ss:$0 sps:$4 sm:$0x11]   ;;  %v7117_v59 = vcombine.low %v4555_v26, %v4509_v27  ;;  %v4383_v14 = vld [vmem:[#allocation3 + $0x24] sm:$0xf]  ;;  %v4984_v7 = vsel %vm2206_vm3, %v4982_v29, %v4983_v5  ;;  %v4980_v57 = vrot.slane %v9477_v39, 1 }
 0x274   : > { %5402 = vrot.lane.b32.xlu0 %v5221_v48, %s7646_s21  ;;  %v3826_v17 = vmax.f32 %v3730_v16, 0.0  ;;  %v3722_v51 = vadd.f32 %v9329_v42, %v3721_v56  ;;  %v9494_v34 = vcombine.low %v4383_v14, %v4384_v4  ;;  %v4979_v45 = vrot.slane %v7023_v49, 1  ;;  %v4491_v38 = vld [vmem:[#allocation3 + $0x24] sm:$0xe]  ;;  %v4300_v1 = vld [vmem:[#allocation3 + $0x48] sm:$0xf] }
 0x275   : > { %v7269_v21 = vpop.f32.mrf.mxu0  ;;  %v5252_v20 = vor.u32 %v5251_v62, %v5247_v58  ;;  %v5997_v24 = vrot.slane %v7117_v59, 1  ;;  %v5998_v52 = vrot.slane %v9485_v23, 1  ;;  %v5256_v53 = vrot.slane %v5254_v3, 1  ;;  %v4293_v60 = vld [vmem:[#allocation3 + $0x3c] sm:$0xf] }
 0x276   : > { %v7168_v33 = vpack.c.bf16 %v3826_v17, %v3826_v17  ;;  %v3824_v61 = vmax.f32 %v3722_v51, 0.0  ;;  %v3733_v30 = vadd.f32 %v7269_v21, %v9329_v42  ;;  %v4981_v25 = vsel %vm2206_vm3, %v4979_v45, %v4980_v57  ;;  %v9506_v5 = vld [vmem:[#allocation3 + $0x2c] ss:$0 sps:$4 sm:$0x11]   ;;  %v4304_v28 = vld [vmem:[#allocation3 + $0x50] sm:$0x1] }
 0x277   : > { %5644 = vrot.lane.b32.xlu1 %v9480_v18, %s7647_s22  ;;  %v3724_v32 = vpop.f32.mrf.mxu0  ;;  %v7070_v55 = vcombine.low %v4491_v38, %v9457_v41  ;;  %v4749_v44 = vshll.u32 %v9483_v37, 16  ;;  %v5999_v0 = vsel %vm2206_vm3, %v5997_v24, %v5998_v52  ;;  %v5257_v56 = vsel %vm1933_vm2, %v5252_v20, %v5256_v53  ;;  %v4297_v57 = vld [vmem:[#allocation3 + $0x44] sm:$0x1] }
 0x278   : > { %5134 = vrot.lane.b32.xlu0 %v9474_v19, %s7653_s24  ;;  %v4030_v47 = vshrl.u32 %v7168_v33, 16  ;;  %v7166_v50 = vpack.c.bf16 %v3824_v61, %v3824_v61  ;;  %v3827_v63 = vmax.f32 %v3733_v30, 0.0  ;;  %v3725_v46 = vadd.f32 %v9329_v42, %v3724_v32 }
 0x279   : > { %v4033_v2 = vshll.u32 %v7168_v33, 16  ;;  %v4751_v51 = vrot.slane %v4749_v44, 1  ;;  %v5488_v62 = vrot.slane %v7070_v55, 1  ;;  %v4747_v21 = vshrl.u32 %v9483_v37, 16 }
 0x27a   : > { %v4032_v27 = vrot.slane %v4030_v47, 7  ;;  %v4013_v10 = vshrl.u32 %v7166_v50, 16  ;;  %v7169_v9 = vpack.c.bf16 %v3827_v63, %v3827_v63  ;;  %v3825_v48 = vmax.f32 %v3725_v46, 0.0 }
 0x27b   : > { %5536 = vrot.lane.b32.xlu1 %v5493_v54, %s7654_s25  ;;  %v4016_v58 = vshll.u32 %v7166_v50, 16  ;;  %v5489_v14 = vrot.slane %v9506_v5, 1  ;;  %v5749_v32 = vshll.u32 %v9449_v8, 16  ;;  %v4752_v47 = vor.u32 %v4751_v51, %v4747_v21 }
 0x27c   : > { %6046 = vrot.lane.b32.xlu0 %v6002_v40, %s7651_s26  ;;  %v4035_v12 = vor.u32 %v4033_v2, %v4032_v27  ;;  %v4015_v4 = vrot.slane %v4013_v10, 7  ;;  %v4038_v16 = vshrl.u32 %v7169_v9, 16  ;;  %v4041_v11 = vshll.u32 %v7169_v9, 16 }
 0x27d   : > { %v7167_v29 = vpack.c.bf16 %v3825_v48, %v3825_v48  ;;  %v4754_v40 = vshll.u32 %v9464_v22, 16  ;;  %v4036_v59 = vrot.slane %v4032_v27, 4  ;;  %v5751_v46 = vrot.slane %v5749_v32, 1 }
 0x27e   : > { %v4301_v49 = vsel %vm8082_vm1, %v4035_v12, %v4300_v1  ;;  %v4018_v17 = vor.u32 %v4016_v58, %v4015_v4  ;;  %v4040_v41 = vrot.slane %v4038_v16, 7  ;;  %v5747_v24 = vshrl.u32 %v9449_v8, 16 }
 0x27f   : > { %4302 = vst [vmem:[#allocation3 + $0x48] sm:$0xf] %v4301_v49  ;;  %v4021_v26 = vshrl.u32 %v7167_v29, 16  ;;  %5024 = vrot.lane.b32.xlu1 %v4981_v25, %s7645_s20  ;;  %v4024_v54 = vshll.u32 %v7167_v29, 16  ;;  %v4756_v20 = vrot.slane %v4754_v40, 1  ;;  %v5754_v52 = vshll.u32 %v9455_v31, 16 }
 0x280   : > { %5026 = vrot.lane.b32.xlu0 %v4984_v7, %s7645_s20  ;;  %v4294_v3 = vsel %vm8082_vm1, %v4018_v17, %v4293_v60  ;;  %v4043_v33 = vor.u32 %v4041_v11, %v4040_v41  ;;  %v4045_v61 = vrot.slane %v4040_v41, 4  ;;  %v4019_v7 = vrot.slane %v4015_v4, 4 }
 0x281   : > { %4295 = vst [vmem:[#allocation3 + $0x3c] sm:$0xf] %v4294_v3  ;;  %v4023_v30 = vrot.slane %v4021_v26, 7  ;;  %v5237_v53 = vshll.u32 %v9474_v19, 16  ;;  %v5737_v27 = vshll.u32 %v9480_v18, 16  ;;  %v5490_v9 = vsel %vm2206_vm3, %v5488_v62, %v5489_v14 }
 0x282   : > { %v4044_v45 = vsel %vm7904_vm12, %v4036_v59, %v4043_v33  ;;  %v4305_v22 = vsel %vm8068_vm14, %v4045_v61, %v4304_v28  ;;  %v4757_v38 = vsel %vm1933_vm2, %v4752_v47, %v4756_v20  ;;  %v5752_v8 = vor.u32 %v5751_v46, %v5747_v24 }
 0x283   : > { %4303 = vst.msk [vmem:[#allocation3 + $0x4c] sm:$0xf] %vm929_vm15, %v4044_v45  ;;  %4306 = vst [vmem:[#allocation3 + $0x50] sm:$0x1] %v4305_v22  ;;  %v4026_v50 = vor.u32 %v4024_v54, %v4023_v30  ;;  %v4028_v63 = vrot.slane %v4023_v30, 4  ;;  %5408 = vrot.lane.b32.xlu1 %v5257_v56, %s7646_s21  ;;  %v4737_v31 = vshll.u32 %v9494_v34, 16 }
 0x284   : > { %6044 = vrot.lane.b32.xlu0 %v5999_v0, %s7651_s26  ;;  %v5756_v1 = vrot.slane %v5754_v52, 1  ;;  %v5235_v48 = vshrl.u32 %v9474_v19, 16  ;;  %v5239_v25 = vrot.slane %v5237_v53, 1  ;;  %v5739_v55 = vrot.slane %v5737_v27, 1 }
 0x285   : > { %v4027_v2 = vsel %vm7904_vm12, %v4019_v7, %v4026_v50  ;;  %v4298_v10 = vsel %vm8068_vm14, %v4028_v63, %v4297_v57  ;;  %v5242_v4 = vshll.u32 %v9506_v5, 16  ;;  %v5735_v58 = vshrl.u32 %v9480_v18, 16 }
 0x286   : > { %4296 = vst.msk [vmem:[#allocation3 + $0x40] sm:$0xf] %vm929_vm15, %v4027_v2  ;;  %4299 = vst [vmem:[#allocation3 + $0x44] sm:$0x1] %v4298_v10  ;;  %v4514_v44 = vld [vmem:[#allocation3 + $0x48] sm:$0xf]  ;;  %v5757_v16 = vsel %vm1933_vm2, %v5752_v8, %v5756_v1  ;;  %v5240_v28 = vor.u32 %v5239_v25, %v5235_v48 }
 0x287   : > { %4898 = vrot.lane.b32.xlu1 %v4757_v38, %s7644_s19  ;;  %v4451_v12 = vld [vmem:[#allocation3 + $0x48] sm:$0xf]  ;;  %v5742_v29 = vshll.u32 %v9485_v23, 16  ;;  %v4739_v0 = vrot.slane %v4737_v31, 1  ;;  %v4735_v49 = vshrl.u32 %v9494_v34, 16  ;;  %v4742_v17 = vshll.u32 %v9477_v39, 16 }
 0x288   : > { %5534 = vrot.lane.b32.xlu0 %v5490_v9, %s7654_s25  ;;  %v4558_v5 = vld [vmem:[#allocation3 + $0x48] sm:$0xe]  ;;  %v5740_v41 = vor.u32 %v5739_v55, %v5735_v58  ;;  %v5244_v39 = vrot.slane %v5242_v4, 1  ;;  %v4557_v32 = vld [vmem:[#allocation3 + $0x3c] sm:$0xe]  ;;  %vm6361_vm7 = vcmask 293888  }
 0x289   : > { %v4431_v51 = vld [vmem:[#allocation3 + $0x48] sm:$0xe]  ;;  %v5744_v62 = vrot.slane %v5742_v29, 1  ;;  %v4740_v21 = vor.u32 %v4739_v0, %v4735_v49  ;;  %v4744_v14 = vrot.slane %v4742_v17, 1  ;;  %v4449_v22 = vld [vmem:[#allocation3 + $0x3c] sm:$0xf] }
 0x28a   : > { %v4515_v60 = vld [vmem:[#allocation3 + $0x4c] sm:$0xf]  ;;  %v9553_v23 = vld [vmem:[#allocation3 + $0x50] ss:$0 sps:$4 sm:$0x11]   ;;  %v5245_v7 = vsel %vm1933_vm2, %v5240_v28, %v5244_v39 }
 0x28b   : > { %v4452_v11 = vld [vmem:[#allocation3 + $0x4c] sm:$0xf]  ;;  %v9545_v56 = vcombine.low %v4514_v44, %v4515_v60  ;;  %v7120_v40 = vcombine.low %v4558_v5, %v4515_v60  ;;  %v9555_v59 = vld [vmem:[#allocation3 + $0x50] ss:$0 sps:$4 sm:$0x11]   ;;  %v5745_v54 = vsel %vm1933_vm2, %v5740_v41, %v5744_v62  ;;  %v4745_v46 = vsel %vm1933_vm2, %v4740_v21, %v4744_v14 }
 0x28c   : > { %5918 = vrot.lane.b32.xlu0 %v5757_v16, %s7655_s28  ;;  %v9547_v19 = vcombine.low %v4451_v12, %v4452_v11  ;;  %v4390_v18 = vld [vmem:[#allocation3 + $0x4c] sm:$0xf]  ;;  %v4494_v3 = vld [vmem:[#allocation3 + $0x48] sm:$0xe]  ;;  %v6007_v52 = vrot.slane %v9553_v23, 1  ;;  %v4989_v9 = vrot.slane %v9555_v59, 1 }
 0x28d   : > { %v4513_v26 = vld [vmem:[#allocation3 + $0x40] sm:$0xf]  ;;  %v7026_v33 = vcombine.low %v4431_v51, %v4390_v18  ;;  %v9559_v61 = vld [vmem:[#allocation3 + $0x50] ss:$0 sps:$4 sm:$0x11]   ;;  %v7073_v30 = vcombine.low %v4494_v3, %v4452_v11  ;;  %v6006_v24 = vrot.slane %v7120_v40, 1 }
 0x28e   : > { %5140 = vrot.lane.b32.xlu1 %v9547_v19, %s7653_s24  ;;  %v9564_v57 = vld [vmem:[#allocation3 + $0x40] sm:$0xf]  ;;  %v9566_v47 = vld [vmem:[#allocation3 + $0x44] ss:$0 sps:$4 sm:$0x11]   ;;  %v7119_v50 = vcombine.low %v4557_v32, %v4513_v26  ;;  %v5273_v63 = vshll.u32 %v9547_v19, 16 }
 0x28f   : > { %v4512_v53 = vld [vmem:[#allocation3 + $0x3c] sm:$0xf]  ;;  %v4389_v2 = vld [vmem:[#allocation3 + $0x48] sm:$0xf]  ;;  %v4988_v10 = vrot.slane %v7026_v33, 1  ;;  %v5497_v38 = vrot.slane %v7073_v30, 1  ;;  %v9577_v48 = vcombine.low %v4449_v22, %v9564_v57  ;;  %v6008_v41 = vsel %vm2206_vm3, %v6006_v24, %v6007_v52 }
 0x290   : > { %5650 = vrot.lane.b32.xlu0 %v9545_v56, %s7647_s22  ;;  %v5498_v8 = vrot.slane %v9559_v61, 1  ;;  %v9579_v25 = vcombine.low %v4389_v2, %v4390_v18  ;;  %v4388_v55 = vld [vmem:[#allocation3 + $0x40] sm:$0xf]  ;;  %v9582_v12 = vcombine.low %v4512_v53, %v4513_v26  ;;  %v6003_v4 = vrot.slane %v7119_v50, 1  ;;  %v4387_v0 = vld [vmem:[#allocation3 + $0x3c] sm:$0xf] }
 0x291   : > { %v7272_v45 = vpop.f32.mrf.mxu0  ;;  %v6004_v58 = vrot.slane %v9566_v47, 1  ;;  %v5275_v16 = vrot.slane %v5273_v63, 1  ;;  %v4430_v49 = vld [vmem:[#allocation3 + $0x3c] sm:$0xe]  ;;  %v5271_v17 = vshrl.u32 %v9547_v19, 16  ;;  %v4990_v18 = vsel %vm2206_vm3, %v4988_v10, %v4989_v9 }
 0x292   : > { %5916 = vrot.lane.b32.xlu1 %v5745_v54, %s7655_s28  ;;  %v3746_v20 = vadd.f32 %v7272_v45, %v9329_v42  ;;  %v5499_v51 = vsel %vm2206_vm3, %v5497_v38, %v5498_v8  ;;  %v9592_v28 = vld [vmem:[#allocation3 + $0x44] ss:$0 sps:$4 sm:$0x11]   ;;  %v7025_v26 = vcombine.low %v4430_v49, %v4388_v55  ;;  %v4493_v62 = vld [vmem:[#allocation3 + $0x3c] sm:$0xe]  ;;  %v9594_v39 = vcombine.low %v4387_v0, %v4388_v55 }
 0x293   : > { %v3737_v27 = vpop.f32.mrf.mxu0  ;;  %v9599_v19 = vld [vmem:[%s10591_s4 + $0x10] ss:$0 sps:$4 sm:$0x33]   ;;  %v6005_v30 = vsel %vm2206_vm3, %v6003_v4, %v6004_v58  ;;  %v9605_v54 = vld [vmem:[#allocation3 + $0x44] ss:$0 sps:$4 sm:$0x11]   ;;  %v7072_v14 = vcombine.low %v4493_v62, %v9564_v57  ;;  %v5276_v32 = vor.u32 %v5275_v16, %v5271_v17 }
 0x294   : > { %5406 = vrot.lane.b32.xlu0 %v5245_v7, %s7646_s21  ;;  %v3830_v31 = vmax.f32 %v3746_v20, 0.0  ;;  %v3738_v1 = vadd.f32 %v9329_v42, %v3737_v27  ;;  %7329 = vmatprep.subr.msk.bf16.mxu1 %vm6394_vm8, %v9599_v19  ;;  %v4314_v63 = vld [vmem:[#allocation3 + $0x60] sm:$0xf]  ;;  %v5278_v24 = vshll.u32 %v9559_v61, 16  ;;  %v4307_v2 = vld [vmem:[#allocation3 + $0x54] sm:$0xf] }
 0x295   : > { %v7273_v44 = vpop.f32.mrf.mxu0  ;;  %v5494_v9 = vrot.slane %v7072_v14, 1  ;;  %v5495_v38 = vrot.slane %v9605_v54, 1  ;;  %v5773_v8 = vshll.u32 %v9545_v56, 16  ;;  %v4318_v61 = vld [vmem:[#allocation3 + $0x68] sm:$0x1] }
 0x296   : > { %4896 = vrot.lane.b32.xlu1 %v4745_v46, %s7644_s19  ;;  %v7172_v60 = vpack.c.bf16 %v3830_v31, %v3830_v31  ;;  %v3828_v11 = vmax.f32 %v3738_v1, 0.0  ;;  %v3749_v29 = vadd.f32 %v7273_v44, %v9329_v42  ;;  %v4986_v46 = vrot.slane %v9592_v28, 1  ;;  %v4311_v62 = vld [vmem:[#allocation3 + $0x5c] sm:$0x1] }
 0x297   : > { %v3740_v5 = vpop.f32.mrf.mxu0  ;;  %v5280_v16 = vrot.slane %v5278_v24, 1  ;;  %v5766_v24 = vshll.u32 %v9566_v47, 16 }
 0x298   : > { %5138 = vrot.lane.b32.xlu0 %v9577_v48, %s7653_s24  ;;  %v4064_v21 = vshrl.u32 %v7172_v60, 16  ;;  %v7170_v40 = vpack.c.bf16 %v3828_v11, %v3828_v11  ;;  %v3831_v3 = vmax.f32 %v3749_v29, 0.0  ;;  %v3741_v33 = vadd.f32 %v9329_v42, %v3740_v5 }
 0x299   : > { %v4067_v45 = vshll.u32 %v7172_v60, 16  ;;  %v4985_v42 = vrot.slane %v7025_v26, 1  ;;  %v4773_v60 = vshll.u32 %v9579_v25, 16 }
 0x29a   : > { %5648 = vrot.lane.b32.xlu1 %v9582_v12, %s7647_s22  ;;  %v4066_v7 = vrot.slane %v4064_v21, 7  ;;  %v4047_v22 = vshrl.u32 %v7170_v40, 16  ;;  %v7173_v50 = vpack.c.bf16 %v3831_v3, %v3831_v3  ;;  %v3829_v20 = vmax.f32 %v3741_v33, 0.0 }
 0x29b   : > { %v4050_v57 = vshll.u32 %v7170_v40, 16  ;;  %v4987_v58 = vsel %vm2206_vm3, %v4985_v42, %v4986_v46  ;;  %v5775_v21 = vrot.slane %v5773_v8, 1  ;;  %v4778_v40 = vshll.u32 %v9555_v59, 16 }
 0x29c   : > { %6050 = vrot.lane.b32.xlu0 %v6008_v41, %s7651_s26  ;;  %v4069_v52 = vor.u32 %v4067_v45, %v4066_v7  ;;  %v4049_v53 = vrot.slane %v4047_v22, 7  ;;  %v4072_v27 = vshrl.u32 %v7173_v50, 16  ;;  %v7171_v10 = vpack.c.bf16 %v3829_v20, %v3829_v20 }
 0x29d   : > { %v4075_v44 = vshll.u32 %v7173_v50, 16  ;;  %v4070_v11 = vrot.slane %v4066_v7, 4  ;;  %v4771_v41 = vshrl.u32 %v9579_v25, 16  ;;  %v5778_v7 = vshll.u32 %v9553_v23, 16  ;;  %v7589_v23 = vld [vmem:[%s10591_s4 + $0x8] sm:$0xff]  }
 0x29e   : > { %5540 = vrot.lane.b32.xlu1 %v5499_v51, %s7654_s25  ;;  %v4315_v31 = vsel %vm8082_vm1, %v4069_v52, %v4314_v63  ;;  %v4052_v1 = vor.u32 %v4050_v57, %v4049_v53  ;;  %v4074_v55 = vrot.slane %v4072_v27, 7  ;;  %v4055_v4 = vshrl.u32 %v7171_v10, 16 }
 0x29f   : > { %4316 = vst [vmem:[#allocation3 + $0x60] sm:$0xf] %v4315_v31  ;;  %v4058_v5 = vshll.u32 %v7171_v10, 16  ;;  %v4775_v51 = vrot.slane %v4773_v60, 1  ;;  %v4053_v3 = vrot.slane %v4049_v53, 4  ;;  %v5281_v45 = vsel %vm1933_vm2, %v5276_v32, %v5280_v16 }
 0x2a0   : > { %5030 = vrot.lane.b32.xlu0 %v4990_v18, %s7645_s20  ;;  %v4308_v29 = vsel %vm8082_vm1, %v4052_v1, %v4307_v2  ;;  %v4077_v0 = vor.u32 %v4075_v44, %v4074_v55  ;;  %v4079_v49 = vrot.slane %v4074_v55, 4  ;;  %v4057_v17 = vrot.slane %v4055_v4, 7 }
 0x2a1   : > { %4309 = vst [vmem:[#allocation3 + $0x54] sm:$0xf] %v4308_v29  ;;  %v5771_v22 = vshrl.u32 %v9545_v56, 16  ;;  %v4776_v50 = vor.u32 %v4775_v51, %v4771_v41  ;;  %v5761_v63 = vshll.u32 %v9582_v12, 16  ;;  %v5261_v42 = vshll.u32 %v9577_v48, 16 }
 0x2a2   : > { %5028 = vrot.lane.b32.xlu1 %v4987_v58, %s7645_s20  ;;  %v4078_v18 = vsel %vm7904_vm12, %v4070_v11, %v4077_v0  ;;  %v4319_v26 = vsel %vm8068_vm14, %v4079_v49, %v4318_v61  ;;  %v4060_v33 = vor.u32 %v4058_v5, %v4057_v17  ;;  %v4062_v14 = vrot.slane %v4057_v17, 4 }
 0x2a3   : > { %4317 = vst.msk [vmem:[#allocation3 + $0x64] sm:$0xf] %vm929_vm15, %v4078_v18  ;;  %4320 = vst [vmem:[#allocation3 + $0x68] sm:$0x1] %v4319_v26  ;;  %v5496_v56 = vsel %vm2206_vm3, %v5494_v9, %v5495_v38  ;;  %v4780_v32 = vrot.slane %v4778_v40, 1  ;;  %v5780_v46 = vrot.slane %v5778_v7, 1 }
 0x2a4   : > { %6048 = vrot.lane.b32.xlu0 %v6005_v30, %s7651_s26  ;;  %v4061_v59 = vsel %vm7904_vm12, %v4053_v3, %v4060_v33  ;;  %v4312_v20 = vsel %vm8068_vm14, %v4062_v14, %v4311_v62  ;;  %v5776_v30 = vor.u32 %v5775_v21, %v5771_v22  ;;  %v4761_v52 = vshll.u32 %v9594_v39, 16  ;;  %v7593_v9 = vld [vmem:[%s10591_s4] sm:$0xff]  }
 0x2a5   : > { %4310 = vst.msk [vmem:[#allocation3 + $0x58] sm:$0xf] %vm929_vm15, %v4061_v59  ;;  %4313 = vst [vmem:[#allocation3 + $0x5c] sm:$0x1] %v4312_v20  ;;  %v6396_v53 = vsel %vm6394_vm8, %v9599_v19, 0  ;;  %v4781_v57 = vsel %vm1933_vm2, %v4776_v50, %v4780_v32  ;;  %v5259_v27 = vshrl.u32 %v9577_v48, 16 }
 0x2a6   : > { %5412 = vrot.lane.b32.xlu1 %v5281_v45, %s7646_s21  ;;  %v5266_v2 = vshll.u32 %v9605_v54, 16  ;;  %v5763_v10 = vrot.slane %v5761_v63, 1  ;;  %7291 = vmatpush3.bf16.msra.mxu1 %v6396_v53  ;;  %v4518_v47 = vld [vmem:[#allocation3 + $0x60] sm:$0xf]  ;;  %v5263_v8 = vrot.slane %v5261_v42, 1  ;;  %v5759_v31 = vshrl.u32 %v9582_v12, 16 }
 0x2a7   : > { %v4455_v38 = vld [vmem:[#allocation3 + $0x60] sm:$0xf]  ;;  %7292 = vmatprep.subr.bf16.mxu1 %v7589_v23  ;;  %v5781_v19 = vsel %vm1933_vm2, %v5776_v30, %v5780_v46  ;;  %v5768_v61 = vrot.slane %v5766_v24, 1  ;;  %v4763_v4 = vrot.slane %v4761_v52, 1  ;;  %v4766_v11 = vshll.u32 %v9592_v28, 16 }
 0x2a8   : > { %5538 = vrot.lane.b32.xlu0 %v5496_v56, %s7654_s25  ;;  %v4560_v55 = vld [vmem:[#allocation3 + $0x60] sm:$0xe]  ;;  %v5764_v60 = vor.u32 %v5763_v10, %v5759_v31  ;;  %v5264_v29 = vor.u32 %v5263_v8, %v5259_v27  ;;  %v4759_v0 = vshrl.u32 %v9594_v39, 16  ;;  %v5268_v28 = vrot.slane %v5266_v2, 1  ;;  %v4559_v21 = vld [vmem:[#allocation3 + $0x54] sm:$0xe] }
 0x2a9   : > { %v4433_v16 = vld [vmem:[#allocation3 + $0x60] sm:$0xe]  ;;  %v4768_v3 = vrot.slane %v4766_v11, 1  ;;  %v9689_v20 = vld [vmem:[%s10590_s3] ss:$0 sm:$0xff] }
 0x2aa   : > { %4902 = vrot.lane.b32.xlu1 %v4781_v57, %s7644_s19  ;;  %v4519_v1 = vld [vmem:[#allocation3 + $0x64] sm:$0xf]  ;;  %v9667_v12 = vld [vmem:[#allocation3 + $0x68] ss:$0 sps:$4 sm:$0x11]   ;;  %7293 = vmatpush3.bf16.msra.mxu1 %v7589_v23  ;;  %v4764_v18 = vor.u32 %v4763_v4, %v4759_v0  ;;  %v5769_v40 = vsel %vm1933_vm2, %v5764_v60, %v5768_v61  ;;  %v5269_v45 = vsel %vm1933_vm2, %v5264_v29, %v5268_v28 }
 0x2ab   : > { %v4456_v48 = vld [vmem:[#allocation3 + $0x64] sm:$0xf]  ;;  %v9662_v54 = vcombine.low %v4518_v47, %v4519_v1  ;;  %v7122_v49 = vcombine.low %v4560_v55, %v4519_v1  ;;  %v9672_v5 = vld [vmem:[#allocation3 + $0x68] ss:$0 sps:$4 sm:$0x11]   ;;  %7294 = vmatprep.subr.bf16.mxu1 %v7593_v9  ;;  %v6013_v59 = vrot.slane %v9667_v12, 1 }
 0x2ac   : > { %5922 = vrot.lane.b32.xlu0 %v5781_v19, %s7655_s28  ;;  %v9664_v44 = vcombine.low %v4455_v38, %v4456_v48  ;;  %v4394_v58 = vld [vmem:[#allocation3 + $0x64] sm:$0xf]  ;;  %v4517_v17 = vld [vmem:[#allocation3 + $0x58] sm:$0xf]  ;;  %v4496_v51 = vld [vmem:[#allocation3 + $0x60] sm:$0xe]  ;;  %v4769_v52 = vsel %vm1933_vm2, %v4764_v18, %v4768_v3 }
 0x2ad   : > { %v7028_v41 = vcombine.low %v4433_v16, %v4394_v58  ;;  %v9676_v26 = vld [vmem:[#allocation3 + $0x68] ss:$0 sps:$4 sm:$0x11]   ;;  %v7075_v62 = vcombine.low %v4496_v51, %v4456_v48  ;;  %v4393_v33 = vld [vmem:[#allocation3 + $0x60] sm:$0xf]  ;;  %v7121_v7 = vcombine.low %v4559_v21, %v4517_v17  ;;  %v6012_v63 = vrot.slane %v7122_v49, 1 }
 0x2ae   : > { %5144 = vrot.lane.b32.xlu1 %v9664_v44, %s7653_s24  ;;  %v9679_v14 = vld [vmem:[#allocation3 + $0x5c] ss:$0 sps:$4 sm:$0x11]   ;;  %7295 = vmatpush3.bf16.msra.mxu1 %v7593_v9  ;;  %v9683_v50 = vld [vmem:[#allocation3 + $0x58] sm:$0xf]  ;;  %v9692_v56 = vcombine.low %v4393_v33, %v4394_v58  ;;  %v4995_v32 = vrot.slane %v9672_v5, 1 }
 0x2af   : > { %v4453_v23 = vld [vmem:[#allocation3 + $0x54] sm:$0xf]  ;;  %v4994_v30 = vrot.slane %v7028_v41, 1  ;;  %v4392_v46 = vld [vmem:[#allocation3 + $0x58] sm:$0xf]  ;;  %v5503_v57 = vrot.slane %v7075_v62, 1  ;;  %v6014_v1 = vsel %vm2206_vm3, %v6012_v63, %v6013_v59 }
 0x2b0   : > { %5654 = vrot.lane.b32.xlu0 %v9662_v54, %s7647_s22  ;;  %v4516_v53 = vld [vmem:[#allocation3 + $0x54] sm:$0xf]  ;;  %v5504_v27 = vrot.slane %v9676_v26, 1  ;;  %v5297_v2 = vshll.u32 %v9664_v44, 16  ;;  %v6009_v47 = vrot.slane %v7121_v7, 1  ;;  %v6010_v38 = vrot.slane %v9679_v14, 1 }
 0x2b1   : > { %v7276_v22 = vpop.f32.mrf.mxu0  ;;  %v4432_v8 = vld [vmem:[#allocation3 + $0x54] sm:$0xe]  ;;  %v9702_v31 = vcombine.low %v4453_v23, %v9683_v50  ;;  %v9706_v48 = vcombine.low %v4516_v53, %v4517_v17  ;;  %v9708_v55 = vld [vmem:[#allocation3 + $0x5c] ss:$0 sps:$4 sm:$0x11]   ;;  %v4996_v60 = vsel %vm2206_vm3, %v4994_v30, %v4995_v32  ;;  %v5295_v17 = vshrl.u32 %v9664_v44, 16  ;;  %v9727_v30 = vpop.permute.xlu0 %4890 }
 0x2b2   : > { %5920 = vrot.lane.b32.xlu1 %v5769_v40, %s7655_s28  ;;  %v3762_v42 = vadd.f32 %v9689_v20, %v7276_v22  ;;  %v7027_v61 = vcombine.low %v4432_v8, %v4392_v46  ;;  %v4391_v11 = vld [vmem:[#allocation3 + $0x54] sm:$0xf]  ;;  %v5505_v0 = vsel %vm2206_vm3, %v5503_v57, %v5504_v27  ;;  %v5299_v41 = vrot.slane %v5297_v2, 1  ;;  %v9723_v7 = vld [vmem:[#allocation3 + $0x5c] ss:$0 sps:$4 sm:$0x11]  }
 0x2b3   : > { %v3753_v24 = vpop.f32.mrf.mxu0  ;;  %v9715_v49 = vcombine.low %v4391_v11, %v4392_v46  ;;  %v6011_v62 = vsel %vm2206_vm3, %v6009_v47, %v6010_v38  ;;  %v4495_v21 = vld [vmem:[#allocation3 + $0x54] sm:$0xe]  ;;  %v4992_v33 = vrot.slane %v9708_v55, 1  ;;  %v5302_v46 = vshll.u32 %v9676_v26, 16 }
 0x2b4   : > { %5410 = vrot.lane.b32.xlu0 %v5269_v45, %s7646_s21  ;;  %v3834_v10 = vmax.f32 %v3762_v42, 0.0  ;;  %v3754_v9 = vadd.f32 %v9689_v20, %v3753_v24  ;;  %v4991_v3 = vrot.slane %v7027_v61, 1  ;;  %v7074_v45 = vcombine.low %v4495_v21, %v9683_v50  ;;  %v4328_v42 = vld [vmem:[#allocation3 + $0x78] sm:$0xf]  ;;  %v4321_v50 = vld [vmem:[#allocation3 + $0x6c] sm:$0xf] }
 0x2b5   : > { %v7277_v19 = vpop.f32.mrf.mxu0  ;;  %v5300_v32 = vor.u32 %v5299_v41, %v5295_v17  ;;  %v5797_v24 = vshll.u32 %v9662_v54, 16  ;;  %v5501_v47 = vrot.slane %v9723_v7, 1 }
 0x2b6   : > { %4900 = vrot.lane.b32.xlu1 %v4769_v52, %s7644_s19  ;;  %v7176_v4 = vpack.c.bf16 %v3834_v10, %v3834_v10  ;;  %v3832_v58 = vmax.f32 %v3754_v9, 0.0  ;;  %v3765_v16 = vadd.f32 %v9689_v20, %v7277_v19  ;;  %v4993_v10 = vsel %vm2206_vm3, %v4991_v3, %v4992_v33  ;;  %v4325_v3 = vld [vmem:[#allocation3 + $0x74] sm:$0x1] }
 0x2b7   : > { %v3756_v29 = vpop.f32.mrf.mxu0  ;;  %v5500_v9 = vrot.slane %v7074_v45, 1  ;;  %v4795_v33 = vshrl.u32 %v9692_v56, 16  ;;  %v4802_v45 = vshll.u32 %v9672_v5, 16 }
 0x2b8   : > { %5142 = vrot.lane.b32.xlu0 %v9702_v31, %s7653_s24  ;;  %v4098_v51 = vshrl.u32 %v7176_v4, 16  ;;  %v7174_v28 = vpack.c.bf16 %v3832_v58, %v3832_v58  ;;  %v3835_v18 = vmax.f32 %v3765_v16, 0.0  ;;  %v3757_v40 = vadd.f32 %v9689_v20, %v3756_v29 }
 0x2b9   : > { %v4101_v22 = vshll.u32 %v7176_v4, 16  ;;  %v5304_v4 = vrot.slane %v5302_v46, 1  ;;  %v5799_v58 = vrot.slane %v5797_v24, 1  ;;  %v4797_v16 = vshll.u32 %v9692_v56, 16 }
 0x2ba   : > { %5652 = vrot.lane.b32.xlu1 %v9706_v48, %s7647_s22  ;;  %v4100_v44 = vrot.slane %v4098_v51, 7  ;;  %v4081_v63 = vshrl.u32 %v7174_v28, 16  ;;  %v7177_v59 = vpack.c.bf16 %v3835_v18, %v3835_v18  ;;  %v3833_v23 = vmax.f32 %v3757_v40, 0.0 }
 0x2bb   : > { %v4084_v57 = vshll.u32 %v7174_v28, 16  ;;  %v5019_v28 = vpop.permute.xlu0 %5018  ;;  %v5802_v18 = vshll.u32 %v9667_v12, 16  ;;  %v4799_v21 = vrot.slane %v4797_v16, 1  ;;  %v5285_v12 = vshll.u32 %v9702_v31, 16 }
 0x2bc   : > { %6054 = vrot.lane.b32.xlu0 %v6014_v1, %s7651_s26  ;;  %v4103_v52 = vor.u32 %v4101_v22, %v4100_v44  ;;  %v4083_v53 = vrot.slane %v4081_v63, 7  ;;  %v4106_v27 = vshrl.u32 %v7177_v59, 16  ;;  %v7175_v2 = vpack.c.bf16 %v3833_v23, %v3833_v23  ;;  %v4332_v1 = vld [vmem:[#allocation3 + $0x80] sm:$0x1] }
 0x2bd   : > { %v4109_v19 = vshll.u32 %v7177_v59, 16  ;;  %v4104_v11 = vrot.slane %v4100_v44, 4  ;;  %v5305_v59 = vsel %vm1933_vm2, %v5300_v32, %v5304_v4  ;;  %v4800_v23 = vor.u32 %v4799_v21, %v4795_v33 }
 0x2be   : > { %5544 = vrot.lane.b32.xlu1 %v5505_v0, %s7654_s25  ;;  %v4329_v38 = vsel %vm8082_vm1, %v4103_v52, %v4328_v42  ;;  %v4086_v8 = vor.u32 %v4084_v57, %v4083_v53  ;;  %v4108_v26 = vrot.slane %v4106_v27, 7  ;;  %v4089_v61 = vshrl.u32 %v7175_v2, 16 }
 0x2bf   : > { %4330 = vst [vmem:[#allocation3 + $0x78] sm:$0xf] %v4329_v38  ;;  %v4092_v51 = vshll.u32 %v7175_v2, 16  ;;  %v4087_v44 = vrot.slane %v4083_v53, 4  ;;  %v5795_v42 = vshrl.u32 %v9662_v54, 16  ;;  %v5785_v46 = vshll.u32 %v9706_v48, 16 }
 0x2c0   : > { %5034 = vrot.lane.b32.xlu0 %v4996_v60, %s7645_s20  ;;  %v4322_v29 = vsel %vm8082_vm1, %v4086_v8, %v4321_v50  ;;  %v4111_v0 = vor.u32 %v4109_v19, %v4108_v26  ;;  %v4113_v17 = vrot.slane %v4108_v26, 4  ;;  %v4091_v41 = vrot.slane %v4089_v61, 7 }
 0x2c1   : > { %4323 = vst [vmem:[#allocation3 + $0x6c] sm:$0xf] %v4322_v29  ;;  %v5800_v32 = vor.u32 %v5799_v58, %v5795_v42  ;;  %v5804_v54 = vrot.slane %v5802_v18, 1  ;;  %v4804_v52 = vrot.slane %v4802_v45, 1  ;;  %v5283_v27 = vshrl.u32 %v9702_v31, 16 }
 0x2c2   : > { %5032 = vrot.lane.b32.xlu1 %v4993_v10, %s7645_s20  ;;  %v4112_v60 = vsel %vm7904_vm12, %v4104_v11, %v4111_v0  ;;  %v4333_v40 = vsel %vm8068_vm14, %v4113_v17, %v4332_v1  ;;  %v4094_v22 = vor.u32 %v4092_v51, %v4091_v41  ;;  %v4096_v63 = vrot.slane %v4091_v41, 4 }
 0x2c3   : > { %4331 = vst.msk [vmem:[#allocation3 + $0x7c] sm:$0xf] %vm929_vm15, %v4112_v60  ;;  %4334 = vst [vmem:[#allocation3 + $0x80] sm:$0x1] %v4333_v40  ;;  %v5287_v50 = vrot.slane %v5285_v12, 1  ;;  %v5787_v2 = vrot.slane %v5785_v46, 1  ;;  %v6076_v38 = vsel %vm6074_vm0, %v9241_v13, %v9727_v30  ;;  %v5805_v13 = vsel %vm1933_vm2, %v5800_v32, %v5804_v54 }
 0x2c4   : > { %6052 = vrot.lane.b32.xlu0 %v6011_v62, %s7651_s26  ;;  %v4095_v5 = vsel %vm7904_vm12, %v4087_v44, %v4094_v22  ;;  %v4326_v24 = vsel %vm8068_vm14, %v4096_v63, %v4325_v3  ;;  %v5502_v62 = vsel %vm2206_vm3, %v5500_v9, %v5501_v47  ;;  %v4785_v10 = vshll.u32 %v9715_v49, 16 }
 0x2c5   : > { %4324 = vst.msk [vmem:[#allocation3 + $0x70] sm:$0xf] %vm929_vm15, %v4095_v5  ;;  %4327 = vst [vmem:[#allocation3 + $0x74] sm:$0x1] %v4326_v24  ;;  %v4805_v9 = vsel %vm1933_vm2, %v4800_v23, %v4804_v52  ;;  %v5290_v26 = vshll.u32 %v9723_v7, 16  ;;  %v5783_v19 = vshrl.u32 %v9706_v48, 16  ;;  %v5288_v29 = vor.u32 %v5287_v50, %v5283_v27 }
 0x2c6   : > { %5416 = vrot.lane.b32.xlu1 %v5305_v59, %s7646_s21  ;;  %v4522_v47 = vld [vmem:[#allocation3 + $0x78] sm:$0xf]  ;;  %v5790_v31 = vshll.u32 %v9679_v14, 16  ;;  %v4783_v1 = vshrl.u32 %v9715_v49, 16  ;;  %v4787_v61 = vrot.slane %v4785_v10, 1  ;;  %v4790_v4 = vshll.u32 %v9708_v55, 16 }
 0x2c7   : > { %v9762_v53 = vpop.permute.xlu0 %5642  ;;  %v4459_v8 = vld [vmem:[#allocation3 + $0x78] sm:$0xf]  ;;  %v5788_v0 = vor.u32 %v5787_v2, %v5783_v19  ;;  %v6108_v51 = vsel %vm3311_vm9, %v6076_v38, %v5019_v28  ;;  %v5292_v18 = vrot.slane %v5290_v26, 1 }
 0x2c8   : > { %5542 = vrot.lane.b32.xlu0 %v5502_v62, %s7654_s25  ;;  %v9764_v57 = vpop.permute.xlu1 %5132  ;;  %v4562_v58 = vld [vmem:[#allocation3 + $0x78] sm:$0xe]  ;;  %v5792_v3 = vrot.slane %v5790_v31, 1  ;;  %v4788_v33 = vor.u32 %v4787_v61, %v4783_v1  ;;  %v4457_v46 = vld [vmem:[#allocation3 + $0x6c] sm:$0xf]  ;;  %v4792_v5 = vrot.slane %v4790_v4, 1 }
 0x2c9   : > { %v4435_v17 = vld [vmem:[#allocation3 + $0x78] sm:$0xe]  ;;  %v5293_v42 = vsel %vm1933_vm2, %v5288_v29, %v5292_v18  ;;  %v4561_v62 = vld [vmem:[#allocation3 + $0x6c] sm:$0xe] }
 0x2ca   : > { %4906 = vrot.lane.b32.xlu1 %v4805_v9, %s7644_s19  ;;  %v4523_v30 = vld [vmem:[#allocation3 + $0x7c] sm:$0xf]  ;;  %v4498_v41 = vld [vmem:[#allocation3 + $0x78] sm:$0xe]  ;;  %v5793_v23 = vsel %vm1933_vm2, %v5788_v0, %v5792_v3  ;;  %v4520_v52 = vld [vmem:[#allocation3 + $0x6c] sm:$0xf]  ;;  %v4793_v38 = vsel %vm1933_vm2, %v4788_v33, %v4792_v5 }
 0x2cb   : > { %v4460_v16 = vld [vmem:[#allocation3 + $0x7c] sm:$0xf]  ;;  %v5131_v11 = vpop.permute.xlu0 %5130  ;;  %v9780_v7 = vcombine.low %v4522_v47, %v4523_v30  ;;  %v9787_v21 = vld [vmem:[#allocation3 + $0x80] ss:$0 sps:$4 sm:$0x11]   ;;  %v7124_v60 = vcombine.low %v4562_v58, %v4523_v30 }
 0x2cc   : > { %5926 = vrot.lane.b32.xlu0 %v5805_v13, %s7655_s28  ;;  %v9782_v48 = vcombine.low %v4459_v8, %v4460_v16  ;;  %v4398_v14 = vld [vmem:[#allocation3 + $0x7c] sm:$0xf]  ;;  %v9785_v55 = vpop.permute.xlu1 %5532  ;;  %v4521_v45 = vld [vmem:[#allocation3 + $0x70] sm:$0xf]  ;;  %v4397_v63 = vld [vmem:[#allocation3 + $0x78] sm:$0xf]  ;;  %v7077_v12 = vcombine.low %v4498_v41, %v4460_v16  ;;  %v9796_v28 = vsel %vm6139_vm4, %v6108_v51, %v5131_v11 }
 0x2cd   : > { %v7030_v40 = vcombine.low %v4435_v17, %v4398_v14  ;;  %v9791_v44 = vld [vmem:[#allocation3 + $0x80] ss:$0 sps:$4 sm:$0x11]   ;;  %v9793_v22 = vld [vmem:[#allocation3 + $0x70] sm:$0xf]  ;;  %v6018_v32 = vrot.slane %v7124_v60, 1  ;;  %v7123_v2 = vcombine.low %v4561_v62, %v4521_v45  ;;  %v9811_v9 = vcombine.low %v4397_v63, %v4398_v14 }
 0x2ce   : > { %5148 = vrot.lane.b32.xlu1 %v9782_v48, %s7653_s24  ;;  %v9804_v24 = vld [vmem:[#allocation3 + $0x80] ss:$0 sps:$4 sm:$0x11]   ;;  %v6019_v54 = vrot.slane %v9787_v21, 1  ;;  %v5001_v47 = vrot.slane %v9791_v44, 1  ;;  %v5321_v26 = vshll.u32 %v9782_v48, 16  ;;  %v9819_v1 = vcombine.low %v4457_v46, %v9793_v22 }
 0x2cf   : > { %v9800_v59 = vpop.permute.xlu0 %6042  ;;  %v5000_v27 = vrot.slane %v7030_v40, 1  ;;  %v9807_v50 = vld [vmem:[#allocation3 + $0x74] ss:$0 sps:$4 sm:$0x11]   ;;  %v4396_v8 = vld [vmem:[#allocation3 + $0x70] sm:$0xf]  ;;  %v9825_v16 = vcombine.low %v4520_v52, %v4521_v45 }
 0x2d0   : > { %5658 = vrot.lane.b32.xlu0 %v9780_v7, %s7647_s22  ;;  %v5509_v61 = vrot.slane %v7077_v12, 1  ;;  %v5510_v4 = vrot.slane %v9804_v24, 1  ;;  %v4434_v58 = vld [vmem:[#allocation3 + $0x6c] sm:$0xe]  ;;  %v6015_v11 = vrot.slane %v7123_v2, 1  ;;  %v6016_v29 = vrot.slane %v9807_v50, 1 }
 0x2d1   : > { %v7280_v10 = vpop.f32.mrf.mxu0  ;;  %v9815_v19 = vpop.permute.xlu1 %5020  ;;  %v9828_v0 = vld [vmem:[#allocation3 + $0x74] ss:$0 sps:$4 sm:$0x11]   ;;  %v7029_v14 = vcombine.low %v4434_v58, %v4396_v8  ;;  %v6020_v51 = vsel %vm2206_vm3, %v6018_v32, %v6019_v54  ;;  %v4395_v18 = vld [vmem:[#allocation3 + $0x6c] sm:$0xf]  ;;  %v5323_v40 = vrot.slane %v5321_v26, 1  ;;  %v5002_v33 = vsel %vm2206_vm3, %v5000_v27, %v5001_v47 }
 0x2d2   : > { %5924 = vrot.lane.b32.xlu1 %v5793_v23, %s7655_s28  ;;  %v3778_v31 = vadd.f32 %v9689_v20, %v7280_v10  ;;  %v4497_v60 = vld [vmem:[#allocation3 + $0x6c] sm:$0xe]  ;;  %v9834_v45 = vcombine.low %v4395_v18, %v4396_v8  ;;  %v9836_v63 = vld [vmem:[#allocation3 + $0x74] ss:$0 sps:$4 sm:$0x11]   ;;  %v5511_v62 = vsel %vm2206_vm3, %v5509_v61, %v5510_v4  ;;  %v9845_v54 = vsel %vm2206_vm3, %v6015_v11, %v6016_v29 }
 0x2d3   : > { %v9823_v13 = vpop.permute.xlu0 %5022  ;;  %v3769_v30 = vpop.f32.mrf.mxu0  ;;  %v7076_v12 = vcombine.low %v4497_v60, %v9793_v22  ;;  %v4997_v52 = vrot.slane %v7029_v14, 1  ;;  %v4998_v27 = vrot.slane %v9828_v0, 1  ;;  %v5326_v22 = vshll.u32 %v9804_v24, 16  ;;  %v4342_v29 = vld [vmem:[#allocation3 + $0x90] sm:$0xf] }
 0x2d4   : > { %5414 = vrot.lane.b32.xlu0 %v5293_v42, %s7646_s21  ;;  %v3838_v17 = vmax.f32 %v3778_v31, 0.0  ;;  %v3770_v41 = vadd.f32 %v9689_v20, %v3769_v30  ;;  %v5319_v42 = vshrl.u32 %v9782_v48, 16  ;;  %v5507_v61 = vrot.slane %v9836_v63, 1 }
 0x2d5   : > { %v7281_v3 = vpop.f32.mrf.mxu0  ;;  %v5506_v31 = vrot.slane %v7076_v12, 1  ;;  %v5821_v4 = vshll.u32 %v9780_v7, 16  ;;  %v5328_v18 = vrot.slane %v5326_v22, 1 }
 0x2d6   : > { %4904 = vrot.lane.b32.xlu1 %v4793_v38, %s7644_s19  ;;  %v7180_v23 = vpack.c.bf16 %v3838_v17, %v3838_v17  ;;  %v3836_v46 = vmax.f32 %v3770_v41, 0.0  ;;  %v3781_v5 = vadd.f32 %v9689_v20, %v7281_v3  ;;  %v5324_v8 = vor.u32 %v5323_v40, %v5319_v42  ;;  %v4335_v42 = vld [vmem:[#allocation3 + $0x84] sm:$0xf] }
 0x2d7   : > { %v3772_v32 = vpop.f32.mrf.mxu0  ;;  %v9851_v47 = vpop.permute.xlu0 %5530  ;;  %v4999_v41 = vsel %vm2206_vm3, %v4997_v52, %v4998_v27  ;;  %v5823_v12 = vrot.slane %v5821_v4, 1 }
 0x2d8   : > { %5146 = vrot.lane.b32.xlu0 %v9819_v1, %s7653_s24  ;;  %v4132_v2 = vshrl.u32 %v7180_v23, 16  ;;  %v7178_v48 = vpack.c.bf16 %v3836_v46, %v3836_v46  ;;  %v3839_v38 = vmax.f32 %v3781_v5, 0.0  ;;  %v3773_v26 = vadd.f32 %v9689_v20, %v3772_v32 }
 0x2d9   : > { %v9849_v10 = vpop.permute.xlu1 %5404  ;;  %v4135_v24 = vshll.u32 %v7180_v23, 16  ;;  %v5508_v23 = vsel %vm2206_vm3, %v5506_v31, %v5507_v61  ;;  %v4819_v31 = vshrl.u32 %v9811_v9, 16 }
 0x2da   : > { %5656 = vrot.lane.b32.xlu1 %v9825_v16, %s7647_s22  ;;  %v4134_v58 = vrot.slane %v4132_v2, 7  ;;  %v4115_v30 = vshrl.u32 %v7178_v48, 16  ;;  %v7181_v11 = vpack.c.bf16 %v3839_v38, %v3839_v38  ;;  %v4118_v14 = vshll.u32 %v7178_v48, 16 }
 0x2db   : > { %v3837_v17 = vmax.f32 %v3773_v26, 0.0  ;;  %v5329_v2 = vsel %vm1933_vm2, %v5324_v8, %v5328_v18  ;;  %v4346_v26 = vld [vmem:[#allocation3 + $0x98] sm:$0x1] }
 0x2dc   : > { %6058 = vrot.lane.b32.xlu0 %v6020_v51, %s7651_s26  ;;  %v4137_v60 = vor.u32 %v4135_v24, %v4134_v58  ;;  %v4117_v40 = vrot.slane %v4115_v30, 7  ;;  %v4140_v3 = vshrl.u32 %v7181_v11, 16  ;;  %v5819_v51 = vshrl.u32 %v9780_v7, 16 }
 0x2dd   : > { %v7179_v46 = vpack.c.bf16 %v3837_v17, %v3837_v17  ;;  %v4895_v5 = vpop.permute.xlu1 %4894  ;;  %v4143_v48 = vshll.u32 %v7181_v11, 16  ;;  %v4138_v38 = vrot.slane %v4134_v58, 4 }
 0x2de   : > { %v9860_v32 = vpop.permute.xlu0 %5914  ;;  %5548 = vrot.lane.b32.xlu1 %v5511_v62, %s7654_s25  ;;  %v4343_v52 = vsel %vm8082_vm1, %v4137_v60, %v4342_v29  ;;  %v4120_v27 = vor.u32 %v4118_v14, %v4117_v40  ;;  %v4142_v22 = vrot.slane %v4140_v3, 7  ;;  %v5826_v62 = vshll.u32 %v9787_v21, 16  ;;  %v4339_v60 = vld [vmem:[#allocation3 + $0x8c] sm:$0x1] }
 0x2df   : > { %4344 = vst [vmem:[#allocation3 + $0x90] sm:$0xf] %v4343_v52  ;;  %v4123_v4 = vshrl.u32 %v7179_v46, 16  ;;  %v5824_v24 = vor.u32 %v5823_v12, %v5819_v51  ;;  %v4126_v11 = vshll.u32 %v7179_v46, 16  ;;  %v4821_v21 = vshll.u32 %v9811_v9, 16 }
 0x2e0   : > { %5038 = vrot.lane.b32.xlu0 %v5002_v33, %s7645_s20  ;;  %v4336_v7 = vsel %vm8082_vm1, %v4120_v27, %v4335_v42  ;;  %v4145_v8 = vor.u32 %v4143_v48, %v4142_v22  ;;  %v4147_v61 = vrot.slane %v4142_v22, 4  ;;  %v4826_v33 = vshll.u32 %v9791_v44, 16 }
 0x2e1   : > { %4337 = vst [vmem:[#allocation3 + $0x84] sm:$0xf] %v4336_v7  ;;  %v4125_v30 = vrot.slane %v4123_v4, 7  ;;  %v9875_v29 = vpop.permute.xlu1 %5136  ;;  %v4121_v14 = vrot.slane %v4117_v40, 4  ;;  %v5309_v3 = vshll.u32 %v9819_v1, 16  ;;  %v5314_v44 = vshll.u32 %v9836_v63, 16 }
 0x2e2   : > { %v9873_v58 = vpop.permute.xlu0 %5646  ;;  %5036 = vrot.lane.b32.xlu1 %v4999_v41, %s7645_s20  ;;  %v4146_v17 = vsel %vm7904_vm12, %v4138_v38, %v4145_v8  ;;  %v4347_v18 = vsel %vm8068_vm14, %v4147_v61, %v4346_v26  ;;  %v4823_v41 = vrot.slane %v4821_v21, 1  ;;  %v6080_v40 = vsel %vm6074_vm0, %v9384_v36, %v4895_v5 }
 0x2e3   : > { %4345 = vst.msk [vmem:[#allocation3 + $0x94] sm:$0xf] %vm929_vm15, %v4146_v17  ;;  %4348 = vst [vmem:[#allocation3 + $0x98] sm:$0x1] %v4347_v18  ;;  %v4128_v12 = vor.u32 %v4126_v11, %v4125_v30  ;;  %v4130_v42 = vrot.slane %v4125_v30, 4  ;;  %v5828_v46 = vrot.slane %v5826_v62, 1 }
 0x2e4   : > { %6056 = vrot.lane.b32.xlu0 %v9845_v54, %s7651_s26  ;;  %v4828_v51 = vrot.slane %v4826_v33, 1  ;;  %v5809_v52 = vshll.u32 %v9825_v16, 16  ;;  %v4824_v54 = vor.u32 %v4823_v41, %v4819_v31  ;;  %v5814_v63 = vshll.u32 %v9807_v50, 16 }
 0x2e5   : > { %v4129_v27 = vsel %vm7904_vm12, %v4121_v14, %v4128_v12  ;;  %v4340_v22 = vsel %vm8068_vm14, %v4130_v42, %v4339_v60  ;;  %v4893_v38 = vpop.permute.xlu1 %4892  ;;  %v5311_v26 = vrot.slane %v5309_v3, 1  ;;  %v5307_v50 = vshrl.u32 %v9819_v1, 16 }
 0x2e6   : > { %v5403_v48 = vpop.permute.xlu0 %5402  ;;  %5420 = vrot.lane.b32.xlu1 %v5329_v2, %s7646_s21  ;;  %4338 = vst.msk [vmem:[#allocation3 + $0x88] sm:$0xf] %vm929_vm15, %v4129_v27  ;;  %4341 = vst [vmem:[#allocation3 + $0x8c] sm:$0x1] %v4340_v22  ;;  %v6078_v5 = vsel %vm6074_vm0, %v9394_v35, %v4893_v38  ;;  %v5811_v4 = vrot.slane %v5809_v52, 1  ;;  %v5316_v31 = vrot.slane %v5314_v44, 1  ;;  %v4829_v35 = vsel %vm1933_vm2, %v4824_v54, %v4828_v51 }
 0x2e7   : > { %v6173_v36 = vsel %vm3344_vm10, %v9796_v28, %v5403_v48  ;;  %v6110_v2 = vsel %vm3311_vm9, %v6078_v5, %v9815_v19  ;;  %v4526_v8 = vld [vmem:[#allocation3 + $0x90] sm:$0xf]  ;;  %v5807_v61 = vshrl.u32 %v9825_v16, 16  ;;  %v4809_v11 = vshll.u32 %v9834_v45, 16 }
 0x2e8   : > { %v6206_v62 = vsel %vm6204_vm5, %v6173_v36, %v9851_v47  ;;  %5546 = vrot.lane.b32.xlu0 %v5508_v23, %s7654_s25  ;;  %v6143_v7 = vsel %vm6139_vm4, %v6110_v2, %v9764_v57  ;;  %v4463_v23 = vld [vmem:[#allocation3 + $0x90] sm:$0xf]  ;;  %v5816_v57 = vrot.slane %v5814_v63, 1  ;;  %v5829_v16 = vsel %vm1933_vm2, %v5824_v24, %v5828_v46  ;;  %v4461_v60 = vld [vmem:[#allocation3 + $0x84] sm:$0xf] }
 0x2e9   : > { %v6238_v28 = vsel %vm3377_vm11, %v6206_v62, %v9762_v53  ;;  %v6175_v19 = vsel %vm3344_vm10, %v6143_v7, %v9849_v10  ;;  %v5645_v30 = vpop.permute.xlu1 %5644  ;;  %v4500_v53 = vld [vmem:[#allocation3 + $0x90] sm:$0xe]  ;;  %v5312_v10 = vor.u32 %v5311_v26, %v5307_v50  ;;  %v5812_v17 = vor.u32 %v5811_v4, %v5807_v61  ;;  %v4563_v12 = vld [vmem:[#allocation3 + $0x84] sm:$0xe] }
 0x2ea   : > { %v5135_v47 = vpop.permute.xlu0 %5134  ;;  %v6271_v1 = vsel %vm6269_vm6, %v6238_v28, %v9860_v32  ;;  %4910 = vrot.lane.b32.xlu1 %v4829_v35, %s7644_s19  ;;  %v9924_v33 = vld [vmem:[#allocation3 + $0x94] sm:$0xf]  ;;  %v4807_v3 = vshrl.u32 %v9834_v45, 16  ;;  %v6208_v24 = vsel %vm6204_vm5, %v6175_v19, %v9785_v55  ;;  %v4814_v42 = vshll.u32 %v9828_v0, 16  ;;  %v4499_v41 = vld [vmem:[#allocation3 + $0x84] sm:$0xe] }
 0x2eb   : > { %v6303_v21 = vsel %vm3410_vm13, %v6271_v1, %v9800_v59  ;;  %v4464_v14 = vld [vmem:[#allocation3 + $0x94] sm:$0xf]  ;;  %v9929_v32 = vcombine.low %v4526_v8, %v9924_v33  ;;  %v4811_v59 = vrot.slane %v4809_v11, 1  ;;  %v9937_v44 = vld [vmem:[#allocation3 + $0x98] ss:$0 sps:$4 sm:$0x11]   ;;  %v6112_v51 = vsel %vm3311_vm9, %v6080_v40, %v9823_v13 }
 0x2ec   : > { %7296 = vmatprep.mubr.msk.bf16.mxu1 %vm6361_vm7, %v6303_v21  ;;  %5930 = vrot.lane.b32.xlu0 %v5829_v16, %s7655_s28  ;;  %v9931_v18 = vcombine.low %v4463_v23, %v4464_v14  ;;  %v7079_v46 = vcombine.low %v4500_v53, %v4464_v14  ;;  %v9947_v55 = vld [vmem:[#allocation3 + $0x90] sm:$0xe]  ;;  %v9950_v0 = vsel %vm6139_vm4, %v6112_v51, %v5135_v47  ;;  %v4816_v26 = vrot.slane %v4814_v42, 1  ;;  %v4524_v4 = vld [vmem:[#allocation3 + $0x84] sm:$0xf] }
 0x2ed   : > { %v9943_v27 = vpop.permute.xlu1 %5536  ;;  %v4462_v22 = vld [vmem:[#allocation3 + $0x88] sm:$0xf]  ;;  %v4812_v48 = vor.u32 %v4811_v59, %v4807_v3  ;;  %v5317_v54 = vsel %vm1933_vm2, %v5312_v10, %v5316_v31  ;;  %v9953_v36 = vld [vmem:[#allocation3 + $0x8c] ss:$0 sps:$4 sm:$0x11]   ;;  %v9956_v40 = vsel %vm3377_vm11, %v6208_v24, %v5645_v30  ;;  %v5817_v5 = vsel %vm1933_vm2, %v5812_v17, %v5816_v57 }
 0x2ee   : > { %v9941_v52 = vpop.permute.xlu0 %6046  ;;  %5152 = vrot.lane.b32.xlu1 %v9931_v18, %s7653_s24  ;;  %v4525_v38 = vld [vmem:[#allocation3 + $0x88] sm:$0xf]  ;;  %v7046_v63 = vcombine.low %v4461_v60, %v4462_v22  ;;  %v7587_v62 = vld [vmem:[#allocation3 + $0x8c] ss:$0 sps:$4 sm:$0x11]   ;;  %v7078_v2 = vcombine.low %v4499_v41, %v4462_v22  ;;  %v5515_v31 = vrot.slane %v7079_v46, 1  ;;  %v7126_v61 = vcombine.low %v9947_v55, %v9924_v33 }
 0x2ef   : > { %v7125_v13 = vcombine.low %v4563_v12, %v4525_v38  ;;  %v9961_v50 = vld [vmem:[#allocation3 + $0x98] ss:$0 sps:$4 sm:$0x11]   ;;  %v9963_v7 = vcombine.low %v4524_v4, %v4525_v38  ;;  %v5516_v28 = vrot.slane %v9937_v44, 1  ;;  %v4400_v35 = vld [vmem:[#allocation3 + $0x88] sm:$0xf]  ;;  %v4817_v30 = vsel %vm1933_vm2, %v4812_v48, %v4816_v26 }
 0x2f0   : > { %5662 = vrot.lane.b32.xlu0 %v9929_v32, %s7647_s22  ;;  %v4436_v8 = vld [vmem:[#allocation3 + $0x84] sm:$0xe]  ;;  %v5333_v23 = vshll.u32 %v7046_v63, 16  ;;  %v5843_v57 = vshrl.u32 %v9929_v32, 16  ;;  %v6022_v53 = vrot.slane %v9953_v36, 1  ;;  %v5512_v21 = vrot.slane %v7078_v2, 1 }
 0x2f1   : > { %v9970_v19 = vpop.permute.xlu1 %5024  ;;  %v6021_v1 = vrot.slane %v7125_v13, 1  ;;  %v7284_v11 = vpop.f32.mrf.mxu0  ;;  %v5331_v16 = vshrl.u32 %v7046_v63, 16  ;;  %v9976_v14 = vld [vmem:[#allocation3 + $0x8c] ss:$0 sps:$4 sm:$0x11]   ;;  %v7031_v10 = vcombine.low %v4436_v8, %v4400_v35  ;;  %v5513_v60 = vrot.slane %v7587_v62, 1 }
 0x2f2   : > { %v9968_v47 = vpop.permute.xlu0 %5026  ;;  %5928 = vrot.lane.b32.xlu1 %v5817_v5, %s7655_s28  ;;  %v3794_v17 = vadd.f32 %v9689_v20, %v7284_v11  ;;  %v5335_v3 = vrot.slane %v5333_v23, 1  ;;  %v5845_v59 = vshll.u32 %v9929_v32, 16  ;;  %v5517_v24 = vsel %vm2206_vm3, %v5515_v31, %v5516_v28 }
 0x2f3   : > { %v3785_v12 = vpop.f32.mrf.mxu0  ;;  %v5338_v42 = vshll.u32 %v7587_v62, 16  ;;  %v5003_v41 = vrot.slane %v7031_v10, 1  ;;  %v5004_v46 = vrot.slane %v9976_v14, 1  ;;  %v5850_v32 = vshll.u32 %v9961_v50, 16 }
 0x2f4   : > { %5418 = vrot.lane.b32.xlu0 %v5317_v54, %s7646_s21  ;;  %v3842_v51 = vmax.f32 %v3794_v17, 0.0  ;;  %v3786_v48 = vadd.f32 %v9689_v20, %v3785_v12  ;;  %v4399_v54 = vld [vmem:[#allocation3 + $0x84] sm:$0xf]  ;;  %v5847_v13 = vrot.slane %v5845_v59, 1  ;;  %v6023_v26 = vsel %vm2206_vm3, %v6021_v1, %v6022_v53 }
 0x2f5   : > { %v9986_v38 = vpop.permute.xlu1 %5408  ;;  %v7285_v5 = vpop.f32.mrf.mxu0  ;;  %v5336_v4 = vor.u32 %v5335_v3, %v5331_v16  ;;  %v9991_v62 = vcombine.low %v4399_v54, %v4400_v35  ;;  %v5345_v2 = vshll.u32 %v9931_v18, 16  ;;  %v5340_v11 = vrot.slane %v5338_v42, 1 }
 0x2f6   : > { %v9983_v22 = vpop.permute.xlu0 %6044  ;;  %4908 = vrot.lane.b32.xlu1 %v4817_v30, %s7644_s19  ;;  %v7184_v31 = vpack.c.bf16 %v3842_v51, %v3842_v51  ;;  %v3840_v28 = vmax.f32 %v3786_v48, 0.0  ;;  %v3797_v8 = vadd.f32 %v9689_v20, %v7285_v5  ;;  %v5514_v30 = vsel %vm2206_vm3, %v5512_v21, %v5513_v60  ;;  %v4356_v48 = vld [vmem:[#allocation3 + $0xa8] sm:$0xf] }
 0x2f7   : > { %v3788_v23 = vpop.f32.mrf.mxu0  ;;  %v5005_v10 = vsel %vm2206_vm3, %v5003_v41, %v5004_v46  ;;  %v5848_v17 = vor.u32 %v5847_v13, %v5843_v57  ;;  %v5347_v59 = vrot.slane %v5345_v2, 1  ;;  %v5852_v3 = vrot.slane %v5850_v32, 1 }
 0x2f8   : > { %5150 = vrot.lane.b32.xlu0 %v7046_v63, %s7653_s24  ;;  %v4166_v1 = vshrl.u32 %v7184_v31, 16  ;;  %v7182_v53 = vpack.c.bf16 %v3840_v28, %v3840_v28  ;;  %v3843_v35 = vmax.f32 %v3797_v8, 0.0  ;;  %v3789_v63 = vadd.f32 %v9689_v20, %v3788_v23 }
 0x2f9   : > { %v5341_v12 = vsel %vm1933_vm2, %v5336_v4, %v5340_v11  ;;  %v5343_v21 = vshrl.u32 %v9931_v18, 16  ;;  %v5350_v60 = vshll.u32 %v9937_v44, 16  ;;  %v4169_v57 = vshll.u32 %v7184_v31, 16  ;;  %v10006_v51 = vpop.permute.xlu1 %4898  ;;  %v4349_v31 = vld [vmem:[#allocation3 + $0x9c] sm:$0xf] }
 0x2fa   : > { %v9998_v16 = vpop.permute.xlu0 %5534  ;;  %5660 = vrot.lane.b32.xlu1 %v9963_v7, %s7647_s22  ;;  %v4168_v42 = vrot.slane %v4166_v1, 7  ;;  %v4149_v41 = vshrl.u32 %v7182_v53, 16  ;;  %v7185_v46 = vpack.c.bf16 %v3843_v35, %v3843_v35  ;;  %v3841_v54 = vmax.f32 %v3789_v63, 0.0 }
 0x2fb   : > { %v10010_v13 = vsel %vm1933_vm2, %v5848_v17, %v5852_v3  ;;  %v5348_v20 = vor.u32 %v5347_v59, %v5343_v21  ;;  %v10015_v18 = vrot.slane %v7126_v61, 1  ;;  %v4152_v5 = vshll.u32 %v7182_v53, 16  ;;  %v4360_v59 = vld [vmem:[#allocation3 + $0xb0] sm:$0x1] }
 0x2fc   : > { %6060 = vrot.lane.b32.xlu0 %v6023_v26, %s7651_s26  ;;  %v4171_v44 = vor.u32 %v4169_v57, %v4168_v42  ;;  %v4151_v32 = vrot.slane %v4149_v41, 7  ;;  %v4174_v4 = vshrl.u32 %v7185_v46, 16  ;;  %v4172_v26 = vrot.slane %v4168_v42, 4 }
 0x2fd   : > { %v7183_v28 = vpack.c.bf16 %v3841_v54, %v3841_v54  ;;  %v5352_v8 = vrot.slane %v5350_v60, 1  ;;  %v6025_v23 = vrot.slane %v9961_v50, 1  ;;  %v4177_v61 = vshll.u32 %v7185_v46, 16 }
 0x2fe   : > { %v10017_v2 = vpop.permute.xlu0 %5918  ;;  %5552 = vrot.lane.b32.xlu1 %v5517_v24, %s7654_s25  ;;  %v4357_v11 = vsel %vm8082_vm1, %v4171_v44, %v4356_v48  ;;  %v4154_v33 = vor.u32 %v4152_v5, %v4151_v32  ;;  %v4176_v55 = vrot.slane %v4174_v4, 7  ;;  %v5833_v35 = vshll.u32 %v9963_v7, 16  ;;  %v10036_v48 = vld [vmem:[#allocation3 + $0x94] sm:$0xf]  ;;  %v4353_v5 = vld [vmem:[#allocation3 + $0xa4] sm:$0x1] }
 0x2ff   : > { %4358 = vst [vmem:[#allocation3 + $0xa8] sm:$0xf] %v4357_v11  ;;  %v4157_v1 = vshrl.u32 %v7183_v28, 16  ;;  %v4160_v24 = vshll.u32 %v7183_v28, 16  ;;  %v5353_v53 = vsel %vm1933_vm2, %v5348_v20, %v5352_v8  ;;  %v5831_v57 = vshrl.u32 %v9963_v7, 16 }
 0x300   : > { %5550 = vrot.lane.b32.xlu0 %v5514_v30, %s7654_s25  ;;  %v10024_v17 = vpop.permute.xlu1 %5140  ;;  %v4350_v3 = vsel %vm8082_vm1, %v4154_v33, %v4349_v31  ;;  %v4179_v63 = vor.u32 %v4177_v61, %v4176_v55  ;;  %v4181_v21 = vrot.slane %v4176_v55, 4  ;;  %v5838_v30 = vshll.u32 %v9953_v36, 16  ;;  %v4401_v28 = vld [vmem:[#allocation3 + $0x90] sm:$0xf] }
 0x301   : > { %4351 = vst [vmem:[#allocation3 + $0x9c] sm:$0xf] %v4350_v3  ;;  %v4159_v42 = vrot.slane %v4157_v1, 7  ;;  %v5835_v41 = vrot.slane %v5833_v35, 1  ;;  %v4833_v46 = vshll.u32 %v9991_v62, 16  ;;  %v4155_v54 = vrot.slane %v4151_v32, 4 }
 0x302   : > { %v10030_v60 = vpop.permute.xlu0 %5650  ;;  %5040 = vrot.lane.b32.xlu1 %v5005_v10, %s7645_s20  ;;  %v4180_v20 = vsel %vm7904_vm12, %v4172_v26, %v4179_v63  ;;  %v4361_v44 = vsel %vm8068_vm14, %v4181_v21, %v4360_v59  ;;  %v4831_v10 = vshrl.u32 %v9991_v62, 16  ;;  %v10047_v26 = vld [vmem:[#allocation3 + $0x98] ss:$0 sps:$4 sm:$0x11]   ;;  %v5840_v11 = vrot.slane %v5838_v30, 1 }
 0x303   : > { %4359 = vst.msk [vmem:[#allocation3 + $0xac] sm:$0xf] %vm929_vm15, %v4180_v20  ;;  %4362 = vst [vmem:[#allocation3 + $0xb0] sm:$0x1] %v4361_v44  ;;  %v4162_v7 = vor.u32 %v4160_v24, %v4159_v42  ;;  %v4164_v4 = vrot.slane %v4159_v42, 4  ;;  %v5836_v31 = vor.u32 %v5835_v41, %v5831_v57  ;;  %v4835_v33 = vrot.slane %v4833_v46, 1 }
 0x304   : > { %5422 = vrot.lane.b32.xlu0 %v5341_v12, %s7646_s21  ;;  %v5917_v36 = vpop.permute.xlu1 %5916  ;;  %v10053_v55 = vcombine.low %v4401_v28, %v10036_v48  ;;  %v4838_v1 = vshll.u32 %v9976_v14, 16  ;;  %v4850_v63 = vshll.u32 %v10047_v26, 16  ;;  %v4437_v41 = vld [vmem:[#allocation3 + $0x90] sm:$0xe]  ;;  %v6084_v50 = vsel %vm6074_vm0, %v9483_v37, %v10006_v51 }
 0x305   : > { %v6273_v32 = vsel %vm6269_vm6, %v9956_v40, %v5917_v36  ;;  %v4163_v61 = vsel %vm7904_vm12, %v4155_v54, %v4162_v7  ;;  %v4354_v40 = vsel %vm8068_vm14, %v4164_v4, %v4353_v5  ;;  %v4836_v3 = vor.u32 %v4835_v33, %v4831_v10 }
 0x306   : > { %v5407_v8 = vpop.permute.xlu0 %5406  ;;  %5424 = vrot.lane.b32.xlu1 %v5353_v53, %s7646_s21  ;;  %v6305_v12 = vsel %vm3410_vm13, %v6273_v32, %v9983_v22  ;;  %4352 = vst.msk [vmem:[#allocation3 + $0xa0] sm:$0xf] %vm929_vm15, %v4163_v61  ;;  %4355 = vst [vmem:[#allocation3 + $0xa4] sm:$0x1] %v4354_v40  ;;  %v5841_v53 = vsel %vm1933_vm2, %v5836_v31, %v5840_v11  ;;  %v4845_v35 = vshll.u32 %v10053_v55, 16  ;;  %v4840_v42 = vrot.slane %v4838_v1, 1 }
 0x307   : > { %v6177_v59 = vsel %vm3344_vm10, %v9950_v0, %v5407_v8  ;;  %7297 = vmatmul.mubr.msk.bf16.vlgmr.msra.gmra.mxu1 %vm6361_vm7, %v6305_v12  ;;  %v4843_v46 = vshrl.u32 %v10053_v55, 16  ;;  %v4852_v54 = vrot.slane %v4850_v63, 1  ;;  %v4467_v11 = vld [vmem:[#allocation3 + $0xa8] sm:$0xf]  ;;  %v5007_v33 = vrot.slane %v10047_v26, 1 }
 0x308   : > { %v6210_v22 = vsel %vm6204_vm5, %v6177_v59, %v9998_v16  ;;  %5934 = vrot.lane.b32.xlu0 %v10010_v13, %s7655_s28  ;;  %v4897_v24 = vpop.permute.xlu1 %4896  ;;  %v6026_v13 = vsel %vm2206_vm3, %v10015_v18, %v6025_v23  ;;  %v4847_v57 = vrot.slane %v4845_v35, 1  ;;  %v4565_v23 = vld [vmem:[#allocation3 + $0x9c] sm:$0xe] }
 0x309   : > { %v6242_v0 = vsel %vm3377_vm11, %v6210_v22, %v9873_v58  ;;  %v6082_v14 = vsel %vm6074_vm0, %v9494_v34, %v4897_v24  ;;  %v4465_v20 = vld [vmem:[#allocation3 + $0x9c] sm:$0xf] }
 0x30a   : > { %v5139_v21 = vpop.permute.xlu0 %5138  ;;  %v6114_v16 = vsel %vm3311_vm9, %v6082_v14, %v9970_v19  ;;  %5932 = vrot.lane.b32.xlu1 %v5841_v53, %s7655_s28  ;;  %v6275_v58 = vsel %vm6269_vm6, %v6242_v0, %v10017_v2  ;;  %v4841_v2 = vsel %vm1933_vm2, %v4836_v3, %v4840_v42  ;;  %v4403_v37 = vld [vmem:[#allocation3 + $0x9c] sm:$0xf]  ;;  %v10101_v51 = vld [vmem:[#allocation3 + $0xac] sm:$0xf]  ;;  %v4848_v36 = vor.u32 %v4847_v57, %v4843_v46  ;;  %v4530_v3 = vld [vmem:[#allocation3 + $0xa8] sm:$0xf] }
 0x30b   : > { %v6147_v34 = vsel %vm6139_vm4, %v6114_v16, %v9875_v29  ;;  %v6307_v30 = vsel %vm3410_vm13, %v6275_v58, %v9941_v52  ;;  %v7032_v29 = vcombine.low %v4437_v41, %v10036_v48  ;;  %v4528_v52 = vld [vmem:[#allocation3 + $0x9c] sm:$0xf]  ;;  %v10136_v14 = vcombine.low %v4467_v11, %v10101_v51 }
 0x30c   : > { %6062 = vrot.lane.b32.xlu0 %v6026_v13, %s7651_s26  ;;  %7300 = vmatprep.mubr.msk.bf16.mxu1 %vm6361_vm7, %v6307_v30  ;;  %v6179_v19 = vsel %vm3344_vm10, %v6147_v34, %v9986_v38  ;;  %v5649_v18 = vpop.permute.xlu1 %5648  ;;  %v6116_v38 = vsel %vm3311_vm9, %v6084_v50, %v9968_v47  ;;  %v10116_v47 = vld [vmem:[#allocation3 + $0xac] sm:$0xf]  ;;  %v4853_v35 = vsel %vm1933_vm2, %v4848_v36, %v4852_v54  ;;  %v10142_v34 = vld [vmem:[#allocation3 + $0xa8] sm:$0xe]  ;;  %v4438_v54 = vld [vmem:[#allocation3 + $0x9c] sm:$0xe] }
 0x30d   : > { %v6212_v48 = vsel %vm6204_vm5, %v6179_v19, %v9943_v27  ;;  %v4529_v5 = vld [vmem:[#allocation3 + $0xa0] sm:$0xf]  ;;  %v7596_v32 = vld [vmem:[#allocation3 + $0xa4] ss:$0 sps:$4 sm:$0x11]   ;;  %v5006_v28 = vrot.slane %v7032_v29, 1  ;;  %v10119_v27 = vsel %vm6139_vm4, %v6116_v38, %v5139_v21  ;;  %v10149_v50 = vcombine.low %v4530_v3, %v10116_v47 }
 0x30e   : > { %v10098_v44 = vpop.permute.xlu0 %6050  ;;  %4912 = vrot.lane.b32.xlu1 %v4841_v2, %s7644_s19  ;;  %v10107_v10 = vld [vmem:[#allocation3 + $0xa0] sm:$0xf]  ;;  %v7095_v4 = vcombine.low %v4528_v52, %v4529_v5  ;;  %v7127_v31 = vcombine.low %v4565_v23, %v4529_v5  ;;  %v10125_v40 = vld [vmem:[#allocation3 + $0xa4] ss:$0 sps:$4 sm:$0x11]   ;;  %v10128_v59 = vsel %vm3377_vm11, %v6212_v48, %v5649_v18  ;;  %v6028_v24 = vrot.slane %v7596_v32, 1 }
 0x30f   : > { %v10112_v8 = vcombine.low %v4465_v20, %v10107_v10  ;;  %v10114_v12 = vld [vmem:[#allocation3 + $0xa0] sm:$0xf]  ;;  %v5862_v0 = vshll.u32 %v7596_v32, 16  ;;  %v5008_v42 = vsel %vm2206_vm3, %v5006_v28, %v5007_v33  ;;  %v10146_v41 = vld [vmem:[#allocation3 + $0xa4] ss:$0 sps:$4 sm:$0x11]   ;;  %v7081_v19 = vcombine.low %v10142_v34, %v10101_v51 }
 0x310   : > { %v10109_v7 = vpop.permute.xlu1 %5540  ;;  %v10123_v61 = vcombine.low %v4403_v37, %v10114_v12  ;;  %v6027_v22 = vrot.slane %v7127_v31, 1  ;;  %v5857_v53 = vshll.u32 %v7095_v4, 16  ;;  %v5855_v16 = vshrl.u32 %v7095_v4, 16  ;;  %v10153_v18 = vld [vmem:[#allocation3 + $0xa8] sm:$0xe] }
 0x311   : > { %v5357_v58 = vshll.u32 %v10112_v8, 16  ;;  %v7634_v2 = vld [vmem:[%s10590_s3] ss:$0 sm:$0xff]  ;;  %v4862_v46 = vshll.u32 %v10125_v40, 16  ;;  %v4501_v20 = vld [vmem:[#allocation3 + $0x9c] sm:$0xe]  ;;  %v7128_v37 = vcombine.low %v10153_v18, %v10116_v47 }
 0x312   : > { %v10130_v1 = vpop.permute.xlu0 %5030  ;;  %5664 = vrot.lane.b32.xlu1 %v7095_v4, %s7647_s22  ;;  %v4857_v26 = vshll.u32 %v10123_v61, 16  ;;  %v6029_v63 = vsel %vm2206_vm3, %v6027_v22, %v6028_v24  ;;  %v5859_v13 = vrot.slane %v5857_v53, 1  ;;  %v5864_v48 = vrot.slane %v5862_v0, 1  ;;  %v4405_v34 = vld [vmem:[#allocation3 + $0xa8] sm:$0xf] }
 0x313   : > { %6064 = vrot.lane.b32.xlu0 %v6029_v63, %s7651_s26  ;;  %v4855_v5 = vshrl.u32 %v10123_v61, 16  ;;  %v5359_v36 = vrot.slane %v5357_v58, 1  ;;  %v7033_v4 = vcombine.low %v4438_v54, %v10114_v12  ;;  %v7080_v11 = vcombine.low %v4501_v20, %v10107_v10 }
 0x314   : > { %v10139_v21 = vpop.permute.xlu1 %5028  ;;  %v7288_v30 = vpop.f32.mrf.mxu0  ;;  %v4859_v57 = vrot.slane %v4857_v26, 1  ;;  %v5860_v23 = vor.u32 %v5859_v13, %v5855_v16  ;;  %v5367_v33 = vshrl.u32 %v10136_v14, 16  ;;  %v5362_v0 = vshll.u32 %v10146_v41, 16 }
 0x315   : > { %v3810_v52 = vadd.f32 %v7634_v2, %v7288_v30  ;;  %v4864_v10 = vrot.slane %v4862_v46, 1  ;;  %v5009_v58 = vrot.slane %v7033_v4, 1  ;;  %v5010_v30 = vrot.slane %v10125_v40, 1 }
 0x316   : > { %v10155_v29 = vpop.permute.xlu0 %6048  ;;  %4914 = vrot.lane.b32.xlu1 %v4853_v35, %s7644_s19  ;;  %v3801_v38 = vpop.f32.mrf.mxu0  ;;  %v5865_v24 = vsel %vm1933_vm2, %v5860_v23, %v5864_v48  ;;  %v4860_v53 = vor.u32 %v4859_v57, %v4855_v5  ;;  %v5355_v35 = vshrl.u32 %v10112_v8, 16  ;;  %v5518_v20 = vrot.slane %v7080_v11, 1  ;;  %v4370_v11 = vld [vmem:[#allocation3 + $0xc0] sm:$0xf] }
 0x317   : > { %v3846_v32 = vmax.f32 %v3810_v52, 0.0  ;;  %v3802_v31 = vadd.f32 %v7634_v2, %v3801_v38  ;;  %5042 = vrot.lane.b32.xlu0 %v5008_v42, %s7645_s20  ;;  %v5369_v42 = vshll.u32 %v10136_v14, 16  ;;  %v5364_v46 = vrot.slane %v5362_v0, 1 }
 0x318   : > { %v10166_v28 = vpop.permute.xlu1 %5412  ;;  %v7289_v22 = vpop.f32.mrf.mxu0  ;;  %v5360_v13 = vor.u32 %v5359_v36, %v5355_v35  ;;  %v4865_v48 = vsel %vm1933_vm2, %v4860_v53, %v4864_v10  ;;  %v5519_v5 = vrot.slane %v10146_v41, 1  ;;  %v10185_v36 = vld [vmem:[#allocation3 + $0xb0] ss:$0 sps:$4 sm:$0x11]   ;;  %v5869_v53 = vshll.u32 %v10149_v50, 16 }
 0x319   : > { %v7188_v26 = vpack.c.bf16 %v3846_v32, %v3846_v32  ;;  %v3844_v12 = vmax.f32 %v3802_v31, 0.0  ;;  %v3813_v63 = vadd.f32 %v7634_v2, %v7289_v22 }
 0x31a   : > { %v10174_v3 = vpop.permute.xlu0 %5538  ;;  %5936 = vrot.lane.b32.xlu1 %v5865_v24, %s7655_s28  ;;  %v3804_v16 = vpop.f32.mrf.mxu0 }
 0x31b   : > { %v4200_v57 = vshrl.u32 %v7188_v26, 16  ;;  %v7186_v52 = vpack.c.bf16 %v3844_v12, %v3844_v12  ;;  %v3847_v23 = vmax.f32 %v3813_v63, 0.0  ;;  %5154 = vrot.lane.b32.xlu0 %v10112_v8, %s7653_s24  ;;  %v3805_v38 = vadd.f32 %v7634_v2, %v3804_v16 }
 0x31c   : > { %v10179_v54 = vpop.permute.xlu1 %4902  ;;  %v4203_v4 = vshll.u32 %v7188_v26, 16  ;;  %v5365_v8 = vsel %vm1933_vm2, %v5360_v13, %v5364_v46  ;;  %v5371_v2 = vrot.slane %v5369_v42, 1  ;;  %v4363_v26 = vld [vmem:[#allocation3 + $0xb4] sm:$0xf]  ;;  %v5011_v16 = vsel %vm2206_vm3, %v5009_v58, %v5010_v30 }
 0x31d   : > { %v4202_v40 = vrot.slane %v4200_v57, 7  ;;  %v4183_v32 = vshrl.u32 %v7186_v52, 16  ;;  %v7189_v31 = vpack.c.bf16 %v3847_v23, %v3847_v23  ;;  %v3845_v24 = vmax.f32 %v3805_v38, 0.0  ;;  %v10203_v46 = vld [vmem:[#allocation3 + $0xb0] ss:$0 sps:$4 sm:$0x11]  }
 0x31e   : > { %v10187_v22 = vpop.permute.xlu0 %5922  ;;  %4916 = vrot.lane.b32.xlu1 %v4865_v48, %s7644_s19  ;;  %v4186_v41 = vshll.u32 %v7186_v52, 16  ;;  %v5520_v57 = vsel %vm2206_vm3, %v5518_v20, %v5519_v5  ;;  %v5374_v23 = vshll.u32 %v10185_v36, 16  ;;  %v5372_v58 = vor.u32 %v5371_v2, %v5367_v33 }
 0x31f   : > { %v4205_v35 = vor.u32 %v4203_v4, %v4202_v40  ;;  %v4185_v0 = vrot.slane %v4183_v32, 7  ;;  %v4208_v12 = vshrl.u32 %v7189_v31, 16  ;;  %v7187_v10 = vpack.c.bf16 %v3845_v24, %v3845_v24  ;;  %5426 = vrot.lane.b32.xlu0 %v5365_v8, %s7646_s21  ;;  %v4374_v4 = vld [vmem:[#allocation3 + $0xc8] sm:$0x1] }
 0x320   : > { %v10192_v63 = vpop.permute.xlu1 %5144  ;;  %v4211_v48 = vshll.u32 %v7189_v31, 16  ;;  %v5867_v30 = vshrl.u32 %v10149_v50, 16  ;;  %v5871_v20 = vrot.slane %v5869_v53, 1  ;;  %v4206_v5 = vrot.slane %v4202_v40, 4 }
 0x321   : > { %v4371_v13 = vsel %vm8082_vm1, %v4205_v35, %v4370_v11  ;;  %v4188_v42 = vor.u32 %v4186_v41, %v4185_v0  ;;  %v4210_v38 = vrot.slane %v4208_v12, 7  ;;  %v4191_v32 = vshrl.u32 %v7187_v10, 16 }
 0x322   : > { %v10200_v52 = vpop.permute.xlu0 %5654  ;;  %5044 = vrot.lane.b32.xlu1 %v5011_v16, %s7645_s20  ;;  %4372 = vst [vmem:[#allocation3 + $0xc0] sm:$0xf] %v4371_v13  ;;  %v4194_v41 = vshll.u32 %v7187_v10, 16  ;;  %v5376_v16 = vrot.slane %v5374_v23, 1  ;;  %v4189_v10 = vrot.slane %v4185_v0, 4  ;;  %v5521_v0 = vrot.slane %v7081_v19, 1 }
 0x323   : > { %v4364_v11 = vsel %vm8082_vm1, %v4188_v42, %v4363_v26  ;;  %v4213_v24 = vor.u32 %v4211_v48, %v4210_v38  ;;  %v4215_v8 = vrot.slane %v4210_v38, 4  ;;  %v4193_v35 = vrot.slane %v4191_v32, 7  ;;  %5554 = vrot.lane.b32.xlu0 %v5520_v57, %s7654_s25 }
 0x324   : > { %v5921_v31 = vpop.permute.xlu1 %5920  ;;  %4365 = vst [vmem:[#allocation3 + $0xb4] sm:$0xf] %v4364_v11  ;;  %v5874_v26 = vshll.u32 %v10203_v46, 16  ;;  %v5377_v42 = vsel %vm1933_vm2, %v5372_v58, %v5376_v16  ;;  %v6031_v32 = vrot.slane %v10203_v46, 1 }
 0x325   : > { %v6277_v12 = vsel %vm6269_vm6, %v10128_v59, %v5921_v31  ;;  %v4214_v33 = vsel %vm7904_vm12, %v4206_v5, %v4213_v24  ;;  %v4375_v40 = vsel %vm8068_vm14, %v4215_v8, %v4374_v4  ;;  %v4196_v59 = vor.u32 %v4194_v41, %v4193_v35  ;;  %v4406_v4 = vld [vmem:[#allocation3 + $0xac] sm:$0xf]  ;;  %v7616_v11 = vld [vmem:[#allocation3 + $0xb0] ss:$0 sps:$4 sm:$0x11]  }
 0x326   : > { %v5411_v2 = vpop.permute.xlu0 %5410  ;;  %5156 = vrot.lane.b32.xlu1 %v10136_v14, %s7653_s24  ;;  %v6309_v53 = vsel %vm3410_vm13, %v6277_v12, %v10155_v29  ;;  %4373 = vst.msk [vmem:[#allocation3 + $0xc4] sm:$0xf] %vm929_vm15, %v4214_v33  ;;  %4376 = vst [vmem:[#allocation3 + $0xc8] sm:$0x1] %v4375_v40  ;;  %v4198_v57 = vrot.slane %v4193_v35, 4  ;;  %v5872_v29 = vor.u32 %v5871_v20, %v5867_v30  ;;  %v5876_v6 = vrot.slane %v5874_v26, 1 }
 0x327   : > { %v6181_v23 = vsel %vm3344_vm10, %v10119_v27, %v5411_v2  ;;  %7301 = vmatmul.mubr.msk.bf16.gmra.mxu1 %vm6361_vm7, %v6309_v53  ;;  %v4197_v38 = vsel %vm7904_vm12, %v4189_v10, %v4196_v59  ;;  %5666 = vrot.lane.b32.xlu0 %v10149_v50, %s7647_s22  ;;  %v10255_v58 = vcombine.low %v4405_v34, %v4406_v4  ;;  %v4439_v30 = vld [vmem:[#allocation3 + $0xa8] sm:$0xe] }
 0x328   : > { %v6214_v13 = vsel %vm6204_vm5, %v6181_v23, %v10174_v3  ;;  %v4901_v14 = vpop.permute.xlu1 %4900  ;;  %v4368_v48 = vsel %vm8068_vm14, %v4198_v57, %v4367_v15  ;;  %v5522_v3 = vrot.slane %v10185_v36, 1  ;;  %4366 = vst.msk [vmem:[#allocation3 + $0xb8] sm:$0xf] %vm929_vm15, %v4197_v38  ;;  %v5877_v50 = vsel %vm1933_vm2, %v5872_v29, %v5876_v6 }
 0x329   : > { %v6246_v27 = vsel %vm3377_vm11, %v6214_v13, %v10030_v60  ;;  %4369 = vst [vmem:[#allocation3 + $0xbc] sm:$0x1] %v4368_v48  ;;  %v6030_v36 = vrot.slane %v7128_v37, 1  ;;  %v6086_v47 = vsel %vm6074_vm0, %v9594_v39, %v4901_v14  ;;  %v7034_v46 = vcombine.low %v4439_v30, %v4406_v4 }
 0x32a   : > { %v10240_v51 = vpop.permute.xlu0 %5142  ;;  %5428 = vrot.lane.b32.xlu1 %v5377_v42, %s7646_s21  ;;  %v6279_v43 = vsel %vm6269_vm6, %v6246_v27, %v10187_v22  ;;  %v5523_v22 = vsel %vm2206_vm3, %v5521_v0, %v5522_v3  ;;  %v4869_v8 = vshll.u32 %v10255_v58, 16  ;;  %v6118_v40 = vsel %vm3311_vm9, %v6086_v47, %v10139_v21 }
 0x32b   : > { %v6311_v60 = vsel %vm3410_vm13, %v6279_v43, %v10098_v44  ;;  %5938 = vrot.lane.b32.xlu0 %v5877_v50, %s7655_s28  ;;  %v4532_v20 = vld [vmem:[#allocation3 + $0xb4] sm:$0xf]  ;;  %v6032_v18 = vsel %vm2206_vm3, %v6030_v36, %v6031_v32  ;;  %v5012_v10 = vrot.slane %v7034_v46, 1  ;;  %v5013_v57 = vrot.slane %v7616_v11, 1 }
 0x32c   : > { %7304 = vmatprep.mubr.msk.bf16.mxu1 %vm6361_vm7, %v6311_v60  ;;  %v10249_v19 = vpop.permute.xlu1 %5652  ;;  %v4567_v5 = vld [vmem:[#allocation3 + $0xb4] sm:$0xe]  ;;  %v4871_v14 = vrot.slane %v4869_v8, 1  ;;  %v4874_v27 = vshll.u32 %v7616_v11, 16  ;;  %v4867_v60 = vshrl.u32 %v10255_v58, 16  ;;  %v6151_v36 = vsel %vm6139_vm4, %v6118_v40, %v10024_v17 }
 0x32d   : > { %v4469_v24 = vld [vmem:[#allocation3 + $0xb4] sm:$0xf]  ;;  %v5014_v32 = vsel %vm2206_vm3, %v5012_v10, %v5013_v57  ;;  %v10302_v47 = vld [vmem:[#allocation3 + $0xc4] sm:$0xf]  ;;  %v4471_v17 = vld [vmem:[#allocation3 + $0xc0] sm:$0xf] }
 0x32e   : > { %v10259_v44 = vpop.permute.xlu0 %6054  ;;  %5556 = vrot.lane.b32.xlu1 %v5523_v22, %s7654_s25  ;;  %v4407_v42 = vld [vmem:[#allocation3 + $0xb4] sm:$0xf]  ;;  %v4876_v46 = vrot.slane %v4874_v27, 1 }
 0x32f   : > { %6066 = vrot.lane.b32.xlu0 %v6032_v18, %s7651_s26  ;;  %v4533_v31 = vld [vmem:[#allocation3 + $0xb8] sm:$0xf]  ;;  %v10304_v18 = vld [vmem:[#allocation3 + $0xc4] sm:$0xf]  ;;  %v4503_v40 = vld [vmem:[#allocation3 + $0xb4] sm:$0xe] }
 0x330   : > { %v10265_v37 = vpop.permute.xlu1 %5544  ;;  %v10269_v35 = vld [vmem:[#allocation3 + $0xb8] sm:$0xf]  ;;  %v7097_v12 = vcombine.low %v4532_v20, %v4533_v31  ;;  %v7613_v16 = vld [vmem:[#allocation3 + $0xbc] ss:$0 sps:$4 sm:$0x11]   ;;  %v7129_v33 = vcombine.low %v4567_v5, %v4533_v31  ;;  %v4872_v20 = vor.u32 %v4871_v14, %v4867_v60  ;;  %v7051_v57 = vcombine.low %v4471_v17, %v10304_v18 }
 0x331   : > { %v7050_v39 = vcombine.low %v4469_v24, %v10269_v35  ;;  %v10276_v15 = vld [vmem:[#allocation3 + $0xb8] sm:$0xf]  ;;  %v6034_v26 = vrot.slane %v7613_v16, 1  ;;  %v5886_v13 = vshll.u32 %v7613_v16, 16  ;;  %v4534_v24 = vld [vmem:[#allocation3 + $0xc0] sm:$0xf] }
 0x332   : > { %v10271_v41 = vpop.permute.xlu0 %5034  ;;  %5668 = vrot.lane.b32.xlu1 %v7097_v12, %s7647_s22  ;;  %v6033_v53 = vrot.slane %v7129_v33, 1  ;;  %v5881_v59 = vshll.u32 %v7097_v12, 16  ;;  %v5879_v23 = vshrl.u32 %v7097_v12, 16  ;;  %v10285_v48 = vcombine.low %v4407_v42, %v10276_v15  ;;  %v10288_v3 = vld [vmem:[#allocation3 + $0xbc] ss:$0 sps:$4 sm:$0x11]  }
 0x333   : > { %v5381_v38 = vshll.u32 %v7050_v39, 16  ;;  %v5888_v6 = vrot.slane %v5886_v13, 1  ;;  %v10293_v34 = vld [vmem:[#allocation3 + $0xbc] ss:$0 sps:$4 sm:$0x11]   ;;  %v5379_v31 = vshrl.u32 %v7050_v39, 16  ;;  %v4877_v13 = vsel %vm1933_vm2, %v4872_v20, %v4876_v46 }
 0x334   : > { %v10279_v2 = vpop.permute.xlu1 %5032  ;;  %v6035_v0 = vsel %vm2206_vm3, %v6033_v53, %v6034_v26  ;;  %v5883_v21 = vrot.slane %v5881_v59, 1  ;;  %v4881_v50 = vshll.u32 %v10285_v48, 16  ;;  %v5386_v12 = vshll.u32 %v10288_v3, 16  ;;  %v4440_v10 = vld [vmem:[#allocation3 + $0xb4] sm:$0xe] }
 0x335   : > { %6068 = vrot.lane.b32.xlu0 %v6035_v0, %s7651_s26  ;;  %v5383_v5 = vrot.slane %v5381_v38, 1  ;;  %v4879_v16 = vshrl.u32 %v10285_v48, 16  ;;  %v4886_v33 = vshll.u32 %v10293_v34, 16  ;;  %v6183_v53 = vsel %vm3344_vm10, %v6151_v36, %v10166_v28  ;;  %v7626_v20 = vld [vmem:[#allocation3 + $0xc8] ss:$0 sps:$4 sm:$0x11]  }
 0x336   : > { %v10281_v29 = vpop.permute.xlu0 %6052  ;;  %v5884_v43 = vor.u32 %v5883_v21, %v5879_v23  ;;  %v4883_v11 = vrot.slane %v4881_v50, 1  ;;  %v7082_v26 = vcombine.low %v4503_v40, %v10269_v35  ;;  %v7098_v59 = vcombine.low %v4534_v24, %v10302_v47 }
 0x337   : > { %v5384_v14 = vor.u32 %v5383_v5, %v5379_v31  ;;  %v7035_v0 = vcombine.low %v4440_v10, %v10276_v15  ;;  %v6088_v28 = vsel %vm6074_vm0, %v9579_v25, %v10179_v54  ;;  %v6216_v35 = vsel %vm6204_vm5, %v6183_v53, %v10109_v7  ;;  %v4536_v7 = vld [vmem:[#allocation3 + $0xcc] sm:$0xf]  ;;  %v7627_v5 = vld [vmem:[#allocation3 + $0xc8] ss:$0 sps:$4 sm:$0x11]  }
 0x338   : > { %v10290_v4 = vpop.permute.xlu1 %5416  ;;  %v5889_v30 = vsel %vm1933_vm2, %v5884_v43, %v5888_v6  ;;  %v4884_v42 = vor.u32 %v4883_v11, %v4879_v16  ;;  %v5388_v38 = vrot.slane %v5386_v12, 1  ;;  %v4888_v27 = vrot.slane %v4886_v33, 1 }
 0x339   : > { %5046 = vrot.lane.b32.xlu0 %v5014_v32, %s7645_s20  ;;  %5940 = vrot.lane.b32.xlu1 %v5889_v30, %s7655_s28  ;;  %v5524_v43 = vrot.slane %v7082_v26, 1  ;;  %v5525_v6 = vrot.slane %v10288_v3, 1  ;;  %v5016_v15 = vrot.slane %v10293_v34, 1  ;;  %v5893_v60 = vshll.u32 %v7098_v59, 16  ;;  %v10337_v32 = vld [vmem:[#allocation3 + $0xd0] sm:$0xf] }
 0x33a   : > { %v10299_v22 = vpop.permute.xlu0 %5542  ;;  %v5389_v50 = vsel %vm1933_vm2, %v5384_v14, %v5388_v38  ;;  %v4889_v36 = vsel %vm1933_vm2, %v4884_v42, %v4888_v27  ;;  %v5015_v25 = vrot.slane %v7035_v0, 1  ;;  %v5393_v54 = vshll.u32 %v7051_v57, 16  ;;  %v4504_v0 = vld [vmem:[#allocation3 + $0xc0] sm:$0xe] }
 0x33b   : > { %v6120_v3 = vsel %vm3311_vm9, %v6088_v28, %v10130_v1  ;;  %v6248_v34 = vsel %vm3377_vm11, %v6216_v35, %v10249_v19  ;;  %v5526_v24 = vsel %vm2206_vm3, %v5524_v43, %v5525_v6  ;;  %v5895_v1 = vrot.slane %v5893_v60, 1 }
 0x33c   : > { %v10308_v8 = vpop.permute.xlu1 %4906  ;;  %v6153_v11 = vsel %vm6139_vm4, %v6120_v3, %v10240_v51  ;;  %v5017_v31 = vsel %vm2206_vm3, %v5015_v25, %v5016_v15  ;;  %v5395_v16 = vrot.slane %v5393_v54, 1  ;;  %v5891_v33 = vshrl.u32 %v7098_v59, 16  ;;  %v7631_v15 = vld [vmem:[#allocation3 + $0xd4] ss:$0 sps:$4 sm:$0x11]  }
 0x33d   : > { %5158 = vrot.lane.b32.xlu0 %v7050_v39, %s7653_s24  ;;  %4918 = vrot.lane.b32.xlu1 %v4877_v13, %s7644_s19  ;;  %v7099_v51 = vcombine.low %v4536_v7, %v10337_v32  ;;  %v5898_v26 = vshll.u32 %v7626_v20, 16  ;;  %v5391_v10 = vshrl.u32 %v7051_v57, 16  ;;  %v4568_v13 = vld [vmem:[#allocation3 + $0xc0] sm:$0xe]  ;;  %v5528_v54 = vrot.slane %v7627_v5, 1 }
 0x33e   : > { %v5927_v23 = vpop.permute.xlu0 %5926  ;;  %v7130_v42 = vcombine.low %v4568_v13, %v10302_v47  ;;  %v5896_v38 = vor.u32 %v5895_v1, %v5891_v33  ;;  %v5910_v3 = vshll.u32 %v7631_v15, 16  ;;  %v6092_v13 = vsel %vm6074_vm0, %v9692_v56, %v10308_v8 }
 0x33f   : > { %v5396_v27 = vor.u32 %v5395_v16, %v5391_v10  ;;  %v5900_v6 = vrot.slane %v5898_v26, 1  ;;  %v5905_v60 = vshll.u32 %v7099_v51, 16 }
 0x340   : > { %v10327_v21 = vpop.permute.xlu1 %5148 }
 0x341   : > { %5430 = vrot.lane.b32.xlu0 %v5389_v50, %s7646_s21  ;;  %4920 = vrot.lane.b32.xlu1 %v4889_v36, %s7644_s19  ;;  %v6036_v50 = vrot.slane %v7130_v42, 1  ;;  %v5901_v25 = vsel %vm1933_vm2, %v5896_v38, %v5900_v6  ;;  %v5907_v7 = vrot.slane %v5905_v60, 1 }
 0x342   : > { %v10331_v39 = vpop.permute.xlu0 %5658 }
 0x344   : > { %v5925_v30 = vpop.permute.xlu1 %5924 }
 0x345   : > { %v6281_v46 = vsel %vm6269_vm6, %v6248_v34, %v5925_v30  ;;  %5558 = vrot.lane.b32.xlu0 %v5526_v24, %s7654_s25  ;;  %5048 = vrot.lane.b32.xlu1 %v5017_v31, %s7645_s20  ;;  %v4569_v34 = vld [vmem:[#allocation3 + $0xcc] sm:$0xe]  ;;  %v5912_v24 = vrot.slane %v5910_v3, 1 }
 0x346   : > { %v5415_v17 = vpop.permute.xlu0 %5414  ;;  %v6313_v12 = vsel %vm3410_vm13, %v6281_v46, %v10281_v29  ;;  %v5398_v29 = vshll.u32 %v7627_v5, 16 }
 0x347   : > { %v6185_v19 = vsel %vm3344_vm10, %v6153_v11, %v5415_v17  ;;  %7305 = vmatmul.mubr.msk.bf16.gmra.mxu1 %vm6361_vm7, %v6313_v12  ;;  %v7131_v17 = vcombine.low %v4569_v34, %v10337_v32 }
 0x348   : > { %v6218_v40 = vsel %vm6204_vm5, %v6185_v19, %v10299_v22  ;;  %v4905_v53 = vpop.permute.xlu1 %4904  ;;  %v7083_v22 = vcombine.low %v4504_v0, %v10304_v18  ;;  %v5400_v47 = vrot.slane %v5398_v29, 1  ;;  %v6124_v0 = vsel %vm3311_vm9, %v6092_v13, %v10271_v41 }
 0x349   : > { %v6250_v14 = vsel %vm3377_vm11, %v6218_v40, %v10200_v52  ;;  %5670 = vrot.lane.b32.xlu0 %v7098_v59, %s7647_s22  ;;  %5160 = vrot.lane.b32.xlu1 %v7051_v57, %s7653_s24  ;;  %v5903_v57 = vshrl.u32 %v7099_v51, 16  ;;  %v6090_v31 = vsel %vm6074_vm0, %v9715_v49, %v4905_v53  ;;  %v6039_v33 = vrot.slane %v7131_v17, 1 }
 0x34a   : > { %v5147_v28 = vpop.permute.xlu0 %5146  ;;  %v6283_v35 = vsel %vm6269_vm6, %v6250_v14, %v5927_v23  ;;  %v6037_v23 = vrot.slane %v7626_v20, 1  ;;  %v5401_v18 = vsel %vm1933_vm2, %v5396_v27, %v5400_v47  ;;  %v5527_v59 = vrot.slane %v7083_v22, 1 }
 0x34b   : > { %v6315_v43 = vsel %vm3410_vm13, %v6283_v35, %v10259_v44  ;;  %v5908_v46 = vor.u32 %v5907_v7, %v5903_v57  ;;  %v6122_v1 = vsel %vm3311_vm9, %v6090_v31, %v10279_v2  ;;  %v6040_v40 = vrot.slane %v7631_v15, 1 }
 0x34c   : > { %7308 = vmatprep.mubr.msk.bf16.mxu1 %vm6361_vm7, %v6315_v43  ;;  %v5657_v52 = vpop.permute.xlu1 %5656  ;;  %v6038_v20 = vsel %vm2206_vm3, %v6036_v50, %v6037_v23  ;;  %v5529_v11 = vsel %vm2206_vm3, %v5527_v59, %v5528_v54  ;;  %v6155_v10 = vsel %vm6139_vm4, %v6122_v1, %v10192_v63  ;;  %v6157_v35 = vsel %vm6139_vm4, %v6124_v0, %v5147_v28 }
 0x34d   : > { %5942 = vrot.lane.b32.xlu0 %v5901_v25, %s7655_s28  ;;  %5432 = vrot.lane.b32.xlu1 %v5401_v18, %s7646_s21  ;;  %v5913_v19 = vsel %vm1933_vm2, %v5908_v46, %v5912_v24  ;;  %v6041_v49 = vsel %vm2206_vm3, %v6039_v33, %v6040_v40 }
 0x34e   : > { %v6059_v36 = vpop.permute.xlu0 %6058 }
 0x350   : > { %v10371_v44 = vpop.permute.xlu1 %5548 }
 0x351   : > { %6070 = vrot.lane.b32.xlu0 %v6038_v20, %s7651_s26  ;;  %5560 = vrot.lane.b32.xlu1 %v5529_v11, %s7654_s25 }
 0x352   : > { %v5039_v30 = vpop.permute.xlu0 %5038 }
 0x354   : > { %v5037_v5 = vpop.permute.xlu1 %5036 }
 0x355   : > { %5672 = vrot.lane.b32.xlu1 %v7099_v51, %s7647_s22  ;;  %v6187_v51 = vsel %vm3344_vm10, %v6155_v10, %v10290_v4 }
 0x356   : > { %v6057_v12 = vpop.permute.xlu0 %6056  ;;  %v6220_v29 = vsel %vm6204_vm5, %v6187_v51, %v10265_v37 }
 0x357   : > { %v6252_v14 = vsel %vm3377_vm11, %v6220_v29, %v5657_v52 }
 0x358   : > { %v5421_v16 = vpop.permute.xlu1 %5420 }
 0x359   : > { %5944 = vrot.lane.b32.xlu1 %v5913_v19, %s7655_s28 }
 0x35a   : > { %v5547_v26 = vpop.permute.xlu0 %5546 }
 0x35c   : > { %v4911_v32 = vpop.permute.xlu1 %4910 }
 0x35d   : > { %6072 = vrot.lane.b32.xlu1 %v6041_v49, %s7651_s26  ;;  %v6096_v50 = vsel %vm6074_vm0, %v9811_v9, %v4911_v32 }
 0x35e   : > { %v5931_v53 = vpop.permute.xlu0 %5930 }
 0x360   : > { %v5153_v2 = vpop.permute.xlu1 %5152 }
 0x362   : > { %v5663_v63 = vpop.permute.xlu0 %5662 }
 0x364   : > { %v5929_v42 = vpop.permute.xlu1 %5928 }
 0x365   : > { %v6285_v4 = vsel %vm6269_vm6, %v6252_v14, %v5929_v42 }
 0x366   : > { %v5419_v38 = vpop.permute.xlu0 %5418  ;;  %v6317_v27 = vsel %vm3410_vm13, %v6285_v4, %v6057_v12 }
 0x367   : > { %v6189_v37 = vsel %vm3344_vm10, %v6157_v35, %v5419_v38  ;;  %7309 = vmatmul.mubr.msk.bf16.gmra.mxu1 %vm6361_vm7, %v6317_v27 }
 0x368   : > { %v6222_v56 = vsel %vm6204_vm5, %v6189_v37, %v5547_v26  ;;  %v4909_v8 = vpop.permute.xlu1 %4908 }
 0x369   : > { %v6254_v22 = vsel %vm3377_vm11, %v6222_v56, %v10331_v39  ;;  %v6094_v6 = vsel %vm6074_vm0, %v9834_v45, %v4909_v8 }
 0x36a   : > { %v5151_v43 = vpop.permute.xlu0 %5150  ;;  %v6287_v41 = vsel %vm6269_vm6, %v6254_v22, %v5931_v53  ;;  %v6126_v15 = vsel %vm3311_vm9, %v6094_v6, %v5037_v5 }
 0x36b   : > { %v6319_v52 = vsel %vm3410_vm13, %v6287_v41, %v6059_v36  ;;  %v6159_v39 = vsel %vm6139_vm4, %v6126_v15, %v10327_v21  ;;  %v6128_v36 = vsel %vm3311_vm9, %v6096_v50, %v5039_v30 }
 0x36c   : > { %7312 = vmatprep.mubr.msk.bf16.mxu1 %vm6361_vm7, %v6319_v52  ;;  %v5661_v28 = vpop.permute.xlu1 %5660  ;;  %v6161_v18 = vsel %vm6139_vm4, %v6128_v36, %v5151_v43  ;;  %v6191_v59 = vsel %vm3344_vm10, %v6159_v39, %v5421_v16 }
 0x36d   : > { %v6224_v9 = vsel %vm6204_vm5, %v6191_v59, %v10371_v44 }
 0x36e   : > { %v6061_v47 = vpop.permute.xlu0 %6060  ;;  %v6256_v21 = vsel %vm3377_vm11, %v6224_v9, %v5661_v28 }
 0x370   : > { %v5553_v60 = vpop.permute.xlu1 %5552 }
 0x372   : > { %v5551_v23 = vpop.permute.xlu0 %5550 }
 0x374   : > { %v5041_v25 = vpop.permute.xlu1 %5040 }
 0x376   : > { %v5423_v54 = vpop.permute.xlu0 %5422 }
 0x377   : > { %v6193_v45 = vsel %vm3344_vm10, %v6161_v18, %v5423_v54 }
 0x378   : > { %v6226_v57 = vsel %vm6204_vm5, %v6193_v45, %v5551_v23  ;;  %v5425_v7 = vpop.permute.xlu1 %5424 }
 0x379   : > { %v6258_v34 = vsel %vm3377_vm11, %v6226_v57, %v5663_v63 }
 0x37a   : > { %v5935_v3 = vpop.permute.xlu0 %5934 }
 0x37b   : > { %v6291_v11 = vsel %vm6269_vm6, %v6258_v34, %v5935_v3 }
 0x37c   : > { %v5933_v20 = vpop.permute.xlu1 %5932 }
 0x37d   : > { %v6289_v30 = vsel %vm6269_vm6, %v6256_v21, %v5933_v20 }
 0x37e   : > { %v6063_v5 = vpop.permute.xlu0 %6062  ;;  %v6321_v46 = vsel %vm3410_vm13, %v6289_v30, %v6061_v47 }
 0x37f   : > { %v6323_v24 = vsel %vm3410_vm13, %v6291_v11, %v6063_v5  ;;  %7313 = vmatmul.mubr.msk.bf16.gmra.mxu1 %vm6361_vm7, %v6321_v46 }
 0x380   : > { %7316 = vmatprep.mubr.msk.bf16.mxu1 %vm6361_vm7, %v6323_v24  ;;  %v4913_v44 = vpop.permute.xlu1 %4912 }
 0x381   : > { %v6098_v17 = vsel %vm6074_vm0, %v9991_v62, %v4913_v44 }
 0x382   : > { %v6130_v31 = vsel %vm3311_vm9, %v6098_v17, %v5041_v25 }
 0x383   : > { %v6163_v12 = vsel %vm6139_vm4, %v6130_v31, %v5153_v2 }
 0x384   : > { %v5665_v1 = vpop.permute.xlu1 %5664  ;;  %v6195_v16 = vsel %vm3344_vm10, %v6163_v12, %v5425_v7  ;;  %v10475_v12 = vld [vmem:[%s10592_s5] ss:$0 sm:$0xff] }
 0x385   : > { %v6065_v19 = vpop.permute.xlu0 %6064  ;;  %v6228_v40 = vsel %vm6204_vm5, %v6195_v16, %v5553_v60 }
 0x386   : > { %v6260_v10 = vsel %vm3377_vm11, %v6228_v40, %v5665_v1 }
 0x388   : > { %v4915_v33 = vpop.permute.xlu1 %4914 }
 0x389   : > { %v5043_v26 = vpop.permute.xlu0 %5042  ;;  %v6100_v14 = vsel %vm6074_vm0, %v10053_v55, %v4915_v33 }
 0x38a   : > { %v6132_v4 = vsel %vm3311_vm9, %v6100_v14, %v5043_v26 }
 0x38c   : > { %v5937_v32 = vpop.permute.xlu1 %5936 }
 0x38d   : > { %v6293_v49 = vsel %vm6269_vm6, %v6260_v10, %v5937_v32  ;;  %v5155_v62 = vpop.permute.xlu0 %5154 }
 0x38e   : > { %v6325_v51 = vsel %vm3410_vm13, %v6293_v49, %v6065_v19  ;;  %v6165_v35 = vsel %vm6139_vm4, %v6132_v4, %v5155_v62 }
 0x38f   : > { %7317 = vmatmul.mubr.msk.bf16.gmra.mxu1 %vm6361_vm7, %v6325_v51 }
 0x390   : > { %v4917_v53 = vpop.permute.xlu1 %4916 }
 0x391   : > { %v5427_v2 = vpop.permute.xlu0 %5426  ;;  %v6102_v55 = vsel %vm6074_vm0, %v10123_v61, %v4917_v53 }
 0x392   : > { %v6197_v27 = vsel %vm3344_vm10, %v6165_v35, %v5427_v2 }
 0x394   : > { %v5045_v29 = vpop.permute.xlu1 %5044 }
 0x395   : > { %v5555_v13 = vpop.permute.xlu0 %5554  ;;  %v6134_v52 = vsel %vm3311_vm9, %v6102_v55, %v5045_v29 }
 0x396   : > { %v6230_v37 = vsel %vm6204_vm5, %v6197_v27, %v5555_v13 }
 0x398   : > { %v5157_v63 = vpop.permute.xlu1 %5156 }
 0x399   : > { %v5667_v42 = vpop.permute.xlu0 %5666  ;;  %v6167_v47 = vsel %vm6139_vm4, %v6134_v52, %v5157_v63 }
 0x39a   : > { %v6262_v56 = vsel %vm3377_vm11, %v6230_v37, %v5667_v42 }
 0x39c   : > { %v5429_v0 = vpop.permute.xlu1 %5428 }
 0x39d   : > { %v5939_v38 = vpop.permute.xlu0 %5938  ;;  %v6199_v15 = vsel %vm3344_vm10, %v6167_v47, %v5429_v0 }
 0x39e   : > { %v6295_v8 = vsel %vm6269_vm6, %v6262_v56, %v5939_v38 }
 0x3a0   : > { %v5557_v22 = vpop.permute.xlu1 %5556 }
 0x3a1   : > { %v6067_v43 = vpop.permute.xlu0 %6066  ;;  %v6232_v60 = vsel %vm6204_vm5, %v6199_v15, %v5557_v22 }
 0x3a2   : > { %v6327_v41 = vsel %vm3410_vm13, %v6295_v8, %v6067_v43 }
 0x3a3   : > { %7320 = vmatprep.mubr.msk.bf16.mxu1 %vm6361_vm7, %v6327_v41 }
 0x3a4   : > { %v5669_v28 = vpop.permute.xlu1 %5668 }
 0x3a5   : > { %v6264_v50 = vsel %vm3377_vm11, %v6232_v60, %v5669_v28 }
 0x3a7   : > { %v6069_v6 = vpop.permute.xlu0 %6068 }
 0x3ab   : > { %v5047_v23 = vpop.permute.xlu0 %5046  ;;  %v5941_v39 = vpop.permute.xlu1 %5940 }
 0x3ac   : > { %v6297_v25 = vsel %vm6269_vm6, %v6264_v50, %v5941_v39 }
 0x3ad   : > { %v6329_v36 = vsel %vm3410_vm13, %v6297_v25, %v6069_v6 }
 0x3ae   : > { %7321 = vmatmul.mubr.msk.bf16.gmra.mxu1 %vm6361_vm7, %v6329_v36 }
 0x3af   : > { %v5159_v61 = vpop.permute.xlu0 %5158  ;;  %v4919_v18 = vpop.permute.xlu1 %4918 }
 0x3b0   : > { %v6104_v45 = vsel %vm6074_vm0, %v10255_v58, %v4919_v18 }
 0x3b1   : > { %v6136_v9 = vsel %vm3311_vm9, %v6104_v45, %v5047_v23 }
 0x3b2   : > { %v6169_v21 = vsel %vm6139_vm4, %v6136_v9, %v5159_v61 }
 0x3b3   : > { %v5431_v59 = vpop.permute.xlu0 %5430  ;;  %v4921_v54 = vpop.permute.xlu1 %4920 }
 0x3b4   : > { %v6201_v11 = vsel %vm3344_vm10, %v6169_v21, %v5431_v59  ;;  %v6106_v33 = vsel %vm6074_vm0, %v10285_v48, %v4921_v54 }
 0x3b7   : > { %v5559_v57 = vpop.permute.xlu0 %5558  ;;  %v5049_v7 = vpop.permute.xlu1 %5048 }
 0x3b8   : > { %v6234_v5 = vsel %vm6204_vm5, %v6201_v11, %v5559_v57  ;;  %v6138_v26 = vsel %vm3311_vm9, %v6106_v33, %v5049_v7 }
 0x3bb   : > { %v5671_v3 = vpop.permute.xlu0 %5670  ;;  %v5161_v34 = vpop.permute.xlu1 %5160 }
 0x3bc   : > { %v6266_v46 = vsel %vm3377_vm11, %v6234_v5, %v5671_v3  ;;  %v6171_v49 = vsel %vm6139_vm4, %v6138_v26, %v5161_v34 }
 0x3bf   : > { %v5943_v20 = vpop.permute.xlu0 %5942  ;;  %v5433_v30 = vpop.permute.xlu1 %5432 }
 0x3c0   : > { %v6299_v24 = vsel %vm6269_vm6, %v6266_v46, %v5943_v20  ;;  %v6203_v53 = vsel %vm3344_vm10, %v6171_v49, %v5433_v30 }
 0x3c3   : > { %v6071_v44 = vpop.permute.xlu0 %6070  ;;  %v5561_v58 = vpop.permute.xlu1 %5560 }
 0x3c4   : > { %v6331_v17 = vsel %vm3410_vm13, %v6299_v24, %v6071_v44  ;;  %v6236_v63 = vsel %vm6204_vm5, %v6203_v53, %v5561_v58  ;;  %v10522_v58 = vld [vmem:[%s10593_s6] sm:$0x3] }
 0x3c5   : > { %7324 = vmatprep.mubr.msk.bf16.mxu1 %vm6361_vm7, %v6331_v17  ;;  %v6608_v17 = vld [vmem:[%s10594_s7] sm:$0x7] }
 0x3c7   : > { %v7298_v31 = vpop.f32.mrf.mxu1  ;;  %v5673_v1 = vpop.permute.xlu1 %5672 }
 0x3c8   : > { %v6441_v19 = vadd.f32 %v7298_v31, %v10475_v12  ;;  %v6268_v48 = vsel %vm3377_vm11, %v6236_v63, %v5673_v1  ;;  %v7656_v31 = vmov 0  }
 0x3c9   : > { %v6432_v16 = vpop.f32.mrf.mxu1  ;;  %7360 = vset.pattern.permute.xlu0 %v7656_v31 }
 0x3ca   : > { %v6433_v10 = vadd.f32 %v10475_v12, %v6432_v16  ;;  %v6561_v2 = vmax.f32 %v6441_v19, 0.0  ;;  %6611 = vperm.xlu0 %7360, %v6608_v17  }
 0x3cb   : > { %v7299_v40 = vpop.f32.mrf.mxu1  ;;  %v5945_v51 = vpop.permute.xlu1 %5944 }
 0x3cc   : > { %v6444_v32 = vadd.f32 %v7299_v40, %v10475_v12  ;;  %v6559_v14 = vmax.f32 %v6433_v10, 0.0  ;;  %v6301_v4 = vsel %vm6269_vm6, %v6268_v48, %v5945_v51 }
 0x3cd   : > { %v6435_v62 = vpop.f32.mrf.mxu1 }
 0x3ce   : > { %v6562_v29 = vmax.f32 %v6444_v32, 0.0  ;;  %v6436_v13 = vadd.f32 %v10475_v12, %v6435_v62 }
 0x3cf   : > { %v6073_v35 = vpop.permute.xlu1 %6072 }
 0x3d0   : > { %v10488_v42 = vpack.c.bf16 %v6562_v29, %v6561_v2  ;;  %v6560_v0 = vmax.f32 %v6436_v13, 0.0  ;;  %v6333_v27 = vsel %vm3410_vm13, %v6301_v4, %v6073_v35 }
 0x3d1   : > { %7325 = vmatmul.mubr.msk.bf16.gmra.mxu1 %vm6361_vm7, %v6333_v27 }
 0x3d2   : > { %v10491_v38 = vpack.c.bf16 %v6560_v0, %v6559_v14  ;;  %7246 = vmatprep.mubr.msk.bf16.mxu1 %vm6074_vm0, %v10522_v58 }
 0x3e7   : > { %v7302_v37 = vpop.f32.mrf.mxu1 }
 0x3e8   : > { %v6457_v8 = vadd.f32 %v7302_v37, %v10475_v12 }
 0x3e9   : > { %v6448_v56 = vpop.f32.mrf.mxu1 }
 0x3ea   : > { %v6449_v43 = vadd.f32 %v10475_v12, %v6448_v56  ;;  %v6565_v52 = vmax.f32 %v6457_v8, 0.0 }
 0x3eb   : > { %v7303_v22 = vpop.f32.mrf.mxu1 }
 0x3ec   : > { %v6460_v41 = vadd.f32 %v7303_v22, %v10475_v12  ;;  %v6563_v47 = vmax.f32 %v6449_v43, 0.0 }
 0x3ed   : > { %v6451_v55 = vpop.f32.mrf.mxu1 }
 0x3ee   : > { %v6566_v28 = vmax.f32 %v6460_v41, 0.0  ;;  %v6452_v6 = vadd.f32 %v10475_v12, %v6451_v55 }
 0x3f0   : > { %v10499_v15 = vpack.c.bf16 %v6566_v28, %v6565_v52  ;;  %v6564_v60 = vmax.f32 %v6452_v6, 0.0 }
 0x3f2   : > { %v10501_v50 = vpack.c.bf16 %v6564_v60, %v6563_v47 }
 0x407   : > { %v10503_v23 = vpop.f32.mrf.mxu1 }
 0x409   : > { %v10505_v39 = vpop.f32.mrf.mxu1 }
 0x40b   : > { %v10507_v25 = vpop.f32.mrf.mxu1 }
 0x40d   : > { %v10509_v36 = vpop.f32.mrf.mxu1 }
 0x427   : > { %v7310_v61 = vpop.f32.mrf.mxu1 }
 0x428   : > { %v6489_v62 = vadd.f32 %v7310_v61, %v10475_v12  ;;  %v6476_v61 = vadd.f32 %v10507_v25, %v10475_v12  ;;  %v6468_v25 = vadd.f32 %v10475_v12, %v10509_v36 }
 0x429   : > { %v6480_v18 = vpop.f32.mrf.mxu1 }
 0x42a   : > { %v6573_v63 = vmax.f32 %v6489_v62, 0.0  ;;  %v6481_v8 = vadd.f32 %v10475_v12, %v6480_v18 }
 0x42b   : > { %v7311_v59 = vpop.f32.mrf.mxu1 }
 0x42c   : > { %v6492_v49 = vadd.f32 %v7311_v59, %v10475_v12  ;;  %v6571_v47 = vmax.f32 %v6481_v8, 0.0 }
 0x42d   : > { %v6483_v54 = vpop.f32.mrf.mxu1 }
 0x42e   : > { %v6574_v2 = vmax.f32 %v6492_v49, 0.0  ;;  %v6484_v0 = vadd.f32 %v10475_v12, %v6483_v54  ;;  %v6473_v54 = vadd.f32 %v10503_v23, %v10475_v12  ;;  %v6465_v23 = vadd.f32 %v10475_v12, %v10505_v39 }
 0x430   : > { %v6598_v35 = vpack.c.bf16 %v6574_v2, %v6573_v63  ;;  %v6572_v55 = vmax.f32 %v6484_v0, 0.0  ;;  %v6627_v2 = vsel %vm6074_vm0, %v10499_v15, 0  ;;  %v6618_v15 = vsel %vm6074_vm0, %v10491_v38, 0 }
 0x432   : > { %v6639_v6 = vsel %vm6074_vm0, %v6598_v35, 0  ;;  %v6597_v18 = vpack.c.bf16 %v6572_v55, %v6571_v47 }
 0x43f   : > { %v7314_v45 = vpop.f32.mrf.mxu1 }
 0x440   : > { %v6505_v7 = vadd.f32 %v7314_v45, %v10475_v12 }
 0x441   : > { %v6496_v57 = vpop.f32.mrf.mxu1 }
 0x442   : > { %v6497_v3 = vadd.f32 %v10475_v12, %v6496_v57  ;;  %v6577_v20 = vmax.f32 %v6505_v7, 0.0  ;;  %v6570_v57 = vmax.f32 %v6476_v61, 0.0 }
 0x443   : > { %v7315_v9 = vpop.f32.mrf.mxu1 }
 0x444   : > { %v6508_v34 = vadd.f32 %v7315_v9, %v10475_v12  ;;  %v6575_v5 = vmax.f32 %v6497_v3, 0.0  ;;  %v6636_v3 = vsel %vm6074_vm0, %v6597_v18, 0 }
 0x445   : > { %v6499_v21 = vpop.f32.mrf.mxu1 }
 0x446   : > { %v6578_v30 = vmax.f32 %v6508_v34, 0.0  ;;  %v6500_v11 = vadd.f32 %v10475_v12, %v6499_v21  ;;  %v6569_v34 = vmax.f32 %v6473_v54, 0.0 }
 0x448   : > { %v10515_v46 = vpack.c.bf16 %v6578_v30, %v6577_v20  ;;  %v6576_v24 = vmax.f32 %v6500_v11, 0.0  ;;  %v6596_v20 = vpack.c.bf16 %v6570_v57, %v6569_v34 }
 0x44a   : > { %v10517_v44 = vpack.c.bf16 %v6576_v24, %v6575_v5  ;;  %v6568_v5 = vmax.f32 %v6468_v25, 0.0  ;;  %v6633_v31 = vsel %vm6074_vm0, %v6596_v20, 0 }
 0x44f   : > { %v7318_v1 = vpop.f32.mrf.mxu1 }
 0x451   : > { %v10529_v16 = vpop.f32.mrf.mxu1 }
 0x453   : > { %v7319_v19 = vpop.f32.mrf.mxu1 }
 0x454   : > { %v6524_v24 = vadd.f32 %v7319_v19, %v10475_v12  ;;  %v6513_v19 = vadd.f32 %v10475_v12, %v10529_v16  ;;  %v6612_v16 = vpop.permute.xlu0 %6611 }
 0x455   : > { %v10531_v33 = vpop.f32.mrf.mxu1 }
 0x456   : > { %v6516_v39 = vadd.f32 %v10475_v12, %v10531_v33  ;;  %v6624_v33 = vsel %vm6074_vm0, %v10501_v50, 0 }
 0x458   : > { %v6580_v62 = vmax.f32 %v6516_v39, 0.0 }
 0x46e   : > { %v7322_v40 = vpop.f32.mrf.mxu1 }
 0x46f   : > { %v6537_v60 = vadd.f32 %v7322_v40, %v10475_v12  ;;  %v6567_v40 = vmax.f32 %v6465_v23, 0.0 }
 0x470   : > { %v6528_v26 = vpop.f32.mrf.mxu1 }
 0x471   : > { %v6585_v45 = vmax.f32 %v6537_v60, 0.0  ;;  %v6529_v21 = vadd.f32 %v10475_v12, %v6528_v26  ;;  %v6521_v26 = vadd.f32 %v7318_v1, %v10475_v12 }
 0x472   : > { %v7323_v10 = vpop.f32.mrf.mxu1 }
 0x473   : > { %v6540_v52 = vadd.f32 %v7323_v10, %v10475_v12  ;;  %v6583_v11 = vmax.f32 %v6529_v21, 0.0  ;;  %v6595_v10 = vpack.c.bf16 %v6568_v5, %v6567_v40  ;;  %v6581_v36 = vmax.f32 %v6521_v26, 0.0 }
 0x474   : > { %v6531_v32 = vpop.f32.mrf.mxu1 }
 0x475   : > { %v6586_v59 = vmax.f32 %v6540_v52, 0.0  ;;  %v6532_v9 = vadd.f32 %v10475_v12, %v6531_v32  ;;  %v6582_v32 = vmax.f32 %v6524_v24, 0.0 }
 0x477   : > { %v6604_v7 = vpack.c.bf16 %v6586_v59, %v6585_v45  ;;  %v6584_v30 = vmax.f32 %v6532_v9, 0.0  ;;  %v6602_v49 = vpack.c.bf16 %v6582_v32, %v6581_v36 }
 0x479   : > { %v6603_v17 = vpack.c.bf16 %v6584_v30, %v6583_v11 }
 0x491   : > { %v7326_v51 = vpop.f32.mrf.mxu1 }
 0x492   : > { %v6553_v29 = vadd.f32 %v7326_v51, %v10475_v12  ;;  %v6630_v51 = vsel %vm6074_vm0, %v6595_v10, 0 }
 0x493   : > { %v6544_v53 = vpop.f32.mrf.mxu1 }
 0x494   : > { %v6545_v48 = vadd.f32 %v10475_v12, %v6544_v53  ;;  %v6589_v27 = vmax.f32 %v6553_v29, 0.0  ;;  %v6579_v53 = vmax.f32 %v6513_v19, 0.0 }
 0x495   : > { %v7327_v13 = vpop.f32.mrf.mxu1 }
 0x496   : > { %v6556_v14 = vadd.f32 %v7327_v13, %v10475_v12  ;;  %v6587_v22 = vmax.f32 %v6545_v48, 0.0  ;;  %v6601_v1 = vpack.c.bf16 %v6580_v62, %v6579_v53 }
 0x497   : > { %v6547_v4 = vpop.f32.mrf.mxu1 }
 0x498   : > { %v6590_v37 = vmax.f32 %v6556_v14, 0.0  ;;  %v6548_v56 = vadd.f32 %v10475_v12, %v6547_v4  ;;  %v6621_v12 = vsel %vm6074_vm0, %v10488_v42, 0 }
 0x49a   : > { %v6606_v43 = vpack.c.bf16 %v6590_v37, %v6589_v27  ;;  %v6588_v41 = vmax.f32 %v6548_v56, 0.0 }
 0x49c   : > { %v6605_v28 = vpack.c.bf16 %v6588_v41, %v6587_v22  ;;  %7330 = vmatprep.subr.msk.bf16.mxu1 %vm6074_vm0, %v6606_v43 }
 0x49d   : > { %7231 = vmatpush3.bf16.xpose.msra.mxu1 %v6639_v6 }
 0x49e   : > { %7331 = vmatprep.subr.msk.bf16.mxu1 %vm6074_vm0, %v6605_v28 }
 0x4a5   : > { %7233 = vmatpush3.bf16.xpose.msra.mxu1 %v6636_v3 }
 0x4a6   : > { %7332 = vmatprep.subr.msk.bf16.mxu1 %vm6074_vm0, %v6604_v7 }
 0x4ad   : > { %7235 = vmatpush3.bf16.xpose.msra.mxu1 %v6633_v31 }
 0x4ae   : > { %7333 = vmatprep.subr.msk.bf16.mxu1 %vm6074_vm0, %v6603_v17 }
 0x4b5   : > { %7237 = vmatpush3.bf16.xpose.msra.mxu1 %v6630_v51 }
 0x4b6   : > { %7334 = vmatprep.subr.msk.bf16.mxu1 %vm6074_vm0, %v6602_v49 }
 0x4bd   : > { %7239 = vmatpush3.bf16.xpose.msra.mxu1 %v6627_v2 }
 0x4be   : > { %7335 = vmatprep.subr.msk.bf16.mxu1 %vm6074_vm0, %v6601_v1 }
 0x4c5   : > { %7241 = vmatpush3.bf16.xpose.msra.mxu1 %v6624_v33 }
 0x4c6   : > { %7336 = vmatprep.subr.msk.bf16.mxu1 %vm6074_vm0, %v10515_v46 }
 0x4cd   : > { %7243 = vmatpush3.bf16.xpose.msra.mxu1 %v6621_v12 }
 0x4ce   : > { %7337 = vmatprep.subr.msk.bf16.mxu1 %vm6074_vm0, %v10517_v44 }
 0x4d5   : > { %7245 = vmatpush3.bf16.xpose.msra.mxu1 %v6618_v15 }
 0x4dc   : > { %7247 = vmatmul.mubr.msk.bf16.vlgmr.msra.gmra.mxu1 %vm6074_vm0, %v10522_v58 }
 0x59c   : > { %v6699_v50 = vpop.f32.mrf.mxu1 }
 0x59d   : > { %v6700_v13 = vadd.f32 %v6699_v50, %v6612_v16 }
 0x59e   : > { %v6701_v29 = vpop.f32.mrf.mxu1 }
 0x59f   : > { %v6702_v63 = vadd.f32 %v6701_v29, %v6612_v16 }
 0x5a0   : > { %v6703_v46 = vpop.f32.mrf.mxu1 }
 0x5a1   : > { %v6708_v48 = vcombine.low %v6700_v13, %v6702_v63 }
 0x5a2   : > { %v6704_v14 = vpop.f32.mrf.mxu1 }
 0x5a3   : > { %6710 = vst [vmem:[%s7723_s18] sm:$0x77] %v6708_v48 }
 0x5a4 PF: > { %s18_s27 = sadd.s32 1, %s7641_s27  }
 0x5a5   : > { %p15_p5 = scmp.ge.s32.totalorder %s18_s27, 4  }
 0x5a7   :  { %17 = sbr.rel (!%p15_p5) target bundleno = 1 (0x1), region = 95 }

</bundles_post_ra>
